<compile_context>
chip_gen: v6e
topology: v6e:2x2x1
jax: 0.10.0
libtpu: 0.0.40
codegen_flags: <defaults>
</compile_context>

<pallas_src>
import jax
import jax.numpy as jnp
from jax.experimental import pallas as pl
from jax.experimental.pallas import tpu as pltpu

INPUT_SIZE = 832
HIDDEN_SIZES = (1024, 512, 256)
OUTPUT_SIZE = 1747

# Lane-dense (multiple-of-128) padded dims used inside the kernel.
IN_PAD = 896     # 7 * 128
OUT_PAD = 1792   # 14 * 128

SMALL_BATCH = 128   # at/below this, run a single grid step (weight-DMA-bound regime)
BATCH_TILE = 256    # max rows per grid step for large B


def _round_up(n, m):
    return ((n + m - 1) // m) * m


def _qnet_kernel(x_ref,
                 w1_ref, s1_ref, b1_ref,
                 w2_ref, s2_ref, b2_ref,
                 w3_ref, s3_ref, b3_ref,
                 w4_ref, s4_ref, b4_ref,
                 o_ref):
    """Fused 4-layer MLP.  x_ref is bf16; weights are int8 (+ per-channel f32 scale);
    matmuls run bf16 x bf16 on the MXU with f32 accumulation; scale/bias/ReLU in f32."""

    def layer(h_bf16, w_ref, s_ref, b_ref, relu):
        # int8 -> bf16 is exact (|q| <= 127); per-output-channel dequant scale is
        # applied in f32 after the matmul (cheaper and more accurate than dequantizing
        # the full weight matrix to bf16).
        acc = jnp.dot(h_bf16, w_ref[...].astype(jnp.bfloat16),
                      preferred_element_type=jnp.float32)
        acc = acc * s_ref[...] + b_ref[...]
        if relu:
            acc = jnp.maximum(acc, 0.0)
        return acc

    h = layer(x_ref[...], w1_ref, s1_ref, b1_ref, True).astype(jnp.bfloat16)
    h = layer(h, w2_ref, s2_ref, b2_ref, True).astype(jnp.bfloat16)
    h = layer(h, w3_ref, s3_ref, b3_ref, True).astype(jnp.bfloat16)
    o_ref[...] = layer(h, w4_ref, s4_ref, b4_ref, False).astype(o_ref.dtype)


def _resident_spec(shape):
    # Full-extent block with a constant index_map: loaded once and reused (not
    # re-fetched) across all batch-grid iterations.
    return pl.BlockSpec(shape, lambda i: (0,) * len(shape))


@jax.jit
def qnetwork_forward(x, kparams):
    """x: (B, INPUT_SIZE) float32.  kparams: output of prepare_params()."""
    B = x.shape[0]
    w1, s1, b1 = kparams["w1"], kparams["s1"], kparams["b1"]
    w2, s2, b2 = kparams["w2"], kparams["s2"], kparams["b2"]
    w3, s3, b3 = kparams["w3"], kparams["s3"], kparams["b3"]
    w4, s4, b4 = kparams["w4"], kparams["s4"], kparams["b4"]

    # Cast to bf16 and pad the feature axis to the lane-dense kernel layout in one
    # fused XLA op (zero feature columns meet zero-padded w1 rows -> numerically
    # transparent).
    x_pad = jnp.pad(x.astype(jnp.bfloat16), ((0, 0), (0, IN_PAD - INPUT_SIZE)))

    if B <= SMALL_BATCH:
        # Small-batch / weight-DMA-bound regime: one grid step, no batch padding.
        tb, grid_b, b_pad = B, 1, B
    else:
        # Large-batch regime: >= 2 batch tiles (so the "parallel" axis can shard across
        # v7x's two TensorCores), capped at BATCH_TILE rows, rounded to a multiple of 16
        # (bf16 sublane packing).
        tb = min(BATCH_TILE, _round_up(pl.cdiv(B, 2), 16))
        grid_b = pl.cdiv(B, tb)
        b_pad = grid_b * tb
        x_pad = jnp.pad(x_pad, ((0, b_pad - B), (0, 0)))

    param_bytes = sum(int(a.size) * a.dtype.itemsize
                      for a in (w1, s1, b1, w2, s2, b2, w3, s3, b3, w4, s4, b4))
    cost = pl.CostEstimate(
        flops=2 * b_pad * (IN_PAD * 1024 + 1024 * 512 + 512 * 256 + 256 * OUT_PAD),
        transcendentals=0,
        bytes_accessed=param_bytes + int(x_pad.size) * 2 + b_pad * OUT_PAD * 4,
    )

    out = pl.pallas_call(
        _qnet_kernel,
        out_shape=jax.ShapeDtypeStruct((b_pad, OUT_PAD), jnp.float32),
        grid=(grid_b,),
        in_specs=[
            pl.BlockSpec((tb, IN_PAD), lambda i: (i, 0)),
            _resident_spec(w1.shape), _resident_spec(s1.shape), _resident_spec(b1.shape),
            _resident_spec(w2.shape), _resident_spec(s2.shape), _resident_spec(b2.shape),
            _resident_spec(w3.shape), _resident_spec(s3.shape), _resident_spec(b3.shape),
            _resident_spec(w4.shape), _resident_spec(s4.shape), _resident_spec(b4.shape),
        ],
        out_specs=pl.BlockSpec((tb, OUT_PAD), lambda i: (i, 0)),
        compiler_params=pltpu.CompilerParams(
            dimension_semantics=("parallel",),
            vmem_limit_bytes=32 * 1024 * 1024,   # portable: v7x has 64 MiB physical VMEM
        ),
        cost_estimate=cost,
    )(x_pad,
      w1, s1, b1, w2, s2, b2, w3, s3, b3, w4, s4, b4)

    return out[:B, :OUTPUT_SIZE]


def init_params(key):
    """PyTorch nn.Linear-style init; logical (unpadded) f32 parameters.

    w{i}: (in_features, out_features) == transpose of torch's .weight; b{i}: (out,).
    """
    dims = (INPUT_SIZE,) + HIDDEN_SIZES + (OUTPUT_SIZE,)
    params = {}
    for i in range(4):
        fan_in, fan_out = dims[i], dims[i + 1]
        key, kw, kb = jax.random.split(key, 3)
        bound = 1.0 / jnp.sqrt(fan_in)
        params[f"w{i + 1}"] = jax.random.uniform(
            kw, (fan_in, fan_out), jnp.float32, -bound, bound)
        params[f"b{i + 1}"] = jax.random.uniform(
            kb, (fan_out,), jnp.float32, -bound, bound)
    return params


def _quantize_int8(w):
    """Symmetric per-output-channel int8 quantization. Returns (q_int8, scale_f32)."""
    amax = jnp.max(jnp.abs(w), axis=0, keepdims=True)          # (1, out)
    scale = jnp.maximum(amax, 1e-8) / 127.0                    # guard all-zero columns
    q = jnp.clip(jnp.round(w / scale), -127.0, 127.0).astype(jnp.int8)
    return q, scale.astype(jnp.float32)


def prepare_params(params):
    """One-time conversion to the kernel layout: lane-dense zero padding
    (w1 rows 832->896, w4/b4 cols 1747->1792), int8 weights + per-channel f32 scales,
    (1, n) f32 biases."""
    w1 = jnp.pad(params["w1"], ((0, IN_PAD - INPUT_SIZE), (0, 0)))
    w4 = jnp.pad(params["w4"], ((0, 0), (0, OUT_PAD - OUTPUT_SIZE)))
    b4 = jnp.pad(params["b4"], ((0, OUT_PAD - OUTPUT_SIZE),))

    q1, s1 = _quantize_int8(w1)
    q2, s2 = _quantize_int8(params["w2"])
    q3, s3 = _quantize_int8(params["w3"])
    q4, s4 = _quantize_int8(w4)

    return {
        "w1": q1, "s1": s1, "b1": params["b1"].reshape(1, -1).astype(jnp.float32),
        "w2": q2, "s2": s2, "b2": params["b2"].reshape(1, -1).astype(jnp.float32),
        "w3": q3, "s3": s3, "b3": params["b3"].reshape(1, -1).astype(jnp.float32),
        "w4": q4, "s4": s4, "b4": b4.reshape(1, -1).astype(jnp.float32),
    }


def reference_forward_f32(x, params):
    """Pure-f32 equivalent of the PyTorch module (semantic sanity check)."""
    h = jnp.maximum(x @ params["w1"] + params["b1"], 0.0)
    h = jnp.maximum(h @ params["w2"] + params["b2"], 0.0)
    h = jnp.maximum(h @ params["w3"] + params["b3"], 0.0)
    return h @ params["w4"] + params["b4"]


def reference_forward_quant(x, kparams):
    """Reference matching the kernel's numerics: bf16 activations, int8->bf16 weights on
    the MXU with f32 accumulation, per-channel f32 scale + bias applied post-matmul."""
    def layer(h, w_q, s, b, relu):
        acc = jnp.dot(h.astype(jnp.bfloat16), w_q.astype(jnp.bfloat16),
                      preferred_element_type=jnp.float32)
        acc = acc * s + b
        if relu:
            acc = jnp.maximum(acc, 0.0)
        return acc

    x_pad = jnp.pad(x, ((0, 0), (0, IN_PAD - INPUT_SIZE)))
    h = layer(x_pad, kparams["w1"], kparams["s1"], kparams["b1"], True)
    h = layer(h, kparams["w2"], kparams["s2"], kparams["b2"], True)
    h = layer(h, kparams["w3"], kparams["s3"], kparams["b3"], True)
    o = layer(h, kparams["w4"], kparams["s4"], kparams["b4"], False)
    return o[:, :OUTPUT_SIZE]


if __name__ == "__main__":
    key = jax.random.PRNGKey(0)
    key, kx, kx2 = jax.random.split(key, 3)

    params = init_params(key)
    kparams = prepare_params(params)   # one-time: int8 weights + scales + padding

    # --- small-batch (single grid step) path ---
    batch = 2
    x = jax.random.normal(kx, (batch, INPUT_SIZE), jnp.float32)
    out = jax.block_until_ready(qnetwork_forward(x, kparams))
    assert out.shape == (batch, OUTPUT_SIZE), out.shape

    # Tight check vs. a reference with matching (int8-weight, bf16-activation) numerics.
    ref_q = reference_forward_quant(x, kparams)
    err_q = float(jnp.max(jnp.abs(out - ref_q)))
    assert err_q < 2e-3, f"max abs error vs quant-matched reference too large: {err_q}"

    # Loose sanity check vs. the full-f32 PyTorch-equivalent forward (difference is the
    # int8-weight / bf16-activation quantization).
    ref_f32 = reference_forward_f32(x, params)
    err_f32 = float(jnp.max(jnp.abs(out - ref_f32)))
    assert err_f32 < 5e-2, f"max abs error vs f32 reference too large: {err_f32}"

    # --- tiled (multi grid step, batch-parallel) path ---
    batch_big = 160
    xb = jax.random.normal(kx2, (batch_big, INPUT_SIZE), jnp.float32)
    out_b = jax.block_until_ready(qnetwork_forward(xb, kparams))
    assert out_b.shape == (batch_big, OUTPUT_SIZE), out_b.shape
    ref_qb = reference_forward_quant(xb, kparams)
    err_b = float(jnp.max(jnp.abs(out_b - ref_qb)))
    assert err_b < 1e-2, f"tiled-path max abs error vs matched reference: {err_b}"

    print("KERNEL_OK")
</pallas_src>

<mosaic_0001>
module attributes {stable_mosaic.version = 11 : i64} {
  func.func @_qnet_kernel(%arg0: i32, %arg1: memref<2x896xbf16, #tpu.memory_space<vmem>>, %arg2: memref<896x1024xi8, #tpu.memory_space<vmem>>, %arg3: memref<1x1024xf32, #tpu.memory_space<vmem>>, %arg4: memref<1x1024xf32, #tpu.memory_space<vmem>>, %arg5: memref<1024x512xi8, #tpu.memory_space<vmem>>, %arg6: memref<1x512xf32, #tpu.memory_space<vmem>>, %arg7: memref<1x512xf32, #tpu.memory_space<vmem>>, %arg8: memref<512x256xi8, #tpu.memory_space<vmem>>, %arg9: memref<1x256xf32, #tpu.memory_space<vmem>>, %arg10: memref<1x256xf32, #tpu.memory_space<vmem>>, %arg11: memref<256x1792xi8, #tpu.memory_space<vmem>>, %arg12: memref<1x1792xf32, #tpu.memory_space<vmem>>, %arg13: memref<1x1792xf32, #tpu.memory_space<vmem>>, %arg14: memref<2x1792xf32, #tpu.memory_space<vmem>>) attributes {dimension_semantics = [#tpu.dimension_semantics<parallel>], iteration_bounds = array<i64: 1>, scalar_prefetch = 0 : i64, scratch_operands = 0 : i64, tpu.core_type = #tpu.core_type<tc>, window_params = [{transform_indices = @transform_0, window_bounds = array<i64: 2, 896>}, {pipeline_mode = #tpu.pipeline_mode<synchronous>, transform_indices = @transform_1, window_bounds = array<i64: 896, 1024>}, {pipeline_mode = #tpu.pipeline_mode<synchronous>, transform_indices = @transform_2, window_bounds = array<i64: 1, 1024>}, {pipeline_mode = #tpu.pipeline_mode<synchronous>, transform_indices = @transform_3, window_bounds = array<i64: 1, 1024>}, {pipeline_mode = #tpu.pipeline_mode<synchronous>, transform_indices = @transform_4, window_bounds = array<i64: 1024, 512>}, {pipeline_mode = #tpu.pipeline_mode<synchronous>, transform_indices = @transform_5, window_bounds = array<i64: 1, 512>}, {pipeline_mode = #tpu.pipeline_mode<synchronous>, transform_indices = @transform_6, window_bounds = array<i64: 1, 512>}, {pipeline_mode = #tpu.pipeline_mode<synchronous>, transform_indices = @transform_7, window_bounds = array<i64: 512, 256>}, {pipeline_mode = #tpu.pipeline_mode<synchronous>, transform_indices = @transform_8, window_bounds = array<i64: 1, 256>}, {pipeline_mode = #tpu.pipeline_mode<synchronous>, transform_indices = @transform_9, window_bounds = array<i64: 1, 256>}, {pipeline_mode = #tpu.pipeline_mode<synchronous>, transform_indices = @transform_10, window_bounds = array<i64: 256, 1792>}, {pipeline_mode = #tpu.pipeline_mode<synchronous>, transform_indices = @transform_11, window_bounds = array<i64: 1, 1792>}, {pipeline_mode = #tpu.pipeline_mode<synchronous>, transform_indices = @transform_12, window_bounds = array<i64: 1, 1792>}, {transform_indices = @transform_13, window_bounds = array<i64: 2, 1792>}]} {
    %c0 = arith.constant 0 : index
    %c0_0 = arith.constant 0 : index
    %0 = vector.load %arg1[%c0, %c0_0] : memref<2x896xbf16, #tpu.memory_space<vmem>>, vector<2x896xbf16>
    %c0_1 = arith.constant 0 : index
    %c0_2 = arith.constant 0 : index
    %1 = vector.load %arg2[%c0_1, %c0_2] : memref<896x1024xi8, #tpu.memory_space<vmem>>, vector<896x1024xi8>
    %2 = arith.sitofp %1 : vector<896x1024xi8> to vector<896x1024xbf16>
    %cst = arith.constant dense<0.000000e+00> : vector<2x1024xf32>
    %3 = tpu.matmul %0, %2, %cst {dimension_numbers = #tpu.dot_dimension_numbers<[1], [0], [0], [1], [0, 0, 1, 1], [], []>} : vector<2x896xbf16>, vector<896x1024xbf16>, vector<2x1024xf32> -> vector<2x1024xf32>
    %c0_3 = arith.constant 0 : index
    %c0_4 = arith.constant 0 : index
    %4 = vector.load %arg3[%c0_3, %c0_4] : memref<1x1024xf32, #tpu.memory_space<vmem>>, vector<1x1024xf32>
    %5 = vector.broadcast %4 : vector<1x1024xf32> to vector<2x1024xf32>
    %6 = arith.mulf %3, %5 : vector<2x1024xf32>
    %c0_5 = arith.constant 0 : index
    %c0_6 = arith.constant 0 : index
    %7 = vector.load %arg4[%c0_5, %c0_6] : memref<1x1024xf32, #tpu.memory_space<vmem>>, vector<1x1024xf32>
    %8 = vector.broadcast %7 : vector<1x1024xf32> to vector<2x1024xf32>
    %9 = arith.addf %6, %8 : vector<2x1024xf32>
    %cst_7 = arith.constant 0.000000e+00 : f32
    %10 = vector.broadcast %cst_7 : f32 to vector<2x1024xf32>
    %11 = arith.maximumf %9, %10 : vector<2x1024xf32>
    %12 = arith.truncf %11 : vector<2x1024xf32> to vector<2x1024xbf16>
    %c0_8 = arith.constant 0 : index
    %c0_9 = arith.constant 0 : index
    %13 = vector.load %arg5[%c0_8, %c0_9] : memref<1024x512xi8, #tpu.memory_space<vmem>>, vector<1024x512xi8>
    %14 = arith.sitofp %13 : vector<1024x512xi8> to vector<1024x512xbf16>
    %cst_10 = arith.constant dense<0.000000e+00> : vector<2x512xf32>
    %15 = tpu.matmul %12, %14, %cst_10 {dimension_numbers = #tpu.dot_dimension_numbers<[1], [0], [0], [1], [0, 0, 1, 1], [], []>} : vector<2x1024xbf16>, vector<1024x512xbf16>, vector<2x512xf32> -> vector<2x512xf32>
    %c0_11 = arith.constant 0 : index
    %c0_12 = arith.constant 0 : index
    %16 = vector.load %arg6[%c0_11, %c0_12] : memref<1x512xf32, #tpu.memory_space<vmem>>, vector<1x512xf32>
    %17 = vector.broadcast %16 : vector<1x512xf32> to vector<2x512xf32>
    %18 = arith.mulf %15, %17 : vector<2x512xf32>
    %c0_13 = arith.constant 0 : index
    %c0_14 = arith.constant 0 : index
    %19 = vector.load %arg7[%c0_13, %c0_14] : memref<1x512xf32, #tpu.memory_space<vmem>>, vector<1x512xf32>
    %20 = vector.broadcast %19 : vector<1x512xf32> to vector<2x512xf32>
    %21 = arith.addf %18, %20 : vector<2x512xf32>
    %cst_15 = arith.constant 0.000000e+00 : f32
    %22 = vector.broadcast %cst_15 : f32 to vector<2x512xf32>
    %23 = arith.maximumf %21, %22 : vector<2x512xf32>
    %24 = arith.truncf %23 : vector<2x512xf32> to vector<2x512xbf16>
    %c0_16 = arith.constant 0 : index
    %c0_17 = arith.constant 0 : index
    %25 = vector.load %arg8[%c0_16, %c0_17] : memref<512x256xi8, #tpu.memory_space<vmem>>, vector<512x256xi8>
    %26 = arith.sitofp %25 : vector<512x256xi8> to vector<512x256xbf16>
    %cst_18 = arith.constant dense<0.000000e+00> : vector<2x256xf32>
    %27 = tpu.matmul %24, %26, %cst_18 {dimension_numbers = #tpu.dot_dimension_numbers<[1], [0], [0], [1], [0, 0, 1, 1], [], []>} : vector<2x512xbf16>, vector<512x256xbf16>, vector<2x256xf32> -> vector<2x256xf32>
    %c0_19 = arith.constant 0 : index
    %c0_20 = arith.constant 0 : index
    %28 = vector.load %arg9[%c0_19, %c0_20] : memref<1x256xf32, #tpu.memory_space<vmem>>, vector<1x256xf32>
    %29 = vector.broadcast %28 : vector<1x256xf32> to vector<2x256xf32>
    %30 = arith.mulf %27, %29 : vector<2x256xf32>
    %c0_21 = arith.constant 0 : index
    %c0_22 = arith.constant 0 : index
    %31 = vector.load %arg10[%c0_21, %c0_22] : memref<1x256xf32, #tpu.memory_space<vmem>>, vector<1x256xf32>
    %32 = vector.broadcast %31 : vector<1x256xf32> to vector<2x256xf32>
    %33 = arith.addf %30, %32 : vector<2x256xf32>
    %cst_23 = arith.constant 0.000000e+00 : f32
    %34 = vector.broadcast %cst_23 : f32 to vector<2x256xf32>
    %35 = arith.maximumf %33, %34 : vector<2x256xf32>
    %36 = arith.truncf %35 : vector<2x256xf32> to vector<2x256xbf16>
    %c0_24 = arith.constant 0 : index
    %c0_25 = arith.constant 0 : index
    %37 = vector.load %arg11[%c0_24, %c0_25] : memref<256x1792xi8, #tpu.memory_space<vmem>>, vector<256x1792xi8>
    %38 = arith.sitofp %37 : vector<256x1792xi8> to vector<256x1792xbf16>
    %cst_26 = arith.constant dense<0.000000e+00> : vector<2x1792xf32>
    %39 = tpu.matmul %36, %38, %cst_26 {dimension_numbers = #tpu.dot_dimension_numbers<[1], [0], [0], [1], [0, 0, 1, 1], [], []>} : vector<2x256xbf16>, vector<256x1792xbf16>, vector<2x1792xf32> -> vector<2x1792xf32>
    %c0_27 = arith.constant 0 : index
    %c0_28 = arith.constant 0 : index
    %40 = vector.load %arg12[%c0_27, %c0_28] : memref<1x1792xf32, #tpu.memory_space<vmem>>, vector<1x1792xf32>
    %41 = vector.broadcast %40 : vector<1x1792xf32> to vector<2x1792xf32>
    %42 = arith.mulf %39, %41 : vector<2x1792xf32>
    %c0_29 = arith.constant 0 : index
    %c0_30 = arith.constant 0 : index
    %43 = vector.load %arg13[%c0_29, %c0_30] : memref<1x1792xf32, #tpu.memory_space<vmem>>, vector<1x1792xf32>
    %44 = vector.broadcast %43 : vector<1x1792xf32> to vector<2x1792xf32>
    %45 = arith.addf %42, %44 : vector<2x1792xf32>
    %c0_31 = arith.constant 0 : index
    %c0_32 = arith.constant 0 : index
    %46 = vector.load %arg14[%c0_31, %c0_32] : memref<2x1792xf32, #tpu.memory_space<vmem>>, vector<2x1792xf32>
    tpu.vector_store %arg14[%c0_31, %c0_32], %45 {strides = array<i32>} : memref<2x1792xf32, #tpu.memory_space<vmem>>, vector<2x1792xf32>,
    return
  }
  func.func @transform_0(%arg0: i32) -> (i32, i32) {
    %c0_i32 = arith.constant 0 : i32
    %c0_i32_0 = arith.constant 0 : i32
    return %arg0, %c0_i32 : i32, i32
  }
  func.func @transform_1(%arg0: i32) -> (i32, i32) {
    %c0_i32 = arith.constant 0 : i32
    %c0_i32_0 = arith.constant 0 : i32
    %c0_i32_1 = arith.constant 0 : i32
    return %c0_i32, %c0_i32_0 : i32, i32
  }
  func.func @transform_2(%arg0: i32) -> (i32, i32) {
    %c0_i32 = arith.constant 0 : i32
    %c0_i32_0 = arith.constant 0 : i32
    %c0_i32_1 = arith.constant 0 : i32
    return %c0_i32, %c0_i32_0 : i32, i32
  }
  func.func @transform_3(%arg0: i32) -> (i32, i32) {
    %c0_i32 = arith.constant 0 : i32
    %c0_i32_0 = arith.constant 0 : i32
    %c0_i32_1 = arith.constant 0 : i32
    return %c0_i32, %c0_i32_0 : i32, i32
  }
  func.func @transform_4(%arg0: i32) -> (i32, i32) {
    %c0_i32 = arith.constant 0 : i32
    %c0_i32_0 = arith.constant 0 : i32
    %c0_i32_1 = arith.constant 0 : i32
    return %c0_i32, %c0_i32_0 : i32, i32
  }
  func.func @transform_5(%arg0: i32) -> (i32, i32) {
    %c0_i32 = arith.constant 0 : i32
    %c0_i32_0 = arith.constant 0 : i32
    %c0_i32_1 = arith.constant 0 : i32
    return %c0_i32, %c0_i32_0 : i32, i32
  }
  func.func @transform_6(%arg0: i32) -> (i32, i32) {
    %c0_i32 = arith.constant 0 : i32
    %c0_i32_0 = arith.constant 0 : i32
    %c0_i32_1 = arith.constant 0 : i32
    return %c0_i32, %c0_i32_0 : i32, i32
  }
  func.func @transform_7(%arg0: i32) -> (i32, i32) {
    %c0_i32 = arith.constant 0 : i32
    %c0_i32_0 = arith.constant 0 : i32
    %c0_i32_1 = arith.constant 0 : i32
    return %c0_i32, %c0_i32_0 : i32, i32
  }
  func.func @transform_8(%arg0: i32) -> (i32, i32) {
    %c0_i32 = arith.constant 0 : i32
    %c0_i32_0 = arith.constant 0 : i32
    %c0_i32_1 = arith.constant 0 : i32
    return %c0_i32, %c0_i32_0 : i32, i32
  }
  func.func @transform_9(%arg0: i32) -> (i32, i32) {
    %c0_i32 = arith.constant 0 : i32
    %c0_i32_0 = arith.constant 0 : i32
    %c0_i32_1 = arith.constant 0 : i32
    return %c0_i32, %c0_i32_0 : i32, i32
  }
  func.func @transform_10(%arg0: i32) -> (i32, i32) {
    %c0_i32 = arith.constant 0 : i32
    %c0_i32_0 = arith.constant 0 : i32
    %c0_i32_1 = arith.constant 0 : i32
    return %c0_i32, %c0_i32_0 : i32, i32
  }
  func.func @transform_11(%arg0: i32) -> (i32, i32) {
    %c0_i32 = arith.constant 0 : i32
    %c0_i32_0 = arith.constant 0 : i32
    %c0_i32_1 = arith.constant 0 : i32
    return %c0_i32, %c0_i32_0 : i32, i32
  }
  func.func @transform_12(%arg0: i32) -> (i32, i32) {
    %c0_i32 = arith.constant 0 : i32
    %c0_i32_0 = arith.constant 0 : i32
    %c0_i32_1 = arith.constant 0 : i32
    return %c0_i32, %c0_i32_0 : i32, i32
  }
  func.func @transform_13(%arg0: i32) -> (i32, i32) {
    %c0_i32 = arith.constant 0 : i32
    %c0_i32_0 = arith.constant 0 : i32
    return %arg0, %c0_i32 : i32, i32
  }
}

</mosaic_0001>

<bundles_post_ra>
// kernel: qnetwork_forward.1
= control target key start
LH: loop header
LB: loop body
LE: loop exit
PB: predicated region body
PF: predicated region fallthrough
CT: control target
= control target key end

     0   :  { %18 = vsyncpa [#allocation3], 0  ;;  %s4213_s0 = inlined_call_operand.vmem [shape: bf16[2,896], index: 0, kind: input, shape index: {}]   ;;  %s4214_s1 = inlined_call_operand.hbm [shape: s8[896,1024], index: 1, kind: input, shape index: {}]   ;;  %s4215_s2 = inlined_call_operand.vmem [shape: f32[1,1024], index: 2, kind: input, shape index: {}]   ;;  %s4216_s3 = inlined_call_operand.hbm [shape: f32[1,1024], index: 3, kind: input, shape index: {}]   ;;  %s4217_s4 = inlined_call_operand.hbm [shape: s8[1024,512], index: 4, kind: input, shape index: {}]   ;;  %s4218_s5 = inlined_call_operand.vmem [shape: f32[1,512], index: 5, kind: input, shape index: {}]   ;;  %s4219_s6 = inlined_call_operand.hbm [shape: f32[1,512], index: 6, kind: input, shape index: {}]   ;;  %s4220_s7 = inlined_call_operand.hbm [shape: s8[512,256], index: 7, kind: input, shape index: {}]   ;;  %s4221_s8 = inlined_call_operand.vmem [shape: f32[1,256], index: 8, kind: input, shape index: {}]   ;;  %s4222_s9 = inlined_call_operand.hbm [shape: f32[1,256], index: 9, kind: input, shape index: {}]   ;;  %s4223_s10 = inlined_call_operand.hbm [shape: s8[256,1792], index: 10, kind: input, shape index: {}]   ;;  %s4224_s11 = inlined_call_operand.vmem [shape: f32[1,1792], index: 11, kind: input, shape index: {}]   ;;  %s4225_s12 = inlined_call_operand.vmem [shape: f32[1,1792], index: 12, kind: input, shape index: {}]   ;;  %s4226_s13 = inlined_call_operand.hbm [shape: f32[2,1792], index: 13, kind: output, shape index: {}]  }
   0x1   :  { %19 = vsyncpa [#allocation6], 0 }
   0x2   :  { %20 = vsyncpa [#allocation9], 0 }
   0x3   :  { %21 = vsyncpa [#allocation12], 0 }
   0x4   :  { %22 = vsyncpa [#allocation4], 0  ;;  %s3709_s25 = smov [#allocation5]   ;;  %s3710_s27 = smov [#allocation8]  }
   0x5   :  { %s45_s26 = sshll.u32 %s3709_s25, 4  ;;  %s69_s28 = sshll.u32 %s3710_s27, 4  ;;  %s46_s26 = int_to_ptr.vmem [resolvable:$true] %s45_s26  ;;  %s70_s28 = int_to_ptr.vmem [resolvable:$true] %s69_s28 }
   0x6   :  { %s3547_s29 = scalar_lea.vmem %s46_s26, 128  ;;  %p3552_p1 = scmp.lt.s32.totalorder %s46_s26, %s46_s26 }
   0x7   :  { %p3548_p0 = scmp.ne.s32.totalorder %s46_s26, %s3547_s29  ;;  %p3553_p2 = scmp.lt.s32.totalorder %s3547_s29, %s3547_s29 }
   0x9   :  { %p3554_p3 = por %p3553_p2, %p3552_p1 }
   0xb   :  { %p3555_p4 = pnand %p3554_p3, %p3548_p0 }
   0xd   :  { %3558 = shalt.err (!%p3555_p4)
}
   0xe   :  { %48 = dma.hbm_to_vmem [thread:$0]  %s4216_s3, 128, %s46_s26, [#allocation6]  }
   0xf   :  { %s3567_s15 = scalar_lea.vmem %s70_s28, 64  ;;  %p3572_p6 = scmp.lt.s32.totalorder %s70_s28, %s70_s28 }
  0x10   :  { %p3568_p5 = scmp.ne.s32.totalorder %s70_s28, %s3567_s15  ;;  %p3573_p7 = scmp.lt.s32.totalorder %s3567_s15, %s3567_s15 }
  0x12   :  { %p3574_p8 = por %p3573_p7, %p3572_p6 }
  0x14   :  { %p3575_p9 = pnand %p3574_p8, %p3568_p5 }
  0x16   :  { %3578 = shalt.err (!%p3575_p9)
}
  0x17   :  { %72 = dma.hbm_to_vmem [thread:$0]  %s4219_s6, 64, %s70_s28, [#allocation9]  }
  0x18   :  { %s3711_s18 = smov [#allocation11]   ;;  %s3712_s20 = smov [#allocation2]  }
  0x19   :  { %s93_s19 = sshll.u32 %s3711_s18, 4  ;;  %s30_s21 = sshll.u32 %s3712_s20, 4  ;;  %s94_s19 = int_to_ptr.vmem [resolvable:$true] %s93_s19  ;;  %s31_s21 = int_to_ptr.vmem [resolvable:$true] %s30_s21 }
  0x1a   :  { %s3587_s22 = scalar_lea.vmem %s94_s19, 32  ;;  %p3592_p11 = scmp.lt.s32.totalorder %s94_s19, %s94_s19 }
  0x1b   :  { %p3588_p10 = scmp.ne.s32.totalorder %s94_s19, %s3587_s22  ;;  %p3593_p12 = scmp.lt.s32.totalorder %s3587_s22, %s3587_s22 }
  0x1d   :  { %p3594_p13 = por %p3593_p12, %p3592_p11 }
  0x1f   :  { %p3595_p0 = pnand %p3594_p13, %p3588_p10 }
  0x21   :  { %3598 = shalt.err (!%p3595_p0)
}
  0x22   :  { %96 = dma.hbm_to_vmem [thread:$0]  %s4222_s9, 32, %s94_s19, [#allocation12]  }
  0x23   :  { %s3607_s24 = scalar_lea.vmem %s31_s21, 28672  ;;  %p3612_p2 = scmp.lt.s32.totalorder %s31_s21, %s31_s21 }
  0x24   :  { %p3608_p1 = scmp.ne.s32.totalorder %s31_s21, %s3607_s24  ;;  %p3613_p3 = scmp.lt.s32.totalorder %s3607_s24, %s3607_s24 }
  0x26   :  { %p3614_p4 = por %p3613_p3, %p3612_p2 }
  0x28   :  { %p3615_p5 = pnand %p3614_p4, %p3608_p1 }
  0x2a   :  { %3618 = shalt.err (!%p3615_p5)
}
  0x2b   :  { %s3713_s6 = smov 1024   ;;  %s3714_s25 = smov 64  }
  0x2c   :  { %36 = dma.hbm_to_vmem [thread:$0]  %s4214_s1, 28672, %s31_s21, [#allocation3], %s3713_s6, %s3713_s6, %s3714_s25  }
  0x2d   :  { %s3715_s28 = smov [#allocation7]  }
  0x2e   :  { %s54_s29 = sshll.u32 %s3715_s28, 4  ;;  %s55_s29 = int_to_ptr.vmem [resolvable:$true] %s54_s29 }
  0x2f   :  { %s3627_s30 = scalar_lea.vmem %s55_s29, 16384  ;;  %p3632_p7 = scmp.lt.s32.totalorder %s55_s29, %s55_s29 }
  0x30   :  { %p3628_p6 = scmp.ne.s32.totalorder %s55_s29, %s3627_s30  ;;  %p3633_p8 = scmp.lt.s32.totalorder %s3627_s30, %s3627_s30 }
  0x32   :  { %p3634_p9 = por %p3633_p8, %p3632_p7 }
  0x34   :  { %p3635_p10 = pnand %p3634_p9, %p3628_p6 }
  0x36   :  { %3638 = shalt.err (!%p3635_p10)
}
  0x37   :  { %s3716_s9 = smov 512   ;;  %s3717_s14 = smov 32  }
  0x38   :  { %60 = dma.hbm_to_vmem [thread:$0]  %s4217_s4, 16384, %s55_s29, [#allocation6], %s3716_s9, %s3716_s9, %s3717_s14  }
  0x39   :  { %s3718_s17 = smov [#allocation10]  }
  0x3a   :  { %s78_s18 = sshll.u32 %s3718_s17, 4  ;;  %s79_s18 = int_to_ptr.vmem [resolvable:$true] %s78_s18 }
  0x3b   :  { %s3647_s1 = scalar_lea.vmem %s79_s18, 4096  ;;  %p3652_p12 = scmp.lt.s32.totalorder %s79_s18, %s79_s18 }
  0x3c   :  { %p3648_p11 = scmp.ne.s32.totalorder %s79_s18, %s3647_s1  ;;  %p3653_p13 = scmp.lt.s32.totalorder %s3647_s1, %s3647_s1 }
  0x3e   :  { %p3654_p0 = por %p3653_p13, %p3652_p12 }
  0x40   :  { %p3655_p1 = pnand %p3654_p0, %p3648_p11 }
  0x42   :  { %3658 = shalt.err (!%p3655_p1)
}
  0x43   :  { %s3719_s19 = smov 256   ;;  %s3720_s20 = smov 16  }
  0x44   :  { %84 = dma.hbm_to_vmem [thread:$0]  %s4220_s7, 4096, %s79_s18, [#allocation9], %s3719_s19, %s3719_s19, %s3720_s20  }
  0x45   :  { %s3721_s3 = smov [#allocation13]  }
  0x46   :  { %s102_s23 = sshll.u32 %s3721_s3, 4  ;;  %s103_s23 = int_to_ptr.vmem [resolvable:$true] %s102_s23 }
  0x47   :  { %s3667_s4 = scalar_lea.vmem %s103_s23, 14336  ;;  %p3672_p3 = scmp.lt.s32.totalorder %s103_s23, %s103_s23 }
  0x48   :  { %p3668_p2 = scmp.ne.s32.totalorder %s103_s23, %s3667_s4  ;;  %p3673_p4 = scmp.lt.s32.totalorder %s3667_s4, %s3667_s4 }
  0x4a   :  { %p3674_p5 = por %p3673_p4, %p3672_p3 }
  0x4c   :  { %p3675_p6 = pnand %p3674_p5, %p3668_p2 }
  0x4e   :  { %3678 = shalt.err (!%p3675_p6)
}
  0x4f   :  { %s3722_s24 = smov 1792   ;;  %s3723_s6 = smov 112  }
  0x50   :  { %108 = dma.hbm_to_vmem [thread:$0]  %s4223_s10, 14336, %s103_s23, [#allocation12], %s3722_s24, %s3722_s24, %s3723_s6  }
  0x51   :  { %3699 = dma.done.wait [#allocation3], 28672  }
  0x52   :  { %3700 = vsyncadd [#allocation3], 4294938624 }
  0x53   :  { %3701 = dma.done.wait [#allocation6], 16512  }
  0x54   :  { %3702 = vsyncadd [#allocation6], 4294950784 }
  0x55   :  { %3703 = dma.done.wait [#allocation9], 4160  }
  0x56   :  { %3704 = vsyncadd [#allocation9], 4294963136 }
  0x57   :  { %3705 = dma.done.wait [#allocation12], 14368  }
  0x58   :  { %3706 = vsyncadd [#allocation12], 4294952928  ;;  %v161_v0 = vld [vmem:[#allocation2 + $0xc8] sm:$0xff]  ;;  %v160_v2 = vld [vmem:[#allocation2 + $0xc0] sm:$0xff]  ;;  %v3724_v18 = vmov 1966171168   ;;  %v813_v20 = vlaneseq }
  0x59   :  { %v225_v1 = vld [vmem:[#allocation2 + $0x2c8] sm:$0xff]  ;;  %v409_v3 = vunpack.c.l.s8.bf16 %v161_v0  ;;  %v417_v4 = vunpack.c.h.s8.bf16 %v161_v0  ;;  %v224_v7 = vld [vmem:[#allocation2 + $0x2c0] sm:$0xff]  ;;  %v416_v8 = vunpack.c.h.s8.bf16 %v160_v2  ;;  %v408_v12 = vunpack.c.l.s8.bf16 %v160_v2 }
  0x5a   :  { %v537_v5 = vunpack.c.l.s8.bf16 %v225_v1  ;;  %v545_v6 = vunpack.c.h.s8.bf16 %v225_v1  ;;  %v544_v9 = vunpack.c.h.s8.bf16 %v224_v7  ;;  %v153_v10 = vld [vmem:[#allocation2 + $0x88] sm:$0xff]  ;;  %v536_v13 = vunpack.c.l.s8.bf16 %v224_v7  ;;  %v152_v16 = vld [vmem:[#allocation2 + $0x80] sm:$0xff] }
  0x5b   :  { %v217_v11 = vld [vmem:[#allocation2 + $0x288] sm:$0xff]  ;;  %864 = vmatprep.subr.bf16.mxu0 %v417_v4  ;;  %v401_v14 = vunpack.c.h.s8.bf16 %v153_v10  ;;  %v216_v17 = vld [vmem:[#allocation2 + $0x280] sm:$0xff]  ;;  %v811_v19 = vunpack.c.l.s4 %v3724_v18  ;;  %v400_v21 = vunpack.c.h.s8.bf16 %v152_v16  ;;  %v393_v23 = vunpack.c.l.s8.bf16 %v153_v10 }
  0x5c   :  { %905 = vmatprep.subr.bf16.mxu1 %v545_v6  ;;  %865 = vmatpush1.bf16.msra.mxu0 %v416_v8  ;;  %v529_v15 = vunpack.c.h.s8.bf16 %v217_v11  ;;  %v528_v22 = vunpack.c.h.s8.bf16 %v216_v17  ;;  %v521_v24 = vunpack.c.l.s8.bf16 %v217_v11  ;;  %v3819_v26 = vshrl.u32 %v813_v20, 7  ;;  %v145_v27 = vld [vmem:[#allocation2 + $0x48] sm:$0xff]  ;;  %v144_v33 = vld [vmem:[#allocation2 + $0x40] sm:$0xff] }
  0x5d   :  { %906 = vmatpush1.bf16.msra.mxu1 %v544_v9  ;;  %866 = vmatprep.subr.bf16.mxu0 %v409_v3  ;;  %v812_v25 = vunpack.c.0.s8 %v811_v19  ;;  %v209_v28 = vld [vmem:[#allocation2 + $0x248] sm:$0xff]  ;;  %v392_v29 = vunpack.c.l.s8.bf16 %v152_v16  ;;  %v520_v30 = vunpack.c.l.s8.bf16 %v216_v17  ;;  %v385_v31 = vunpack.c.h.s8.bf16 %v145_v27  ;;  %v208_v34 = vld [vmem:[#allocation2 + $0x240] sm:$0xff] }
  0x5e   :  { %907 = vmatprep.subr.bf16.mxu1 %v537_v5  ;;  %v513_v32 = vunpack.c.h.s8.bf16 %v209_v28  ;;  %v3827_v36 = vld [vmem:[%s4213_s0] sm:$0x7f]  ;;  %v384_v37 = vunpack.c.h.s8.bf16 %v144_v33  ;;  %v512_v38 = vunpack.c.h.s8.bf16 %v208_v34  ;;  %v377_v39 = vunpack.c.l.s8.bf16 %v145_v27  ;;  %v137_v42 = vld [vmem:[#allocation2 + $0x8] sm:$0xff] }
  0x5f   :  { %v3822_v35 = vsub.s32 %v812_v25, %v3819_v26  ;;  %v505_v40 = vunpack.c.l.s8.bf16 %v209_v28  ;;  %v201_v43 = vld [vmem:[#allocation2 + $0x208] sm:$0xff]  ;;  %v376_v45 = vunpack.c.l.s8.bf16 %v144_v33  ;;  %v504_v46 = vunpack.c.l.s8.bf16 %v208_v34  ;;  %v136_v49 = vld [vmem:[#allocation2] sm:$0xff] }
  0x60   :  { %867 = vmatpush1.bf16.msra.mxu0 %v408_v12  ;;  %v369_v47 = vunpack.c.h.s8.bf16 %v137_v42  ;;  %v497_v48 = vunpack.c.h.s8.bf16 %v201_v43  ;;  %v200_v50 = vld [vmem:[#allocation2 + $0x200] sm:$0xff]  ;;  %v368_v53 = vunpack.c.h.s8.bf16 %v136_v49  ;;  %v361_v55 = vunpack.c.l.s8.bf16 %v137_v42  ;;  %v193_v57 = vld [vmem:[#allocation2 + $0x1c8] sm:$0xff] }
  0x61   :  { %908 = vmatpush1.bf16.msra.mxu1 %v536_v13  ;;  %868 = vmatprep.subr.bf16.mxu0 %v401_v14  ;;  %v3831_v41 = vrot.slane %v3827_v36, %v3822_v35  ;;  %v496_v54 = vunpack.c.h.s8.bf16 %v200_v50  ;;  %v489_v56 = vunpack.c.l.s8.bf16 %v201_v43  ;;  %v257_v58 = vld [vmem:[#allocation2 + $0x3c8] sm:$0xff]  ;;  %v360_v59 = vunpack.c.l.s8.bf16 %v136_v49  ;;  %v192_v63 = vld [vmem:[#allocation2 + $0x1c0] sm:$0xff] }
  0x62   :  { %909 = vmatprep.subr.bf16.mxu1 %v529_v15  ;;  %v488_v60 = vunpack.c.l.s8.bf16 %v200_v50  ;;  %v481_v61 = vunpack.c.h.s8.bf16 %v193_v57  ;;  %v609_v62 = vunpack.c.h.s8.bf16 %v257_v58  ;;  %v256_v0 = vld [vmem:[#allocation2 + $0x3c0] sm:$0xff]  ;;  %v480_v1 = vunpack.c.h.s8.bf16 %v192_v63  ;;  %v185_v5 = vld [vmem:[#allocation2 + $0x188] sm:$0xff] }
  0x63   :  { %v824_v44 = vcombine.high %v3831_v41, %v3831_v41  ;;  %v608_v2 = vunpack.c.h.s8.bf16 %v256_v0  ;;  %v473_v3 = vunpack.c.l.s8.bf16 %v193_v57  ;;  %v601_v4 = vunpack.c.l.s8.bf16 %v257_v58  ;;  %v249_v6 = vld [vmem:[#allocation2 + $0x388] sm:$0xff]  ;;  %v184_v11 = vld [vmem:[#allocation2 + $0x180] sm:$0xff] }
  0x64   :  { %869 = vmatpush1.bf16.msra.mxu0 %v400_v21  ;;  %v472_v7 = vunpack.c.l.s8.bf16 %v192_v63  ;;  %v600_v8 = vunpack.c.l.s8.bf16 %v256_v0  ;;  %v465_v9 = vunpack.c.h.s8.bf16 %v185_v5  ;;  %v593_v10 = vunpack.c.h.s8.bf16 %v249_v6  ;;  %v248_v12 = vld [vmem:[#allocation2 + $0x380] sm:$0xff]  ;;  %v177_v17 = vld [vmem:[#allocation2 + $0x148] sm:$0xff] }
  0x65   :  { %910 = vmatpush1.bf16.msra.mxu1 %v528_v22  ;;  %870 = vmatprep.subr.bf16.mxu0 %v393_v23  ;;  %v3836_v51 = vrot.slane %v824_v44, %v3822_v35  ;;  %v464_v13 = vunpack.c.h.s8.bf16 %v184_v11  ;;  %v592_v14 = vunpack.c.h.s8.bf16 %v248_v12  ;;  %v457_v15 = vunpack.c.l.s8.bf16 %v185_v5  ;;  %v241_v18 = vld [vmem:[#allocation2 + $0x348] sm:$0xff]  ;;  %v176_v23 = vld [vmem:[#allocation2 + $0x140] sm:$0xff] }
  0x66   :  { %911 = vmatprep.subr.bf16.mxu1 %v521_v24  ;;  %v585_v16 = vunpack.c.l.s8.bf16 %v249_v6  ;;  %v456_v19 = vunpack.c.l.s8.bf16 %v184_v11  ;;  %v584_v20 = vunpack.c.l.s8.bf16 %v248_v12  ;;  %v449_v21 = vunpack.c.h.s8.bf16 %v177_v17  ;;  %v240_v24 = vld [vmem:[#allocation2 + $0x340] sm:$0xff]  ;;  %v345_v63 = vld [vmem:[#allocation2 + $0x688] sm:$0xff] }
  0x67   :  { %896 = vmatprep.mubr.bf16.mxu0 %v3836_v51  ;;  %v3841_v52 = vcombine.high %v3836_v51, %v3836_v51  ;;  %v577_v22 = vunpack.c.h.s8.bf16 %v241_v18  ;;  %v448_v25 = vunpack.c.h.s8.bf16 %v176_v23  ;;  %v576_v27 = vunpack.c.h.s8.bf16 %v240_v24  ;;  %v280_v5 = vld [vmem:[#allocation2 + $0x480] sm:$0xff]  ;;  %v273_v12 = vld [vmem:[#allocation2 + $0x448] sm:$0xff] }
  0x68   :  { %871 = vmatpush1.bf16.msra.mxu0 %v392_v29  ;;  %v441_v28 = vunpack.c.l.s8.bf16 %v177_v17  ;;  %v569_v29 = vunpack.c.l.s8.bf16 %v241_v18  ;;  %v568_v33 = vunpack.c.l.s8.bf16 %v240_v24  ;;  %v809_v43 = vcombine.high %v3827_v36, %v3827_v36  ;;  %v344_v6 = vld [vmem:[#allocation2 + $0x680] sm:$0xff]  ;;  %v265_v24 = vld [vmem:[#allocation2 + $0x408] sm:$0xff] }
  0x69   :  { %912 = vmatpush1.bf16.msra.mxu1 %v520_v30  ;;  %872 = vmatprep.subr.bf16.mxu0 %v385_v31  ;;  %v169_v30 = vld [vmem:[#allocation2 + $0x108] sm:$0xff]  ;;  %v777_v11 = vunpack.c.l.s8.bf16 %v345_v63  ;;  %v272_v18 = vld [vmem:[#allocation2 + $0x440] sm:$0xff] }
  0x6a   :  { %913 = vmatprep.subr.bf16.mxu1 %v513_v32  ;;  %937 = vmatprep.mubr.bf16.mxu1 %v3841_v52  ;;  %v233_v31 = vld [vmem:[#allocation2 + $0x308] sm:$0xff]  ;;  %v440_v32 = vunpack.c.l.s8.bf16 %v176_v23  ;;  %v433_v34 = vunpack.c.h.s8.bf16 %v169_v30  ;;  %v425_v44 = vunpack.c.l.s8.bf16 %v169_v30 }
  0x6c   :  { %873 = vmatpush1.bf16.msra.mxu0 %v384_v37  ;;  %v561_v37 = vunpack.c.h.s8.bf16 %v233_v31 }
  0x6d   :  { %914 = vmatpush1.bf16.msra.mxu1 %v512_v38  ;;  %874 = vmatprep.subr.bf16.mxu0 %v377_v39  ;;  %v168_v38 = vld [vmem:[#allocation2 + $0x100] sm:$0xff] }
  0x6e   :  { %915 = vmatprep.subr.bf16.mxu1 %v505_v40  ;;  %v232_v39 = vld [vmem:[#allocation2 + $0x300] sm:$0xff]  ;;  %v432_v40 = vunpack.c.h.s8.bf16 %v168_v38  ;;  %v424_v49 = vunpack.c.l.s8.bf16 %v168_v38 }
  0x6f   :  { %v560_v42 = vunpack.c.h.s8.bf16 %v232_v39  ;;  %v552_v50 = vunpack.c.l.s8.bf16 %v232_v39  ;;  %v321_v39 = vld [vmem:[#allocation2 + $0x5c8] sm:$0xff] }
  0x70   :  { %875 = vmatpush1.bf16.msra.mxu0 %v376_v45  ;;  %v553_v45 = vunpack.c.l.s8.bf16 %v233_v31  ;;  %v264_v31 = vld [vmem:[#allocation2 + $0x400] sm:$0xff] }
  0x71   :  { %916 = vmatpush1.bf16.msra.mxu1 %v504_v46  ;;  %876 = vmatprep.subr.bf16.mxu0 %v369_v47  ;;  %v289_v46 = vld [vmem:[#allocation2 + $0x4c8] sm:$0xff] }
  0x72   :  { %917 = vmatprep.subr.bf16.mxu1 %v497_v48  ;;  %v353_v47 = vld [vmem:[#allocation2 + $0x6c8] sm:$0xff]  ;;  %v3848_v48 = vrot.slane %v3831_v41, %v3822_v35  ;;  %v673_v36 = vunpack.c.h.s8.bf16 %v289_v46 }
  0x74   :  { %877 = vmatpush1.bf16.msra.mxu0 %v368_v53  ;;  %v3851_v53 = vrot.slane %v809_v43, %v3822_v35  ;;  %v3857_v41 = vcombine.high %v3848_v48, %v3848_v48  ;;  %v616_v43 = vunpack.c.l.s8.bf16 %v264_v31 }
  0x75   :  { %918 = vmatpush1.bf16.msra.mxu1 %v496_v54  ;;  %878 = vmatprep.subr.bf16.mxu0 %v361_v55  ;;  %v801_v54 = vunpack.c.h.s8.bf16 %v353_v47  ;;  %v288_v55 = vld [vmem:[#allocation2 + $0x4c0] sm:$0xff] }
  0x76   :  { %919 = vmatprep.subr.bf16.mxu1 %v489_v56  ;;  %v352_v56 = vld [vmem:[#allocation2 + $0x6c0] sm:$0xff]  ;;  %v825_v57 = vcombine.high %v3851_v53, %v3851_v53  ;;  %v672_v58 = vunpack.c.h.s8.bf16 %v288_v55 }
  0x78   :  { %879 = vmatpush1.bf16.msra.mxu0 %v360_v59  ;;  %v800_v59 = vunpack.c.h.s8.bf16 %v352_v56  ;;  %v3860_v0 = vrot.slane %v825_v57, %v3822_v35 }
  0x79   :  { %920 = vmatpush1.bf16.msra.mxu1 %v488_v60  ;;  %880 = vmatprep.subr.bf16.mxu0 %v481_v61  ;;  %v665_v60 = vunpack.c.l.s8.bf16 %v289_v46  ;;  %v793_v61 = vunpack.c.l.s8.bf16 %v353_v47  ;;  %v320_v47 = vld [vmem:[#allocation2 + $0x5c0] sm:$0xff] }
  0x7a   :  { %921 = vmatprep.subr.bf16.mxu1 %v609_v62  ;;  %v281_v62 = vld [vmem:[#allocation2 + $0x488] sm:$0xff]  ;;  %v728_v57 = vunpack.c.l.s8.bf16 %v320_v47 }
  0x7c   :  { %881 = vmatpush2.bf16.msra.mxu0 %v480_v1  ;;  %v664_v1 = vunpack.c.l.s8.bf16 %v288_v55  ;;  %v313_v55 = vld [vmem:[#allocation2 + $0x588] sm:$0xff] }
  0x7d   :  { %922 = vmatpush2.bf16.msra.mxu1 %v608_v2  ;;  %882 = vmatprep.subr.bf16.mxu0 %v473_v3  ;;  %v792_v2 = vunpack.c.l.s8.bf16 %v352_v56  ;;  %v657_v3 = vunpack.c.h.s8.bf16 %v281_v62  ;;  %v155_v56 = vld [vmem:[#allocation2 + $0x98] sm:$0xff] }
  0x7e   :  { %923 = vmatprep.subr.bf16.mxu1 %v601_v4  ;;  %v785_v4 = vunpack.c.h.s8.bf16 %v345_v63 }
  0x80   :  { %883 = vmatpush2.bf16.msra.mxu0 %v472_v7  ;;  %v3725_v7 = vmov 0  }
  0x81   :  { %924 = vmatpush2.bf16.msra.mxu1 %v600_v8  ;;  %884 = vmatprep.subr.bf16.mxu0 %v465_v9  ;;  %v656_v8 = vunpack.c.h.s8.bf16 %v280_v5  ;;  %v784_v9 = vunpack.c.h.s8.bf16 %v344_v6 }
  0x82   :  { %925 = vmatprep.subr.bf16.mxu1 %v593_v10  ;;  %v649_v10 = vunpack.c.l.s8.bf16 %v281_v62  ;;  %v154_v62 = vld [vmem:[#allocation2 + $0x90] sm:$0xff] }
  0x84   :  { %885 = vmatpush2.bf16.msra.mxu0 %v464_v13  ;;  %v337_v13 = vld [vmem:[#allocation2 + $0x648] sm:$0xff] }
  0x85   :  { %926 = vmatpush2.bf16.msra.mxu1 %v592_v14  ;;  %886 = vmatprep.subr.bf16.mxu0 %v457_v15  ;;  %v648_v14 = vunpack.c.l.s8.bf16 %v280_v5  ;;  %v776_v15 = vunpack.c.l.s8.bf16 %v344_v6  ;;  %v769_v17 = vunpack.c.h.s8.bf16 %v337_v13  ;;  %v761_v23 = vunpack.c.l.s8.bf16 %v337_v13  ;;  %v147_v5 = vld [vmem:[#allocation2 + $0x58] sm:$0xff] }
  0x86   :  { %927 = vmatprep.subr.bf16.mxu1 %v585_v16  ;;  %v641_v16 = vunpack.c.h.s8.bf16 %v273_v12 }
  0x88   :  { %887 = vmatpush2.bf16.msra.mxu0 %v456_v19  ;;  %v336_v19 = vld [vmem:[#allocation2 + $0x640] sm:$0xff] }
  0x89   :  { %928 = vmatpush2.bf16.msra.mxu1 %v584_v20  ;;  %888 = vmatprep.subr.bf16.mxu0 %v449_v21  ;;  %v640_v20 = vunpack.c.h.s8.bf16 %v272_v18  ;;  %v768_v21 = vunpack.c.h.s8.bf16 %v336_v19 }
  0x8a   :  { %929 = vmatprep.subr.bf16.mxu1 %v577_v22  ;;  %v633_v22 = vunpack.c.l.s8.bf16 %v273_v12  ;;  %v146_v12 = vld [vmem:[#allocation2 + $0x50] sm:$0xff] }
  0x8c   :  { %889 = vmatpush2.bf16.msra.mxu0 %v448_v25  ;;  %v329_v25 = vld [vmem:[#allocation2 + $0x608] sm:$0xff] }
  0x8d   :  { %930 = vmatpush2.bf16.msra.mxu1 %v576_v27  ;;  %890 = vmatprep.subr.bf16.mxu0 %v441_v28  ;;  %v632_v27 = vunpack.c.l.s8.bf16 %v272_v18  ;;  %v760_v28 = vunpack.c.l.s8.bf16 %v336_v19  ;;  %v753_v30 = vunpack.c.h.s8.bf16 %v329_v25  ;;  %v745_v38 = vunpack.c.l.s8.bf16 %v329_v25  ;;  %v139_v18 = vld [vmem:[#allocation2 + $0x18] sm:$0xff] }
  0x8e   :  { %931 = vmatprep.subr.bf16.mxu1 %v569_v29  ;;  %v625_v29 = vunpack.c.h.s8.bf16 %v265_v24 }
  0x90   :  { %891 = vmatpush2.bf16.msra.mxu0 %v440_v32  ;;  %v328_v32 = vld [vmem:[#allocation2 + $0x600] sm:$0xff] }
  0x91   :  { %932 = vmatpush2.bf16.msra.mxu1 %v568_v33  ;;  %892 = vmatprep.subr.bf16.mxu0 %v433_v34  ;;  %v624_v33 = vunpack.c.h.s8.bf16 %v264_v31  ;;  %v752_v34 = vunpack.c.h.s8.bf16 %v328_v32  ;;  %v227_v31 = vld [vmem:[#allocation2 + $0x2d8] sm:$0xff] }
  0x92   :  { %933 = vmatprep.subr.bf16.mxu1 %v561_v37  ;;  %v617_v37 = vunpack.c.l.s8.bf16 %v265_v24  ;;  %v138_v24 = vld [vmem:[#allocation2 + $0x10] sm:$0xff] }
  0x94   :  { %893 = vmatpush2.bf16.msra.mxu0 %v432_v40  ;;  %v163_v40 = vld [vmem:[#allocation2 + $0xd8] sm:$0xff] }
  0x95   :  { %934 = vmatpush2.bf16.msra.mxu1 %v560_v42  ;;  %894 = vmatprep.subr.bf16.mxu0 %v425_v44  ;;  %v3868_v42 = vrot.slane %v3851_v53, %v3822_v35  ;;  %v744_v44 = vunpack.c.l.s8.bf16 %v328_v32  ;;  %v419_v46 = vunpack.c.h.s8.bf16 %v163_v40  ;;  %v729_v35 = vunpack.c.l.s8.bf16 %v321_v39 }
  0x96   :  { %935 = vmatprep.subr.bf16.mxu1 %v553_v45  ;;  %v737_v45 = vunpack.c.h.s8.bf16 %v321_v39  ;;  %v411_v53 = vunpack.c.l.s8.bf16 %v163_v40  ;;  %v226_v39 = vld [vmem:[#allocation2 + $0x2d0] sm:$0xff] }
  0x98   :  { %895 = vmatpush2.bf16.msra.mxu0 %v424_v49  ;;  %v162_v49 = vld [vmem:[#allocation2 + $0xd0] sm:$0xff] }
  0x99   :  { %936 = vmatpush2.bf16.msra.mxu1 %v552_v50  ;;  %946 = vmatprep.subr.bf16.mxu0 %v673_v36  ;;  %v3872_v50 = vcombine.high %v3868_v42, %v3868_v42  ;;  %v736_v36 = vunpack.c.h.s8.bf16 %v320_v47  ;;  %v219_v47 = vld [vmem:[#allocation2 + $0x298] sm:$0xff] }
  0x9a   :  { %987 = vmatprep.subr.bf16.mxu1 %v801_v54  ;;  %v418_v54 = vunpack.c.h.s8.bf16 %v162_v49 }
  0x9b   :  { %897 = vmatmul.mubr.bf16.vlgmr.msra.gmra.mxu0 %v3848_v48 }
  0x9c   :  { %938 = vmatmul.mubr.bf16.vlgmr.msra.gmra.mxu1 %v3857_v41  ;;  %947 = vmatpush1.bf16.msra.mxu0 %v672_v58  ;;  %v410_v58 = vunpack.c.l.s8.bf16 %v162_v49 }
  0x9d   :  { %988 = vmatpush1.bf16.msra.mxu1 %v800_v59  ;;  %948 = vmatprep.subr.bf16.mxu0 %v665_v60  ;;  %v721_v59 = vunpack.c.h.s8.bf16 %v313_v55  ;;  %v403_v60 = vunpack.c.h.s8.bf16 %v155_v56 }
  0x9e   :  { %989 = vmatprep.subr.bf16.mxu1 %v793_v61  ;;  %1019 = vmatprep.mubr.bf16.mxu1 %v3725_v7  ;;  %v312_v61 = vld [vmem:[#allocation2 + $0x580] sm:$0xff] }
  0x9f   :  { %978 = vmatprep.mubr.bf16.mxu0 %v3860_v0  ;;  %v720_v63 = vunpack.c.h.s8.bf16 %v312_v61  ;;  %v712_v6 = vunpack.c.l.s8.bf16 %v312_v61  ;;  %v211_v61 = vld [vmem:[#allocation2 + $0x258] sm:$0xff] }
  0xa0   :  { %949 = vmatpush1.bf16.msra.mxu0 %v664_v1  ;;  %v402_v1 = vunpack.c.h.s8.bf16 %v154_v62 }
  0xa1   :  { %990 = vmatpush1.bf16.msra.mxu1 %v792_v2  ;;  %950 = vmatprep.subr.bf16.mxu0 %v657_v3  ;;  %v713_v2 = vunpack.c.l.s8.bf16 %v313_v55  ;;  %v395_v3 = vunpack.c.l.s8.bf16 %v155_v56  ;;  %v218_v55 = vld [vmem:[#allocation2 + $0x290] sm:$0xff] }
  0xa2   :  { %991 = vmatprep.subr.bf16.mxu1 %v785_v4  ;;  %v305_v4 = vld [vmem:[#allocation2 + $0x548] sm:$0xff] }
  0xa4   :  { %951 = vmatpush1.bf16.msra.mxu0 %v656_v8  ;;  %v394_v8 = vunpack.c.l.s8.bf16 %v154_v62 }
  0xa5   :  { %992 = vmatpush1.bf16.msra.mxu1 %v784_v9  ;;  %952 = vmatprep.subr.bf16.mxu0 %v649_v10  ;;  %v705_v9 = vunpack.c.h.s8.bf16 %v305_v4  ;;  %v387_v10 = vunpack.c.h.s8.bf16 %v147_v5 }
  0xa6   :  { %993 = vmatprep.subr.bf16.mxu1 %v777_v11  ;;  %v304_v11 = vld [vmem:[#allocation2 + $0x540] sm:$0xff] }
  0xa7   :  { %v704_v13 = vunpack.c.h.s8.bf16 %v304_v11  ;;  %v696_v19 = vunpack.c.l.s8.bf16 %v304_v11  ;;  %v203_v11 = vld [vmem:[#allocation2 + $0x218] sm:$0xff] }
  0xa8   :  { %953 = vmatpush1.bf16.msra.mxu0 %v648_v14  ;;  %v386_v14 = vunpack.c.h.s8.bf16 %v146_v12 }
  0xa9   :  { %994 = vmatpush1.bf16.msra.mxu1 %v776_v15  ;;  %954 = vmatprep.subr.bf16.mxu0 %v641_v16  ;;  %v697_v15 = vunpack.c.l.s8.bf16 %v305_v4  ;;  %v379_v16 = vunpack.c.l.s8.bf16 %v147_v5  ;;  %v210_v4 = vld [vmem:[#allocation2 + $0x250] sm:$0xff] }
  0xaa   :  { %995 = vmatprep.subr.bf16.mxu1 %v769_v17  ;;  %v297_v17 = vld [vmem:[#allocation2 + $0x508] sm:$0xff] }
  0xac   :  { %955 = vmatpush1.bf16.msra.mxu0 %v640_v20  ;;  %v378_v20 = vunpack.c.l.s8.bf16 %v146_v12 }
  0xad   :  { %996 = vmatpush1.bf16.msra.mxu1 %v768_v21  ;;  %956 = vmatprep.subr.bf16.mxu0 %v633_v22  ;;  %v689_v21 = vunpack.c.h.s8.bf16 %v297_v17  ;;  %v371_v22 = vunpack.c.h.s8.bf16 %v139_v18 }
  0xae   :  { %997 = vmatprep.subr.bf16.mxu1 %v761_v23  ;;  %v296_v23 = vld [vmem:[#allocation2 + $0x500] sm:$0xff] }
  0xaf   :  { %v688_v25 = vunpack.c.h.s8.bf16 %v296_v23  ;;  %v680_v32 = vunpack.c.l.s8.bf16 %v296_v23  ;;  %v291_v23 = vld [vmem:[#allocation2 + $0x4d8] sm:$0xff] }
  0xb0   :  { %957 = vmatpush1.bf16.msra.mxu0 %v632_v27  ;;  %v370_v27 = vunpack.c.h.s8.bf16 %v138_v24 }
  0xb1   :  { %998 = vmatpush1.bf16.msra.mxu1 %v760_v28  ;;  %958 = vmatprep.subr.bf16.mxu0 %v625_v29  ;;  %v681_v28 = vunpack.c.l.s8.bf16 %v297_v17  ;;  %v363_v29 = vunpack.c.l.s8.bf16 %v139_v18  ;;  %v202_v17 = vld [vmem:[#allocation2 + $0x210] sm:$0xff] }
  0xb2   :  { %999 = vmatprep.subr.bf16.mxu1 %v753_v30  ;;  %v195_v30 = vld [vmem:[#allocation2 + $0x1d8] sm:$0xff] }
  0xb4   :  { %959 = vmatpush1.bf16.msra.mxu0 %v624_v33  ;;  %v362_v33 = vunpack.c.l.s8.bf16 %v138_v24 }
  0xb5   :  { %1000 = vmatpush1.bf16.msra.mxu1 %v752_v34  ;;  %960 = vmatprep.subr.bf16.mxu0 %v617_v37  ;;  %v483_v34 = vunpack.c.h.s8.bf16 %v195_v30  ;;  %v547_v37 = vunpack.c.h.s8.bf16 %v227_v31 }
  0xb6   :  { %1001 = vmatprep.subr.bf16.mxu1 %v745_v38  ;;  %v194_v38 = vld [vmem:[#allocation2 + $0x1d0] sm:$0xff] }
  0xb7   :  { %v482_v40 = vunpack.c.h.s8.bf16 %v194_v38  ;;  %v474_v49 = vunpack.c.l.s8.bf16 %v194_v38  ;;  %v283_v38 = vld [vmem:[#allocation2 + $0x498] sm:$0xff] }
  0xb8   :  { %961 = vmatpush1.bf16.msra.mxu0 %v616_v43  ;;  %v546_v43 = vunpack.c.h.s8.bf16 %v226_v39 }
  0xb9   :  { %1002 = vmatpush1.bf16.msra.mxu1 %v744_v44  ;;  %962 = vmatprep.subr.bf16.mxu0 %v737_v45  ;;  %v475_v44 = vunpack.c.l.s8.bf16 %v195_v30  ;;  %v539_v45 = vunpack.c.l.s8.bf16 %v227_v31  ;;  %v290_v30 = vld [vmem:[#allocation2 + $0x4d0] sm:$0xff] }
  0xba   :  { %1028 = vmatprep.subr.bf16.mxu1 %v419_v46  ;;  %v187_v46 = vld [vmem:[#allocation2 + $0x198] sm:$0xff] }
  0xbc   :  { %1020 = vmatmul.mubr.bf16.vlgmr.msra.gmra.mxu1 %v3872_v50  ;;  %963 = vmatpush2.bf16.msra.mxu0 %v736_v36  ;;  %v538_v36 = vunpack.c.l.s8.bf16 %v226_v39 }
  0xbd   :  { %1029 = vmatpush1.bf16.msra.mxu1 %v418_v54  ;;  %964 = vmatprep.subr.bf16.mxu0 %v729_v35  ;;  %v467_v54 = vunpack.c.h.s8.bf16 %v187_v46  ;;  %v531_v35 = vunpack.c.h.s8.bf16 %v219_v47 }
  0xbe   :  { %1030 = vmatprep.subr.bf16.mxu1 %v411_v53  ;;  %1060 = vmatprep.mubr.bf16.mxu1 %v3836_v51  ;;  %v186_v53 = vld [vmem:[#allocation2 + $0x190] sm:$0xff] }
  0xbf   :  { %v466_v56 = vunpack.c.h.s8.bf16 %v186_v53  ;;  %v458_v62 = vunpack.c.l.s8.bf16 %v186_v53  ;;  %v275_v53 = vld [vmem:[#allocation2 + $0x458] sm:$0xff] }
  0xc0   :  { %965 = vmatpush2.bf16.msra.mxu0 %v728_v57  ;;  %v530_v57 = vunpack.c.h.s8.bf16 %v218_v55 }
  0xc1   :  { %1031 = vmatpush1.bf16.msra.mxu1 %v410_v58  ;;  %966 = vmatprep.subr.bf16.mxu0 %v721_v59  ;;  %v459_v58 = vunpack.c.l.s8.bf16 %v187_v46  ;;  %v523_v59 = vunpack.c.l.s8.bf16 %v219_v47  ;;  %v282_v46 = vld [vmem:[#allocation2 + $0x490] sm:$0xff] }
  0xc2   :  { %1032 = vmatprep.subr.bf16.mxu1 %v403_v60  ;;  %v179_v60 = vld [vmem:[#allocation2 + $0x158] sm:$0xff] }
  0xc4   :  { %967 = vmatpush2.bf16.msra.mxu0 %v720_v63  ;;  %v522_v63 = vunpack.c.l.s8.bf16 %v218_v55 }
  0xc5   :  { %1033 = vmatpush1.bf16.msra.mxu1 %v402_v1  ;;  %968 = vmatprep.subr.bf16.mxu0 %v713_v2  ;;  %v451_v1 = vunpack.c.h.s8.bf16 %v179_v60  ;;  %v515_v2 = vunpack.c.h.s8.bf16 %v211_v61 }
  0xc6   :  { %1034 = vmatprep.subr.bf16.mxu1 %v395_v3  ;;  %v178_v3 = vld [vmem:[#allocation2 + $0x150] sm:$0xff] }
  0xc7   :  { %v450_v5 = vunpack.c.h.s8.bf16 %v178_v3  ;;  %v442_v12 = vunpack.c.l.s8.bf16 %v178_v3  ;;  %v267_v3 = vld [vmem:[#allocation2 + $0x418] sm:$0xff] }
  0xc8   :  { %969 = vmatpush2.bf16.msra.mxu0 %v712_v6  ;;  %v514_v6 = vunpack.c.h.s8.bf16 %v210_v4 }
  0xc9   :  { %1035 = vmatpush1.bf16.msra.mxu1 %v394_v8  ;;  %970 = vmatprep.subr.bf16.mxu0 %v705_v9  ;;  %v443_v8 = vunpack.c.l.s8.bf16 %v179_v60  ;;  %v507_v9 = vunpack.c.l.s8.bf16 %v211_v61  ;;  %v274_v60 = vld [vmem:[#allocation2 + $0x450] sm:$0xff] }
  0xca   :  { %1036 = vmatprep.subr.bf16.mxu1 %v387_v10  ;;  %v171_v10 = vld [vmem:[#allocation2 + $0x118] sm:$0xff] }
  0xcc   :  { %971 = vmatpush2.bf16.msra.mxu0 %v704_v13  ;;  %v506_v13 = vunpack.c.l.s8.bf16 %v210_v4 }
  0xcd   :  { %1037 = vmatpush1.bf16.msra.mxu1 %v386_v14  ;;  %972 = vmatprep.subr.bf16.mxu0 %v697_v15  ;;  %v435_v14 = vunpack.c.h.s8.bf16 %v171_v10  ;;  %v499_v15 = vunpack.c.h.s8.bf16 %v203_v11 }
  0xce   :  { %1038 = vmatprep.subr.bf16.mxu1 %v379_v16  ;;  %v170_v16 = vld [vmem:[#allocation2 + $0x110] sm:$0xff] }
  0xcf   :  { %v434_v18 = vunpack.c.h.s8.bf16 %v170_v16  ;;  %v426_v24 = vunpack.c.l.s8.bf16 %v170_v16  ;;  %v165_v16 = vld [vmem:[#allocation2 + $0xe8] sm:$0xff] }
  0xd0   :  { %973 = vmatpush2.bf16.msra.mxu0 %v696_v19  ;;  %v498_v19 = vunpack.c.h.s8.bf16 %v202_v17 }
  0xd1   :  { %1039 = vmatpush1.bf16.msra.mxu1 %v378_v20  ;;  %974 = vmatprep.subr.bf16.mxu0 %v689_v21  ;;  %v427_v20 = vunpack.c.l.s8.bf16 %v171_v10  ;;  %v491_v21 = vunpack.c.l.s8.bf16 %v203_v11  ;;  %v266_v10 = vld [vmem:[#allocation2 + $0x410] sm:$0xff] }
  0xd2   :  { %1040 = vmatprep.subr.bf16.mxu1 %v371_v22  ;;  %v259_v22 = vld [vmem:[#allocation2 + $0x3d8] sm:$0xff] }
  0xd4   :  { %975 = vmatpush2.bf16.msra.mxu0 %v688_v25  ;;  %v490_v25 = vunpack.c.l.s8.bf16 %v202_v17 }
  0xd5   :  { %1041 = vmatpush1.bf16.msra.mxu1 %v370_v27  ;;  %976 = vmatprep.subr.bf16.mxu0 %v681_v28  ;;  %v611_v27 = vunpack.c.h.s8.bf16 %v259_v22  ;;  %v675_v28 = vunpack.c.h.s8.bf16 %v291_v23 }
  0xd6   :  { %1042 = vmatprep.subr.bf16.mxu1 %v363_v29  ;;  %v258_v29 = vld [vmem:[#allocation2 + $0x3d0] sm:$0xff] }
  0xd7   :  { %v610_v31 = vunpack.c.h.s8.bf16 %v258_v29  ;;  %v602_v39 = vunpack.c.l.s8.bf16 %v258_v29  ;;  %v157_v29 = vld [vmem:[#allocation2 + $0xa8] sm:$0xff] }
  0xd8   :  { %977 = vmatpush2.bf16.msra.mxu0 %v680_v32  ;;  %v674_v32 = vunpack.c.h.s8.bf16 %v290_v30 }
  0xd9   :  { %1043 = vmatpush1.bf16.msra.mxu1 %v362_v33  ;;  %1069 = vmatprep.subr.bf16.mxu0 %v547_v37  ;;  %v603_v33 = vunpack.c.l.s8.bf16 %v259_v22  ;;  %v251_v37 = vld [vmem:[#allocation2 + $0x398] sm:$0xff]  ;;  %v164_v22 = vld [vmem:[#allocation2 + $0xe0] sm:$0xff] }
  0xda   :  { %1044 = vmatprep.subr.bf16.mxu1 %v483_v34  ;;  %v667_v34 = vunpack.c.l.s8.bf16 %v291_v23 }
  0xdb   :  { %979 = vmatmul.mubr.bf16.vlgmr.msra.gmra.mxu0 %v3868_v42 }
  0xdc   :  { %1070 = vmatpush1.bf16.msra.mxu0 %v546_v43  ;;  %1101 = vmatprep.mubr.bf16.mxu0 %v3841_v52  ;;  %v595_v43 = vunpack.c.h.s8.bf16 %v251_v37 }
  0xdd   :  { %1045 = vmatpush2.bf16.msra.mxu1 %v482_v40  ;;  %1071 = vmatprep.subr.bf16.mxu0 %v539_v45  ;;  %v666_v40 = vunpack.c.l.s8.bf16 %v290_v30  ;;  %v250_v45 = vld [vmem:[#allocation2 + $0x390] sm:$0xff] }
  0xde   :  { %1046 = vmatprep.subr.bf16.mxu1 %v475_v44  ;;  %v659_v44 = vunpack.c.h.s8.bf16 %v283_v38  ;;  %v594_v47 = vunpack.c.h.s8.bf16 %v250_v45  ;;  %v586_v55 = vunpack.c.l.s8.bf16 %v250_v45  ;;  %v149_v45 = vld [vmem:[#allocation2 + $0x68] sm:$0xff] }
  0xe0   :  { %1072 = vmatpush1.bf16.msra.mxu0 %v538_v36  ;;  %v587_v36 = vunpack.c.l.s8.bf16 %v251_v37  ;;  %v156_v37 = vld [vmem:[#allocation2 + $0xa0] sm:$0xff] }
  0xe1   :  { %1047 = vmatpush2.bf16.msra.mxu1 %v474_v49  ;;  %1073 = vmatprep.subr.bf16.mxu0 %v531_v35  ;;  %v658_v49 = vunpack.c.h.s8.bf16 %v282_v46  ;;  %v243_v35 = vld [vmem:[#allocation2 + $0x358] sm:$0xff] }
  0xe2   :  { %1048 = vmatprep.subr.bf16.mxu1 %v467_v54  ;;  %v651_v54 = vunpack.c.l.s8.bf16 %v283_v38 }
  0xe4   :  { %1074 = vmatpush1.bf16.msra.mxu0 %v530_v57  ;;  %v579_v57 = vunpack.c.h.s8.bf16 %v243_v35 }
  0xe5   :  { %1049 = vmatpush2.bf16.msra.mxu1 %v466_v56  ;;  %1075 = vmatprep.subr.bf16.mxu0 %v523_v59  ;;  %v650_v56 = vunpack.c.l.s8.bf16 %v282_v46  ;;  %v242_v59 = vld [vmem:[#allocation2 + $0x350] sm:$0xff] }
  0xe6   :  { %1050 = vmatprep.subr.bf16.mxu1 %v459_v58  ;;  %v643_v58 = vunpack.c.h.s8.bf16 %v275_v53  ;;  %v578_v61 = vunpack.c.h.s8.bf16 %v242_v59  ;;  %v570_v4 = vunpack.c.l.s8.bf16 %v242_v59  ;;  %v141_v59 = vld [vmem:[#allocation2 + $0x28] sm:$0xff] }
  0xe8   :  { %1076 = vmatpush1.bf16.msra.mxu0 %v522_v63  ;;  %v571_v63 = vunpack.c.l.s8.bf16 %v243_v35  ;;  %v148_v35 = vld [vmem:[#allocation2 + $0x60] sm:$0xff] }
  0xe9   :  { %1051 = vmatpush2.bf16.msra.mxu1 %v458_v62  ;;  %1077 = vmatprep.subr.bf16.mxu0 %v515_v2  ;;  %v642_v62 = vunpack.c.h.s8.bf16 %v274_v60  ;;  %v235_v2 = vld [vmem:[#allocation2 + $0x318] sm:$0xff] }
  0xea   :  { %1052 = vmatprep.subr.bf16.mxu1 %v451_v1  ;;  %v635_v1 = vunpack.c.l.s8.bf16 %v275_v53 }
  0xec   :  { %1078 = vmatpush1.bf16.msra.mxu0 %v514_v6  ;;  %v563_v6 = vunpack.c.h.s8.bf16 %v235_v2 }
  0xed   :  { %1053 = vmatpush2.bf16.msra.mxu1 %v450_v5  ;;  %1079 = vmatprep.subr.bf16.mxu0 %v507_v9  ;;  %v634_v5 = vunpack.c.l.s8.bf16 %v274_v60  ;;  %v234_v9 = vld [vmem:[#allocation2 + $0x310] sm:$0xff] }
  0xee   :  { %1054 = vmatprep.subr.bf16.mxu1 %v443_v8  ;;  %v627_v8 = vunpack.c.h.s8.bf16 %v267_v3  ;;  %v562_v11 = vunpack.c.h.s8.bf16 %v234_v9  ;;  %v554_v17 = vunpack.c.l.s8.bf16 %v234_v9  ;;  %v197_v9 = vld [vmem:[#allocation2 + $0x1e8] sm:$0xff] }
  0xf0   :  { %1080 = vmatpush1.bf16.msra.mxu0 %v506_v13  ;;  %v555_v13 = vunpack.c.l.s8.bf16 %v235_v2  ;;  %v140_v2 = vld [vmem:[#allocation2 + $0x20] sm:$0xff] }
  0xf1   :  { %1055 = vmatpush2.bf16.msra.mxu1 %v442_v12  ;;  %1081 = vmatprep.subr.bf16.mxu0 %v499_v15  ;;  %v626_v12 = vunpack.c.h.s8.bf16 %v266_v10  ;;  %v323_v15 = vld [vmem:[#allocation2 + $0x5d8] sm:$0xff] }
  0xf2   :  { %1056 = vmatprep.subr.bf16.mxu1 %v435_v14  ;;  %v619_v14 = vunpack.c.l.s8.bf16 %v267_v3 }
  0xf4   :  { %1082 = vmatpush1.bf16.msra.mxu0 %v498_v19  ;;  %v739_v19 = vunpack.c.h.s8.bf16 %v323_v15 }
  0xf5   :  { %1057 = vmatpush2.bf16.msra.mxu1 %v434_v18  ;;  %1083 = vmatprep.subr.bf16.mxu0 %v491_v21  ;;  %v618_v18 = vunpack.c.l.s8.bf16 %v266_v10  ;;  %v322_v21 = vld [vmem:[#allocation2 + $0x5d0] sm:$0xff] }
  0xf6   :  { %1058 = vmatprep.subr.bf16.mxu1 %v427_v20  ;;  %v421_v20 = vunpack.c.h.s8.bf16 %v165_v16  ;;  %v738_v23 = vunpack.c.h.s8.bf16 %v322_v21  ;;  %v730_v30 = vunpack.c.l.s8.bf16 %v322_v21  ;;  %v189_v21 = vld [vmem:[#allocation2 + $0x1a8] sm:$0xff] }
  0xf8   :  { %1084 = vmatpush1.bf16.msra.mxu0 %v490_v25  ;;  %v731_v25 = vunpack.c.l.s8.bf16 %v323_v15  ;;  %v196_v15 = vld [vmem:[#allocation2 + $0x1e0] sm:$0xff] }
  0xf9   :  { %1059 = vmatpush2.bf16.msra.mxu1 %v426_v24  ;;  %1085 = vmatprep.subr.bf16.mxu0 %v611_v27  ;;  %v420_v24 = vunpack.c.h.s8.bf16 %v164_v22  ;;  %v413_v27 = vunpack.c.l.s8.bf16 %v165_v16 }
  0xfa   :  { %1110 = vmatprep.subr.bf16.mxu1 %v675_v28  ;;  %v315_v28 = vld [vmem:[#allocation2 + $0x598] sm:$0xff] }
  0xfc   :  { %1061 = vmatmul.mubr.bf16.vlgmr.msra.gmra.mxu1 %v3848_v48  ;;  %1086 = vmatpush2.bf16.msra.mxu0 %v610_v31  ;;  %v412_v31 = vunpack.c.l.s8.bf16 %v164_v22 }
  0xfd   :  { %1111 = vmatpush1.bf16.msra.mxu1 %v674_v32  ;;  %1087 = vmatprep.subr.bf16.mxu0 %v603_v33  ;;  %v723_v32 = vunpack.c.h.s8.bf16 %v315_v28  ;;  %v405_v33 = vunpack.c.h.s8.bf16 %v157_v29 }
  0xfe   :  { %1112 = vmatprep.subr.bf16.mxu1 %v667_v34  ;;  %1142 = vmatprep.mubr.bf16.mxu1 %v3860_v0  ;;  %v314_v34 = vld [vmem:[#allocation2 + $0x590] sm:$0xff] }
  0xff   :  { %v722_v38 = vunpack.c.h.s8.bf16 %v314_v34  ;;  %v714_v46 = vunpack.c.l.s8.bf16 %v314_v34  ;;  %v181_v34 = vld [vmem:[#allocation2 + $0x168] sm:$0xff] }
 0x100   :  { %1088 = vmatpush2.bf16.msra.mxu0 %v602_v39  ;;  %v404_v39 = vunpack.c.h.s8.bf16 %v156_v37 }
 0x101   :  { %1113 = vmatpush1.bf16.msra.mxu1 %v666_v40  ;;  %1089 = vmatprep.subr.bf16.mxu0 %v595_v43  ;;  %v715_v40 = vunpack.c.l.s8.bf16 %v315_v28  ;;  %v397_v43 = vunpack.c.l.s8.bf16 %v157_v29  ;;  %v188_v28 = vld [vmem:[#allocation2 + $0x1a0] sm:$0xff] }
 0x102   :  { %1114 = vmatprep.subr.bf16.mxu1 %v659_v44  ;;  %v307_v44 = vld [vmem:[#allocation2 + $0x558] sm:$0xff] }
 0x104   :  { %1090 = vmatpush2.bf16.msra.mxu0 %v594_v47  ;;  %v396_v47 = vunpack.c.l.s8.bf16 %v156_v37 }
 0x105   :  { %1115 = vmatpush1.bf16.msra.mxu1 %v658_v49  ;;  %1091 = vmatprep.subr.bf16.mxu0 %v587_v36  ;;  %v707_v49 = vunpack.c.h.s8.bf16 %v307_v44  ;;  %v389_v36 = vunpack.c.h.s8.bf16 %v149_v45 }
 0x106   :  { %1116 = vmatprep.subr.bf16.mxu1 %v651_v54  ;;  %v306_v54 = vld [vmem:[#allocation2 + $0x550] sm:$0xff] }
 0x107   :  { %v706_v53 = vunpack.c.h.s8.bf16 %v306_v54  ;;  %v698_v60 = vunpack.c.l.s8.bf16 %v306_v54  ;;  %v173_v54 = vld [vmem:[#allocation2 + $0x128] sm:$0xff] }
 0x108   :  { %1092 = vmatpush2.bf16.msra.mxu0 %v586_v55  ;;  %v388_v55 = vunpack.c.h.s8.bf16 %v148_v35 }
 0x109   :  { %1117 = vmatpush1.bf16.msra.mxu1 %v650_v56  ;;  %1093 = vmatprep.subr.bf16.mxu0 %v579_v57  ;;  %v699_v56 = vunpack.c.l.s8.bf16 %v307_v44  ;;  %v381_v57 = vunpack.c.l.s8.bf16 %v149_v45  ;;  %v180_v44 = vld [vmem:[#allocation2 + $0x160] sm:$0xff] }
 0x10a   :  { %1118 = vmatprep.subr.bf16.mxu1 %v643_v58  ;;  %v299_v58 = vld [vmem:[#allocation2 + $0x518] sm:$0xff] }
 0x10c   :  { %1094 = vmatpush2.bf16.msra.mxu0 %v578_v61  ;;  %v380_v61 = vunpack.c.l.s8.bf16 %v148_v35 }
 0x10d   :  { %1119 = vmatpush1.bf16.msra.mxu1 %v642_v62  ;;  %1095 = vmatprep.subr.bf16.mxu0 %v571_v63  ;;  %v691_v62 = vunpack.c.h.s8.bf16 %v299_v58  ;;  %v373_v63 = vunpack.c.h.s8.bf16 %v141_v59 }
 0x10e   :  { %1120 = vmatprep.subr.bf16.mxu1 %v635_v1  ;;  %v298_v1 = vld [vmem:[#allocation2 + $0x510] sm:$0xff] }
 0x10f   :  { %v690_v3 = vunpack.c.h.s8.bf16 %v298_v1  ;;  %v682_v10 = vunpack.c.l.s8.bf16 %v298_v1  ;;  %v293_v1 = vld [vmem:[#allocation2 + $0x4e8] sm:$0xff] }
 0x110   :  { %1096 = vmatpush2.bf16.msra.mxu0 %v570_v4  ;;  %v372_v4 = vunpack.c.h.s8.bf16 %v140_v2 }
 0x111   :  { %1121 = vmatpush1.bf16.msra.mxu1 %v634_v5  ;;  %1097 = vmatprep.subr.bf16.mxu0 %v563_v6  ;;  %v683_v5 = vunpack.c.l.s8.bf16 %v299_v58  ;;  %v365_v6 = vunpack.c.l.s8.bf16 %v141_v59  ;;  %v172_v58 = vld [vmem:[#allocation2 + $0x120] sm:$0xff] }
 0x112   :  { %1122 = vmatprep.subr.bf16.mxu1 %v627_v8  ;;  %v355_v8 = vld [vmem:[#allocation2 + $0x6d8] sm:$0xff] }
 0x114   :  { %1098 = vmatpush2.bf16.msra.mxu0 %v562_v11  ;;  %v364_v11 = vunpack.c.l.s8.bf16 %v140_v2 }
 0x115   :  { %1123 = vmatpush1.bf16.msra.mxu1 %v626_v12  ;;  %1099 = vmatprep.subr.bf16.mxu0 %v555_v13  ;;  %v803_v12 = vunpack.c.h.s8.bf16 %v355_v8  ;;  %v485_v13 = vunpack.c.h.s8.bf16 %v197_v9 }
 0x116   :  { %1124 = vmatprep.subr.bf16.mxu1 %v619_v14  ;;  %v354_v14 = vld [vmem:[#allocation2 + $0x6d0] sm:$0xff] }
 0x117   :  { %v802_v16 = vunpack.c.h.s8.bf16 %v354_v14  ;;  %v794_v22 = vunpack.c.l.s8.bf16 %v354_v14  ;;  %v285_v14 = vld [vmem:[#allocation2 + $0x4a8] sm:$0xff] }
 0x118   :  { %1100 = vmatpush2.bf16.msra.mxu0 %v554_v17  ;;  %v484_v17 = vunpack.c.h.s8.bf16 %v196_v15 }
 0x119   :  { %1125 = vmatpush1.bf16.msra.mxu1 %v618_v18  ;;  %1192 = vmatprep.subr.bf16.mxu0 %v421_v20  ;;  %v795_v18 = vunpack.c.l.s8.bf16 %v355_v8  ;;  %v347_v20 = vld [vmem:[#allocation2 + $0x698] sm:$0xff]  ;;  %v292_v8 = vld [vmem:[#allocation2 + $0x4e0] sm:$0xff] }
 0x11a   :  { %1126 = vmatprep.subr.bf16.mxu1 %v739_v19  ;;  %v477_v19 = vunpack.c.l.s8.bf16 %v197_v9 }
 0x11b   :  { %1102 = vmatmul.mubr.bf16.vlgmr.msra.gmra.mxu0 %v3857_v41 }
 0x11c   :  { %1193 = vmatpush1.bf16.msra.mxu0 %v420_v24  ;;  %1224 = vmatprep.mubr.bf16.mxu0 %v3836_v51  ;;  %v787_v24 = vunpack.c.h.s8.bf16 %v347_v20 }
 0x11d   :  { %1127 = vmatpush2.bf16.msra.mxu1 %v738_v23  ;;  %1194 = vmatprep.subr.bf16.mxu0 %v413_v27  ;;  %v476_v23 = vunpack.c.l.s8.bf16 %v196_v15  ;;  %v346_v27 = vld [vmem:[#allocation2 + $0x690] sm:$0xff] }
 0x11e   :  { %1128 = vmatprep.subr.bf16.mxu1 %v731_v25  ;;  %v469_v25 = vunpack.c.h.s8.bf16 %v189_v21  ;;  %v786_v29 = vunpack.c.h.s8.bf16 %v346_v27  ;;  %v778_v37 = vunpack.c.l.s8.bf16 %v346_v27 }
 0x120   :  { %1195 = vmatpush1.bf16.msra.mxu0 %v412_v31  ;;  %v779_v31 = vunpack.c.l.s8.bf16 %v347_v20 }
 0x121   :  { %1129 = vmatpush2.bf16.msra.mxu1 %v730_v30  ;;  %1196 = vmatprep.subr.bf16.mxu0 %v405_v33  ;;  %v468_v30 = vunpack.c.h.s8.bf16 %v188_v28  ;;  %v339_v33 = vld [vmem:[#allocation2 + $0x658] sm:$0xff] }
 0x122   :  { %1130 = vmatprep.subr.bf16.mxu1 %v723_v32  ;;  %v461_v32 = vunpack.c.l.s8.bf16 %v189_v21 }
 0x124   :  { %1197 = vmatpush1.bf16.msra.mxu0 %v404_v39  ;;  %v771_v39 = vunpack.c.h.s8.bf16 %v339_v33 }
 0x125   :  { %1131 = vmatpush2.bf16.msra.mxu1 %v722_v38  ;;  %1198 = vmatprep.subr.bf16.mxu0 %v397_v43  ;;  %v460_v38 = vunpack.c.l.s8.bf16 %v188_v28  ;;  %v338_v43 = vld [vmem:[#allocation2 + $0x650] sm:$0xff] }
 0x126   :  { %1132 = vmatprep.subr.bf16.mxu1 %v715_v40  ;;  %v453_v40 = vunpack.c.h.s8.bf16 %v181_v34  ;;  %v770_v45 = vunpack.c.h.s8.bf16 %v338_v43  ;;  %v762_v35 = vunpack.c.l.s8.bf16 %v338_v43 }
 0x128   :  { %1199 = vmatpush1.bf16.msra.mxu0 %v396_v47  ;;  %v763_v47 = vunpack.c.l.s8.bf16 %v339_v33 }
 0x129   :  { %1133 = vmatpush2.bf16.msra.mxu1 %v714_v46  ;;  %1200 = vmatprep.subr.bf16.mxu0 %v389_v36  ;;  %v452_v46 = vunpack.c.h.s8.bf16 %v180_v44  ;;  %v331_v36 = vld [vmem:[#allocation2 + $0x618] sm:$0xff] }
 0x12a   :  { %1134 = vmatprep.subr.bf16.mxu1 %v707_v49  ;;  %v445_v49 = vunpack.c.l.s8.bf16 %v181_v34  ;;  %v653_v34 = vunpack.c.l.s8.bf16 %v285_v14 }
 0x12c   :  { %1201 = vmatpush1.bf16.msra.mxu0 %v388_v55  ;;  %v755_v55 = vunpack.c.h.s8.bf16 %v331_v36 }
 0x12d   :  { %1135 = vmatpush2.bf16.msra.mxu1 %v706_v53  ;;  %1202 = vmatprep.subr.bf16.mxu0 %v381_v57  ;;  %v444_v53 = vunpack.c.l.s8.bf16 %v180_v44  ;;  %v330_v57 = vld [vmem:[#allocation2 + $0x610] sm:$0xff] }
 0x12e   :  { %1136 = vmatprep.subr.bf16.mxu1 %v699_v56  ;;  %v437_v56 = vunpack.c.h.s8.bf16 %v173_v54  ;;  %v754_v59 = vunpack.c.h.s8.bf16 %v330_v57  ;;  %v746_v2 = vunpack.c.l.s8.bf16 %v330_v57 }
 0x130   :  { %1203 = vmatpush1.bf16.msra.mxu0 %v380_v61  ;;  %v747_v61 = vunpack.c.l.s8.bf16 %v331_v36 }
 0x131   :  { %1137 = vmatpush2.bf16.msra.mxu1 %v698_v60  ;;  %1204 = vmatprep.subr.bf16.mxu0 %v373_v63  ;;  %v436_v60 = vunpack.c.h.s8.bf16 %v172_v58  ;;  %v229_v63 = vld [vmem:[#allocation2 + $0x2e8] sm:$0xff] }
 0x132   :  { %1138 = vmatprep.subr.bf16.mxu1 %v691_v62  ;;  %v429_v62 = vunpack.c.l.s8.bf16 %v173_v54 }
 0x134   :  { %1205 = vmatpush1.bf16.msra.mxu0 %v372_v4  ;;  %v549_v4 = vunpack.c.h.s8.bf16 %v229_v63 }
 0x135   :  { %1139 = vmatpush2.bf16.msra.mxu1 %v690_v3  ;;  %1206 = vmatprep.subr.bf16.mxu0 %v365_v6  ;;  %v428_v3 = vunpack.c.l.s8.bf16 %v172_v58  ;;  %v228_v6 = vld [vmem:[#allocation2 + $0x2e0] sm:$0xff] }
 0x136   :  { %1140 = vmatprep.subr.bf16.mxu1 %v683_v5  ;;  %v677_v5 = vunpack.c.h.s8.bf16 %v293_v1  ;;  %v548_v9 = vunpack.c.h.s8.bf16 %v228_v6 }
 0x138   :  { %1207 = vmatpush1.bf16.msra.mxu0 %v364_v11  ;;  %v541_v11 = vunpack.c.l.s8.bf16 %v229_v63 }
 0x139   :  { %1141 = vmatpush2.bf16.msra.mxu1 %v682_v10  ;;  %1208 = vmatprep.subr.bf16.mxu0 %v485_v13  ;;  %v676_v10 = vunpack.c.h.s8.bf16 %v292_v8  ;;  %v221_v13 = vld [vmem:[#allocation2 + $0x2a8] sm:$0xff] }
 0x13a   :  { %1151 = vmatprep.subr.bf16.mxu1 %v803_v12  ;;  %v669_v12 = vunpack.c.l.s8.bf16 %v293_v1  ;;  %v525_v33 = vunpack.c.l.s8.bf16 %v221_v13 }
 0x13c   :  { %1143 = vmatmul.mubr.bf16.vlgmr.msra.gmra.mxu1 %v3868_v42  ;;  %1209 = vmatpush2.bf16.msra.mxu0 %v484_v17 }
 0x13d   :  { %1152 = vmatpush1.bf16.msra.mxu1 %v802_v16  ;;  %1210 = vmatprep.subr.bf16.mxu0 %v477_v19  ;;  %v668_v19 = vunpack.c.l.s8.bf16 %v292_v8 }
 0x13e   :  { %1153 = vmatprep.subr.bf16.mxu1 %v795_v18  ;;  %1183 = vmatprep.mubr.bf16.mxu1 %v3725_v7  ;;  %v540_v18 = vunpack.c.l.s8.bf16 %v228_v6 }
 0x140   :  { %1211 = vmatpush2.bf16.msra.mxu0 %v476_v23  ;;  %v661_v23 = vunpack.c.h.s8.bf16 %v285_v14 }
 0x141   :  { %1154 = vmatpush1.bf16.msra.mxu1 %v794_v22  ;;  %1212 = vmatprep.subr.bf16.mxu0 %v469_v25  ;;  %v533_v22 = vunpack.c.h.s8.bf16 %v221_v13  ;;  %v284_v25 = vld [vmem:[#allocation2 + $0x4a0] sm:$0xff] }
 0x142   :  { %1155 = vmatprep.subr.bf16.mxu1 %v787_v24  ;;  %v220_v24 = vld [vmem:[#allocation2 + $0x2a0] sm:$0xff]  ;;  %v652_v43 = vunpack.c.l.s8.bf16 %v284_v25 }
 0x144   :  { %1213 = vmatpush2.bf16.msra.mxu0 %v468_v30  ;;  %v532_v30 = vunpack.c.h.s8.bf16 %v220_v24 }
 0x145   :  { %1156 = vmatpush1.bf16.msra.mxu1 %v786_v29  ;;  %1214 = vmatprep.subr.bf16.mxu0 %v461_v32 }
 0x146   :  { %1157 = vmatprep.subr.bf16.mxu1 %v779_v31  ;;  %v660_v31 = vunpack.c.h.s8.bf16 %v284_v25  ;;  %v252_v25 = vld [vmem:[#allocation2 + $0x3a0] sm:$0xff] }
 0x148   :  { %1215 = vmatpush2.bf16.msra.mxu0 %v460_v38  ;;  %v213_v38 = vld [vmem:[#allocation2 + $0x268] sm:$0xff] }
 0x149   :  { %1158 = vmatpush1.bf16.msra.mxu1 %v778_v37  ;;  %1216 = vmatprep.subr.bf16.mxu0 %v453_v40  ;;  %v524_v40 = vunpack.c.l.s8.bf16 %v220_v24  ;;  %v517_v44 = vunpack.c.h.s8.bf16 %v213_v38  ;;  %v509_v54 = vunpack.c.l.s8.bf16 %v213_v38  ;;  %v309_v38 = vld [vmem:[#allocation2 + $0x568] sm:$0xff] }
 0x14a   :  { %1159 = vmatprep.subr.bf16.mxu1 %v771_v39  ;;  %v277_v39 = vld [vmem:[#allocation2 + $0x468] sm:$0xff] }
 0x14c   :  { %1217 = vmatpush2.bf16.msra.mxu0 %v452_v46  ;;  %v212_v46 = vld [vmem:[#allocation2 + $0x260] sm:$0xff] }
 0x14d   :  { %1160 = vmatpush1.bf16.msra.mxu1 %v770_v45  ;;  %1218 = vmatprep.subr.bf16.mxu0 %v445_v49  ;;  %v645_v45 = vunpack.c.h.s8.bf16 %v277_v39  ;;  %v516_v49 = vunpack.c.h.s8.bf16 %v212_v46 }
 0x14e   :  { %1161 = vmatprep.subr.bf16.mxu1 %v763_v47  ;;  %v276_v47 = vld [vmem:[#allocation2 + $0x460] sm:$0xff] }
 0x14f   :  { %v644_v36 = vunpack.c.h.s8.bf16 %v276_v47  ;;  %v636_v57 = vunpack.c.l.s8.bf16 %v276_v47 }
 0x150   :  { %1219 = vmatpush2.bf16.msra.mxu0 %v444_v53  ;;  %v205_v53 = vld [vmem:[#allocation2 + $0x228] sm:$0xff] }
 0x151   :  { %1162 = vmatpush1.bf16.msra.mxu1 %v762_v35  ;;  %1220 = vmatprep.subr.bf16.mxu0 %v437_v56  ;;  %v637_v35 = vunpack.c.l.s8.bf16 %v277_v39  ;;  %v508_v56 = vunpack.c.l.s8.bf16 %v212_v46  ;;  %v501_v58 = vunpack.c.h.s8.bf16 %v205_v53  ;;  %v493_v1 = vunpack.c.l.s8.bf16 %v205_v53  ;;  %v308_v46 = vld [vmem:[#allocation2 + $0x560] sm:$0xff]  ;;  %v301_v53 = vld [vmem:[#allocation2 + $0x528] sm:$0xff] }
 0x152   :  { %1163 = vmatprep.subr.bf16.mxu1 %v755_v55  ;;  %v269_v55 = vld [vmem:[#allocation2 + $0x428] sm:$0xff]  ;;  %v588_v39 = vunpack.c.l.s8.bf16 %v252_v25 }
 0x154   :  { %1221 = vmatpush2.bf16.msra.mxu0 %v436_v60  ;;  %v204_v60 = vld [vmem:[#allocation2 + $0x220] sm:$0xff] }
 0x155   :  { %1164 = vmatpush1.bf16.msra.mxu1 %v754_v59  ;;  %1222 = vmatprep.subr.bf16.mxu0 %v429_v62  ;;  %v629_v59 = vunpack.c.h.s8.bf16 %v269_v55  ;;  %v500_v62 = vunpack.c.h.s8.bf16 %v204_v60 }
 0x156   :  { %1165 = vmatprep.subr.bf16.mxu1 %v747_v61  ;;  %v268_v61 = vld [vmem:[#allocation2 + $0x420] sm:$0xff] }
 0x157   :  { %v628_v63 = vunpack.c.h.s8.bf16 %v268_v61  ;;  %v620_v6 = vunpack.c.l.s8.bf16 %v268_v61 }
 0x158   :  { %1223 = vmatpush2.bf16.msra.mxu0 %v428_v3  ;;  %v261_v3 = vld [vmem:[#allocation2 + $0x3e8] sm:$0xff] }
 0x159   :  { %1166 = vmatpush1.bf16.msra.mxu1 %v746_v2  ;;  %1274 = vmatprep.subr.bf16.mxu0 %v677_v5  ;;  %v621_v2 = vunpack.c.l.s8.bf16 %v269_v55  ;;  %v492_v5 = vunpack.c.l.s8.bf16 %v204_v60  ;;  %v613_v8 = vunpack.c.h.s8.bf16 %v261_v3  ;;  %v605_v14 = vunpack.c.l.s8.bf16 %v261_v3  ;;  %v300_v60 = vld [vmem:[#allocation2 + $0x520] sm:$0xff]  ;;  %v231_v3 = vld [vmem:[#allocation2 + $0x2f8] sm:$0xff] }
 0x15a   :  { %1233 = vmatprep.subr.bf16.mxu1 %v549_v4  ;;  %v325_v4 = vld [vmem:[#allocation2 + $0x5e8] sm:$0xff] }
 0x15b   :  { %v898_v15 = vpop.f32.mrf.mxu0  ;;  %1225 = vmatmul.mubr.bf16.vlgmr.msra.gmra.mxu0 %v3848_v48 }
 0x15c   :  { %v939_v16 = vpop.f32.mrf.mxu1  ;;  %1184 = vmatmul.mubr.bf16.vlgmr.msra.gmra.mxu1 %v3872_v50  ;;  %1275 = vmatpush1.bf16.msra.mxu0 %v676_v10  ;;  %v260_v10 = vld [vmem:[#allocation2 + $0x3e0] sm:$0xff] }
 0x15d   :  { %v3886_v17 = vadd.f32 %v939_v16, %v898_v15  ;;  %1234 = vmatpush1.bf16.msra.mxu1 %v548_v9  ;;  %v900_v20 = vpop.f32.mrf.mxu0  ;;  %1276 = vmatprep.subr.bf16.mxu0 %v669_v12  ;;  %v741_v9 = vunpack.c.h.s8.bf16 %v325_v4  ;;  %v612_v12 = vunpack.c.h.s8.bf16 %v260_v10  ;;  %v733_v15 = vunpack.c.l.s8.bf16 %v325_v4  ;;  %v253_v16 = vld [vmem:[#allocation2 + $0x3a8] sm:$0xff] }
 0x15e   :  { %v941_v21 = vpop.f32.mrf.mxu1  ;;  %1235 = vmatprep.subr.bf16.mxu1 %v541_v11  ;;  %1265 = vmatprep.mubr.bf16.mxu1 %v3841_v52  ;;  %v324_v11 = vld [vmem:[#allocation2 + $0x5e0] sm:$0xff] }
 0x15f   :  { %v3888_v27 = vadd.f32 %v941_v21, %v900_v20  ;;  %1306 = vmatprep.mubr.bf16.mxu0 %v3860_v0  ;;  %v902_v29 = vpop.f32.mrf.mxu0  ;;  %v740_v13 = vunpack.c.h.s8.bf16 %v324_v11  ;;  %v604_v20 = vunpack.c.l.s8.bf16 %v260_v10  ;;  %v732_v21 = vunpack.c.l.s8.bf16 %v324_v11  ;;  %v230_v10 = vld [vmem:[#allocation2 + $0x2f0] sm:$0xff] }
 0x160   :  { %v943_v28 = vpop.f32.mrf.mxu1  ;;  %1277 = vmatpush1.bf16.msra.mxu0 %v668_v19 }
 0x161   :  { %1236 = vmatpush1.bf16.msra.mxu1 %v540_v18  ;;  %1278 = vmatprep.subr.bf16.mxu0 %v661_v23  ;;  %v903_v37 = vpop.f32.mrf.mxu0  ;;  %v317_v18 = vld [vmem:[#allocation2 + $0x5a8] sm:$0xff]  ;;  %v597_v23 = vunpack.c.h.s8.bf16 %v253_v16  ;;  %v316_v28 = vld [vmem:[#allocation2 + $0x5a0] sm:$0xff] }
 0x162   :  { %v944_v32 = vpop.f32.mrf.mxu1  ;;  %1237 = vmatprep.subr.bf16.mxu1 %v533_v22  ;;  %v725_v24 = vunpack.c.h.s8.bf16 %v317_v18  ;;  %v245_v37 = vld [vmem:[#allocation2 + $0x368] sm:$0xff] }
 0x164   :  { %1279 = vmatpush1.bf16.msra.mxu0 %v660_v31  ;;  %v724_v31 = vunpack.c.h.s8.bf16 %v316_v28 }
 0x165   :  { %1238 = vmatpush1.bf16.msra.mxu1 %v532_v30  ;;  %1280 = vmatprep.subr.bf16.mxu0 %v653_v34  ;;  %v596_v30 = vunpack.c.h.s8.bf16 %v252_v25  ;;  %v717_v34 = vunpack.c.l.s8.bf16 %v317_v18 }
 0x166   :  { %1239 = vmatprep.subr.bf16.mxu1 %v525_v33  ;;  %v589_v33 = vunpack.c.l.s8.bf16 %v253_v16  ;;  %v223_v16 = vld [vmem:[#allocation2 + $0x2b8] sm:$0xff] }
 0x168   :  { %1281 = vmatpush1.bf16.msra.mxu0 %v652_v43  ;;  %v581_v43 = vunpack.c.h.s8.bf16 %v245_v37 }
 0x169   :  { %1240 = vmatpush1.bf16.msra.mxu1 %v524_v40  ;;  %1282 = vmatprep.subr.bf16.mxu0 %v645_v45  ;;  %v716_v40 = vunpack.c.l.s8.bf16 %v316_v28  ;;  %v244_v45 = vld [vmem:[#allocation2 + $0x360] sm:$0xff]  ;;  %v535_v28 = vunpack.c.h.s8.bf16 %v223_v16 }
 0x16a   :  { %1241 = vmatprep.subr.bf16.mxu1 %v517_v44  ;;  %v709_v44 = vunpack.c.h.s8.bf16 %v309_v38  ;;  %v580_v47 = vunpack.c.h.s8.bf16 %v244_v45  ;;  %v572_v55 = vunpack.c.l.s8.bf16 %v244_v45  ;;  %v340_v45 = vld [vmem:[#allocation2 + $0x660] sm:$0xff] }
 0x16c   :  { %1283 = vmatpush1.bf16.msra.mxu0 %v644_v36  ;;  %v573_v36 = vunpack.c.l.s8.bf16 %v245_v37 }
 0x16d   :  { %1242 = vmatpush1.bf16.msra.mxu1 %v516_v49  ;;  %1284 = vmatprep.subr.bf16.mxu0 %v637_v35  ;;  %v708_v49 = vunpack.c.h.s8.bf16 %v308_v46  ;;  %v237_v35 = vld [vmem:[#allocation2 + $0x328] sm:$0xff] }
 0x16e   :  { %1243 = vmatprep.subr.bf16.mxu1 %v509_v54  ;;  %v701_v54 = vunpack.c.l.s8.bf16 %v309_v38 }
 0x170   :  { %1285 = vmatpush1.bf16.msra.mxu0 %v636_v57  ;;  %v565_v57 = vunpack.c.h.s8.bf16 %v237_v35 }
 0x171   :  { %1244 = vmatpush1.bf16.msra.mxu1 %v508_v56  ;;  %1286 = vmatprep.subr.bf16.mxu0 %v629_v59  ;;  %v700_v56 = vunpack.c.l.s8.bf16 %v308_v46  ;;  %v236_v59 = vld [vmem:[#allocation2 + $0x320] sm:$0xff]  ;;  %v214_v46 = vld [vmem:[#allocation2 + $0x270] sm:$0xff] }
 0x172   :  { %1245 = vmatprep.subr.bf16.mxu1 %v501_v58  ;;  %v693_v58 = vunpack.c.h.s8.bf16 %v301_v53  ;;  %v564_v61 = vunpack.c.h.s8.bf16 %v236_v59  ;;  %v556_v4 = vunpack.c.l.s8.bf16 %v236_v59  ;;  %v332_v59 = vld [vmem:[#allocation2 + $0x620] sm:$0xff] }
 0x174   :  { %1287 = vmatpush1.bf16.msra.mxu0 %v628_v63  ;;  %v557_v63 = vunpack.c.l.s8.bf16 %v237_v35  ;;  %v333_v35 = vld [vmem:[#allocation2 + $0x628] sm:$0xff] }
 0x175   :  { %1246 = vmatpush1.bf16.msra.mxu1 %v500_v62  ;;  %1288 = vmatprep.subr.bf16.mxu0 %v621_v2  ;;  %v692_v62 = vunpack.c.h.s8.bf16 %v300_v60  ;;  %v357_v2 = vld [vmem:[#allocation2 + $0x6e8] sm:$0xff] }
 0x176   :  { %1247 = vmatprep.subr.bf16.mxu1 %v493_v1  ;;  %v685_v1 = vunpack.c.l.s8.bf16 %v301_v53  ;;  %v207_v53 = vld [vmem:[#allocation2 + $0x238] sm:$0xff] }
 0x178   :  { %1289 = vmatpush1.bf16.msra.mxu0 %v620_v6  ;;  %v805_v6 = vunpack.c.h.s8.bf16 %v357_v2 }
 0x179   :  { %1248 = vmatpush1.bf16.msra.mxu1 %v492_v5  ;;  %1290 = vmatprep.subr.bf16.mxu0 %v741_v9  ;;  %v684_v5 = vunpack.c.l.s8.bf16 %v300_v60  ;;  %v356_v9 = vld [vmem:[#allocation2 + $0x6e0] sm:$0xff]  ;;  %v206_v60 = vld [vmem:[#allocation2 + $0x230] sm:$0xff] }
 0x17a   :  { %1249 = vmatprep.subr.bf16.mxu1 %v613_v8  ;;  %v551_v8 = vunpack.c.h.s8.bf16 %v231_v3  ;;  %v804_v11 = vunpack.c.h.s8.bf16 %v356_v9 }
 0x17c   :  { %v3892_v19 = vpop.f32.mrf.mxu1  ;;  %1291 = vmatpush2.bf16.msra.mxu0 %v740_v13  ;;  %v797_v13 = vunpack.c.l.s8.bf16 %v357_v2  ;;  %v167_v2 = vld [vmem:[#allocation2 + $0xf8] sm:$0xff] }
 0x17d   :  { %1250 = vmatpush2.bf16.msra.mxu1 %v612_v12  ;;  %1292 = vmatprep.subr.bf16.mxu0 %v733_v15  ;;  %v550_v12 = vunpack.c.h.s8.bf16 %v230_v10  ;;  %v349_v15 = vld [vmem:[#allocation2 + $0x6a8] sm:$0xff] }
 0x17e   :  { %v3894_v22 = vpop.f32.mrf.mxu1  ;;  %1251 = vmatprep.subr.bf16.mxu1 %v605_v14  ;;  %v543_v14 = vunpack.c.l.s8.bf16 %v231_v3  ;;  %v789_v25 = vunpack.c.h.s8.bf16 %v349_v15  ;;  %v781_v38 = vunpack.c.l.s8.bf16 %v349_v15  ;;  %v263_v3 = vld [vmem:[#allocation2 + $0x3f8] sm:$0xff] }
 0x17f   :  { %v159_v15 = vld [vmem:[#allocation2 + $0xb8] sm:$0xff] }
 0x180   :  { %v1025_v29 = vpop.f32.mrf.mxu1  ;;  %1293 = vmatpush2.bf16.msra.mxu0 %v732_v21  ;;  %v796_v21 = vunpack.c.l.s8.bf16 %v356_v9  ;;  %v166_v9 = vld [vmem:[#allocation2 + $0xf0] sm:$0xff] }
 0x181   :  { %1252 = vmatpush2.bf16.msra.mxu1 %v604_v20  ;;  %1294 = vmatprep.subr.bf16.mxu0 %v725_v24  ;;  %v348_v29 = vld [vmem:[#allocation2 + $0x6a0] sm:$0xff] }
 0x182   :  { %v1026_v32 = vpop.f32.mrf.mxu1  ;;  %1253 = vmatprep.subr.bf16.mxu1 %v597_v23  ;;  %v542_v23 = vunpack.c.l.s8.bf16 %v230_v10  ;;  %v262_v10 = vld [vmem:[#allocation2 + $0x3f0] sm:$0xff] }
 0x184   :  { %1295 = vmatpush2.bf16.msra.mxu0 %v724_v31 }
 0x185   :  { %1254 = vmatpush2.bf16.msra.mxu1 %v596_v30  ;;  %1296 = vmatprep.subr.bf16.mxu0 %v717_v34  ;;  %v222_v30 = vld [vmem:[#allocation2 + $0x2b0] sm:$0xff]  ;;  %v788_v34 = vunpack.c.h.s8.bf16 %v348_v29 }
 0x186   :  { %1255 = vmatprep.subr.bf16.mxu1 %v589_v33  ;;  %v534_v37 = vunpack.c.h.s8.bf16 %v222_v30 }
 0x188   :  { %1297 = vmatpush2.bf16.msra.mxu0 %v716_v40  ;;  %v341_v40 = vld [vmem:[#allocation2 + $0x668] sm:$0xff] }
 0x189   :  { %1256 = vmatpush2.bf16.msra.mxu1 %v588_v39  ;;  %1298 = vmatprep.subr.bf16.mxu0 %v709_v44  ;;  %v527_v39 = vunpack.c.l.s8.bf16 %v223_v16  ;;  %v526_v44 = vunpack.c.l.s8.bf16 %v222_v30  ;;  %v255_v16 = vld [vmem:[#allocation2 + $0x3b8] sm:$0xff] }
 0x18a   :  { %1257 = vmatprep.subr.bf16.mxu1 %v581_v43  ;;  %v215_v43 = vld [vmem:[#allocation2 + $0x278] sm:$0xff] }
 0x18c   :  { %1299 = vmatpush2.bf16.msra.mxu0 %v708_v49  ;;  %v518_v49 = vunpack.c.h.s8.bf16 %v214_v46 }
 0x18d   :  { %1258 = vmatpush2.bf16.msra.mxu1 %v580_v47  ;;  %1300 = vmatprep.subr.bf16.mxu0 %v701_v54  ;;  %v772_v47 = vunpack.c.h.s8.bf16 %v340_v45  ;;  %v511_v54 = vunpack.c.l.s8.bf16 %v215_v43 }
 0x18e   :  { %1259 = vmatprep.subr.bf16.mxu1 %v573_v36  ;;  %v765_v36 = vunpack.c.l.s8.bf16 %v341_v40 }
 0x190   :  { %1301 = vmatpush2.bf16.msra.mxu0 %v700_v56  ;;  %v510_v56 = vunpack.c.l.s8.bf16 %v214_v46 }
 0x191   :  { %1260 = vmatpush2.bf16.msra.mxu1 %v572_v55  ;;  %1302 = vmatprep.subr.bf16.mxu0 %v693_v58  ;;  %v764_v55 = vunpack.c.l.s8.bf16 %v340_v45  ;;  %v503_v58 = vunpack.c.h.s8.bf16 %v207_v53 }
 0x192   :  { %1261 = vmatprep.subr.bf16.mxu1 %v565_v57  ;;  %v757_v57 = vunpack.c.h.s8.bf16 %v333_v35 }
 0x194   :  { %1303 = vmatpush2.bf16.msra.mxu0 %v692_v62  ;;  %v502_v62 = vunpack.c.h.s8.bf16 %v206_v60 }
 0x195   :  { %1262 = vmatpush2.bf16.msra.mxu1 %v564_v61  ;;  %1304 = vmatprep.subr.bf16.mxu0 %v685_v1  ;;  %v756_v61 = vunpack.c.h.s8.bf16 %v332_v59  ;;  %v495_v1 = vunpack.c.l.s8.bf16 %v207_v53 }
 0x196   :  { %1263 = vmatprep.subr.bf16.mxu1 %v557_v63  ;;  %v749_v63 = vunpack.c.l.s8.bf16 %v333_v35 }
 0x198   :  { %1305 = vmatpush2.bf16.msra.mxu0 %v684_v5  ;;  %v494_v5 = vunpack.c.l.s8.bf16 %v206_v60 }
 0x199   :  { %1264 = vmatpush2.bf16.msra.mxu1 %v556_v4  ;;  %1397 = vmatprep.subr.bf16.mxu0 %v551_v8  ;;  %v748_v4 = vunpack.c.l.s8.bf16 %v332_v59  ;;  %v615_v8 = vunpack.c.h.s8.bf16 %v263_v3 }
 0x19a   :  { %1315 = vmatprep.subr.bf16.mxu1 %v805_v6  ;;  %v423_v6 = vunpack.c.h.s8.bf16 %v167_v2 }
 0x19b   :  { %v980_v18 = vpop.f32.mrf.mxu0  ;;  %1307 = vmatmul.mubr.bf16.vlgmr.msra.gmra.mxu0 %v3868_v42 }
 0x19c   :  { %1266 = vmatmul.mubr.bf16.vlgmr.msra.gmra.mxu1 %v3857_v41  ;;  %v981_v20 = vadd.f32 %v980_v18, %v3886_v17  ;;  %1398 = vmatpush1.bf16.msra.mxu0 %v550_v12  ;;  %v614_v12 = vunpack.c.h.s8.bf16 %v262_v10 }
 0x19d   :  { %1316 = vmatpush1.bf16.msra.mxu1 %v804_v11  ;;  %v982_v24 = vpop.f32.mrf.mxu0  ;;  %1399 = vmatprep.subr.bf16.mxu0 %v543_v14  ;;  %v422_v11 = vunpack.c.h.s8.bf16 %v166_v9  ;;  %v607_v14 = vunpack.c.l.s8.bf16 %v263_v3 }
 0x19e   :  { %1317 = vmatprep.subr.bf16.mxu1 %v797_v13  ;;  %v3900_v31 = vadd.f32 %v3892_v19, %v981_v20  ;;  %v983_v32 = vadd.f32 %v982_v24, %v3888_v27  ;;  %1347 = vmatprep.mubr.bf16.mxu1 %v3725_v7  ;;  %v780_v27 = vunpack.c.l.s8.bf16 %v348_v29  ;;  %v415_v13 = vunpack.c.l.s8.bf16 %v167_v2  ;;  %v254_v29 = vld [vmem:[#allocation2 + $0x3b0] sm:$0xff] }
 0x19f   :  { %1429 = vmatprep.mubr.bf16.mxu0 %v3841_v52  ;;  %v984_v17 = vpop.f32.mrf.mxu0  ;;  %v773_v52 = vunpack.c.h.s8.bf16 %v341_v40  ;;  %v414_v20 = vunpack.c.l.s8.bf16 %v166_v9  ;;  %v407_v24 = vunpack.c.h.s8.bf16 %v159_v15 }
 0x1a0   :  { %v3906_v33 = vadd.f32 %v3894_v22, %v983_v32  ;;  %1400 = vmatpush1.bf16.msra.mxu0 %v542_v23  ;;  %v519_v22 = vunpack.c.h.s8.bf16 %v215_v43  ;;  %v598_v17 = vunpack.c.h.s8.bf16 %v254_v29  ;;  %v590_v43 = vunpack.c.l.s8.bf16 %v254_v29  ;;  %v350_v29 = vld [vmem:[#allocation2 + $0x6b0] sm:$0xff] }
 0x1a1   :  { %1318 = vmatpush1.bf16.msra.mxu1 %v796_v21  ;;  %1401 = vmatprep.subr.bf16.mxu0 %v535_v28  ;;  %v985_v19 = vpop.f32.mrf.mxu0  ;;  %v606_v21 = vunpack.c.l.s8.bf16 %v262_v10  ;;  %v158_v28 = vld [vmem:[#allocation2 + $0xb0] sm:$0xff] }
 0x1a2   :  { %1319 = vmatprep.subr.bf16.mxu1 %v789_v25  ;;  %v599_v25 = vunpack.c.h.s8.bf16 %v255_v16  ;;  %v406_v32 = vunpack.c.h.s8.bf16 %v158_v28  ;;  %v247_v19 = vld [vmem:[#allocation2 + $0x378] sm:$0xff]  ;;  %v398_v40 = vunpack.c.l.s8.bf16 %v158_v28  ;;  %v190_v28 = vld [vmem:[#allocation2 + $0x1b0] sm:$0xff] }
 0x1a4   :  { %1402 = vmatpush1.bf16.msra.mxu0 %v534_v37  ;;  %v399_v37 = vunpack.c.l.s8.bf16 %v159_v15 }
 0x1a5   :  { %1320 = vmatpush1.bf16.msra.mxu1 %v788_v34  ;;  %1403 = vmatprep.subr.bf16.mxu0 %v527_v39  ;;  %v151_v39 = vld [vmem:[#allocation2 + $0x78] sm:$0xff] }
 0x1a6   :  { %1321 = vmatprep.subr.bf16.mxu1 %v781_v38  ;;  %v591_v38 = vunpack.c.l.s8.bf16 %v255_v16  ;;  %v383_v46 = vunpack.c.l.s8.bf16 %v151_v39 }
 0x1a8   :  { %1404 = vmatpush1.bf16.msra.mxu0 %v526_v44  ;;  %v150_v44 = vld [vmem:[#allocation2 + $0x70] sm:$0xff] }
 0x1a9   :  { %1322 = vmatpush1.bf16.msra.mxu1 %v780_v27  ;;  %1405 = vmatprep.subr.bf16.mxu0 %v519_v22  ;;  %v391_v27 = vunpack.c.h.s8.bf16 %v151_v39  ;;  %v390_v22 = vunpack.c.h.s8.bf16 %v150_v44  ;;  %v343_v39 = vld [vmem:[#allocation2 + $0x678] sm:$0xff] }
 0x1aa   :  { %1323 = vmatprep.subr.bf16.mxu1 %v773_v52  ;;  %v246_v52 = vld [vmem:[#allocation2 + $0x370] sm:$0xff] }
 0x1ab   :  { %v582_v45 = vunpack.c.h.s8.bf16 %v246_v52  ;;  %v574_v35 = vunpack.c.l.s8.bf16 %v246_v52 }
 0x1ac   :  { %1406 = vmatpush1.bf16.msra.mxu0 %v518_v49  ;;  %v143_v49 = vld [vmem:[#allocation2 + $0x38] sm:$0xff] }
 0x1ad   :  { %1324 = vmatpush1.bf16.msra.mxu1 %v772_v47  ;;  %1407 = vmatprep.subr.bf16.mxu0 %v511_v54  ;;  %v575_v47 = vunpack.c.l.s8.bf16 %v247_v19  ;;  %v382_v54 = vunpack.c.l.s8.bf16 %v150_v44  ;;  %v375_v53 = vunpack.c.h.s8.bf16 %v143_v49  ;;  %v367_v60 = vunpack.c.l.s8.bf16 %v143_v49  ;;  %v335_v49 = vld [vmem:[#allocation2 + $0x638] sm:$0xff] }
 0x1ae   :  { %1325 = vmatprep.subr.bf16.mxu1 %v765_v36  ;;  %v239_v36 = vld [vmem:[#allocation2 + $0x338] sm:$0xff] }
 0x1b0   :  { %1408 = vmatpush1.bf16.msra.mxu0 %v510_v56  ;;  %v142_v56 = vld [vmem:[#allocation2 + $0x30] sm:$0xff] }
 0x1b1   :  { %1326 = vmatpush1.bf16.msra.mxu1 %v764_v55  ;;  %1409 = vmatprep.subr.bf16.mxu0 %v503_v58  ;;  %v567_v55 = vunpack.c.h.s8.bf16 %v239_v36  ;;  %v374_v58 = vunpack.c.h.s8.bf16 %v142_v56 }
 0x1b2   :  { %1327 = vmatprep.subr.bf16.mxu1 %v757_v57  ;;  %v238_v57 = vld [vmem:[#allocation2 + $0x330] sm:$0xff] }
 0x1b3   :  { %v566_v59 = vunpack.c.h.s8.bf16 %v238_v57  ;;  %v558_v2 = vunpack.c.l.s8.bf16 %v238_v57  ;;  %v334_v57 = vld [vmem:[#allocation2 + $0x630] sm:$0xff] }
 0x1b4   :  { %1410 = vmatpush1.bf16.msra.mxu0 %v502_v62  ;;  %v199_v62 = vld [vmem:[#allocation2 + $0x1f8] sm:$0xff] }
 0x1b5   :  { %1328 = vmatpush1.bf16.msra.mxu1 %v756_v61  ;;  %1411 = vmatprep.subr.bf16.mxu0 %v495_v1  ;;  %v559_v61 = vunpack.c.l.s8.bf16 %v239_v36  ;;  %v366_v1 = vunpack.c.l.s8.bf16 %v142_v56  ;;  %v487_v3 = vunpack.c.h.s8.bf16 %v199_v62  ;;  %v479_v10 = vunpack.c.l.s8.bf16 %v199_v62  ;;  %v174_v56 = vld [vmem:[#allocation2 + $0x130] sm:$0xff] }
 0x1b6   :  { %1329 = vmatprep.subr.bf16.mxu1 %v749_v63  ;;  %v359_v63 = vld [vmem:[#allocation2 + $0x6f8] sm:$0xff]  ;;  %v758_v62 = vunpack.c.h.s8.bf16 %v334_v57 }
 0x1b8   :  { %1412 = vmatpush1.bf16.msra.mxu0 %v494_v5  ;;  %v198_v5 = vld [vmem:[#allocation2 + $0x1f0] sm:$0xff] }
 0x1b9   :  { %1330 = vmatpush1.bf16.msra.mxu1 %v748_v4  ;;  %1413 = vmatprep.subr.bf16.mxu0 %v615_v8  ;;  %v807_v4 = vunpack.c.h.s8.bf16 %v359_v63  ;;  %v486_v8 = vunpack.c.h.s8.bf16 %v198_v5  ;;  %v478_v16 = vunpack.c.l.s8.bf16 %v198_v5  ;;  %v430_v5 = vunpack.c.l.s8.bf16 %v174_v56 }
 0x1ba   :  { %1356 = vmatprep.subr.bf16.mxu1 %v423_v6  ;;  %v358_v6 = vld [vmem:[#allocation2 + $0x6f0] sm:$0xff] }
 0x1bb   :  { %v806_v9 = vunpack.c.h.s8.bf16 %v358_v6 }
 0x1bc   :  { %v3908_v18 = vpop.f32.mrf.mxu1  ;;  %1348 = vmatmul.mubr.bf16.vlgmr.msra.gmra.mxu1 %v3872_v50  ;;  %1414 = vmatpush2.bf16.msra.mxu0 %v614_v12  ;;  %v191_v12 = vld [vmem:[#allocation2 + $0x1b8] sm:$0xff] }
 0x1bd   :  { %1357 = vmatpush1.bf16.msra.mxu1 %v422_v11  ;;  %1415 = vmatprep.subr.bf16.mxu0 %v607_v14  ;;  %v799_v11 = vunpack.c.l.s8.bf16 %v359_v63 }
 0x1be   :  { %v3911_v23 = vpop.f32.mrf.mxu1  ;;  %1358 = vmatprep.subr.bf16.mxu1 %v415_v13  ;;  %1388 = vmatprep.mubr.bf16.mxu1 %v3836_v51  ;;  %v583_v51 = vunpack.c.h.s8.bf16 %v247_v19  ;;  %v351_v13 = vld [vmem:[#allocation2 + $0x6b8] sm:$0xff]  ;;  %v462_v19 = vunpack.c.l.s8.bf16 %v190_v28 }
 0x1c0   :  { %v1066_v30 = vpop.f32.mrf.mxu1  ;;  %1416 = vmatpush2.bf16.msra.mxu0 %v606_v21 }
 0x1c1   :  { %1359 = vmatpush1.bf16.msra.mxu1 %v414_v20  ;;  %1417 = vmatprep.subr.bf16.mxu0 %v599_v25  ;;  %v798_v20 = vunpack.c.l.s8.bf16 %v358_v6  ;;  %v791_v25 = vunpack.c.h.s8.bf16 %v351_v13  ;;  %v750_v6 = vunpack.c.l.s8.bf16 %v334_v57  ;;  %v270_v57 = vld [vmem:[#allocation2 + $0x430] sm:$0xff] }
 0x1c2   :  { %v1067_v34 = vpop.f32.mrf.mxu1  ;;  %1360 = vmatprep.subr.bf16.mxu1 %v407_v24  ;;  %v471_v24 = vunpack.c.h.s8.bf16 %v191_v12 }
 0x1c3   :  { %v783_v34 = vunpack.c.l.s8.bf16 %v351_v13 }
 0x1c4   :  { %1418 = vmatpush2.bf16.msra.mxu0 %v598_v17  ;;  %v463_v17 = vunpack.c.l.s8.bf16 %v191_v12 }
 0x1c5   :  { %1361 = vmatpush1.bf16.msra.mxu1 %v406_v32  ;;  %1419 = vmatprep.subr.bf16.mxu0 %v591_v38  ;;  %v790_v32 = vunpack.c.h.s8.bf16 %v350_v29  ;;  %v183_v38 = vld [vmem:[#allocation2 + $0x178] sm:$0xff] }
 0x1c6   :  { %1362 = vmatprep.subr.bf16.mxu1 %v399_v37 }
 0x1c8   :  { %1420 = vmatpush2.bf16.msra.mxu0 %v590_v43  ;;  %v182_v43 = vld [vmem:[#allocation2 + $0x170] sm:$0xff] }
 0x1c9   :  { %1363 = vmatpush1.bf16.msra.mxu1 %v398_v40  ;;  %1421 = vmatprep.subr.bf16.mxu0 %v583_v51  ;;  %v782_v40 = vunpack.c.l.s8.bf16 %v350_v29  ;;  %v3923_v51 = vsub.s32 1, %v3819_v26  ;;  %v454_v44 = vunpack.c.h.s8.bf16 %v182_v43 }
 0x1ca   :  { %1364 = vmatprep.subr.bf16.mxu1 %v391_v27  ;;  %v342_v27 = vld [vmem:[#allocation2 + $0x670] sm:$0xff] }
 0x1cb   :  { %v774_v52 = vunpack.c.h.s8.bf16 %v342_v27 }
 0x1cc   :  { %1422 = vmatpush2.bf16.msra.mxu0 %v582_v45  ;;  %v767_v45 = vunpack.c.l.s8.bf16 %v343_v39 }
 0x1cd   :  { %1365 = vmatpush1.bf16.msra.mxu1 %v390_v22  ;;  %1423 = vmatprep.subr.bf16.mxu0 %v575_v47  ;;  %v447_v22 = vunpack.c.l.s8.bf16 %v183_v38  ;;  %v175_v47 = vld [vmem:[#allocation2 + $0x138] sm:$0xff] }
 0x1ce   :  { %1366 = vmatprep.subr.bf16.mxu1 %v383_v46  ;;  %v3928_v46 = vld [vmem:[%s4215_s2] sm:$0xff]  ;;  %v431_v63 = vunpack.c.l.s8.bf16 %v175_v47 }
 0x1cf   :  { %v1529_v36 = vrot.slane %v3928_v46, %v3923_v51 }
 0x1d0   :  { %1424 = vmatpush2.bf16.msra.mxu0 %v574_v35  ;;  %v766_v35 = vunpack.c.l.s8.bf16 %v342_v27 }
 0x1d1   :  { %1367 = vmatpush1.bf16.msra.mxu1 %v382_v54  ;;  %1425 = vmatprep.subr.bf16.mxu0 %v567_v55  ;;  %v446_v54 = vunpack.c.l.s8.bf16 %v182_v43  ;;  %v759_v55 = vunpack.c.h.s8.bf16 %v335_v49 }
 0x1d2   :  { %1368 = vmatprep.subr.bf16.mxu1 %v375_v53  ;;  %v439_v53 = vunpack.c.h.s8.bf16 %v175_v47 }
 0x1d4   :  { %1426 = vmatpush2.bf16.msra.mxu0 %v566_v59  ;;  %v1563_v59 = vmul.f32 %v1529_v36, %v3906_v33  ;;  %v271_v36 = vld [vmem:[#allocation2 + $0x438] sm:$0xff] }
 0x1d5   :  { %1369 = vmatpush1.bf16.msra.mxu1 %v374_v58  ;;  %1427 = vmatprep.subr.bf16.mxu0 %v559_v61  ;;  %v3932_v58 = vld [vmem:[#allocation5] sm:$0xff]  ;;  %v438_v61 = vunpack.c.h.s8.bf16 %v174_v56 }
 0x1d6   :  { %1370 = vmatprep.subr.bf16.mxu1 %v367_v60  ;;  %v1579_v60 = vrot.slane %v3932_v58, %v3923_v51 }
 0x1d8   :  { %1428 = vmatpush2.bf16.msra.mxu0 %v558_v2  ;;  %v295_v2 = vld [vmem:[#allocation2 + $0x4f8] sm:$0xff] }
 0x1d9   :  { %1371 = vmatpush1.bf16.msra.mxu1 %v366_v1  ;;  %1479 = vmatprep.subr.bf16.mxu0 %v807_v4  ;;  %v751_v1 = vunpack.c.l.s8.bf16 %v335_v49  ;;  %v1613_v4 = vadd.f32 %v1579_v60, %v1563_v59  ;;  %v679_v33 = vunpack.c.h.s8.bf16 %v295_v2  ;;  %v1636_v59 = vld [vmem:[#allocation7] sm:$0xff]  ;;  %v630_v60 = vunpack.c.h.s8.bf16 %v270_v57 }
 0x1da   :  { %1372 = vmatprep.subr.bf16.mxu1 %v487_v3  ;;  %v1649_v3 = vld [vmem:[#allocation7 + $0x68] sm:$0xff] }
 0x1db   :  { %v1103_v14 = vpop.f32.mrf.mxu0  ;;  %1430 = vmatmul.mubr.bf16.vlgmr.msra.gmra.mxu0 %v3857_v41 }
 0x1dc   :  { %v3916_v15 = vadd.f32 %v1103_v14, %v3908_v18  ;;  %1480 = vmatpush1.bf16.msra.mxu0 %v806_v9  ;;  %1511 = vmatprep.mubr.bf16.mxu0 %v3725_v7  ;;  %v470_v18 = vunpack.c.h.s8.bf16 %v190_v28  ;;  %v775_v7 = vunpack.c.h.s8.bf16 %v343_v39  ;;  %v294_v9 = vld [vmem:[#allocation2 + $0x4f0] sm:$0xff]  ;;  %v671_v14 = vunpack.c.l.s8.bf16 %v295_v2 }
 0x1dd   :  { %1373 = vmatpush2.bf16.msra.mxu1 %v486_v8  ;;  %v1105_v21 = vpop.f32.mrf.mxu0  ;;  %1481 = vmatprep.subr.bf16.mxu0 %v799_v11  ;;  %v1793_v8 = vunpack.c.h.s8.bf16 %v1649_v3  ;;  %v1621_v11 = vmax.f32 %v1613_v4, 0.0  ;;  %v678_v12 = vunpack.c.h.s8.bf16 %v294_v9  ;;  %v670_v29 = vunpack.c.l.s8.bf16 %v294_v9  ;;  %v1665_v2 = vld [vmem:[#allocation7 + $0xe8] sm:$0xff] }
 0x1de   :  { %1374 = vmatprep.subr.bf16.mxu1 %v479_v10  ;;  %v3919_v30 = vadd.f32 %v1105_v21, %v3911_v23  ;;  %v455_v23 = vunpack.c.h.s8.bf16 %v183_v38  ;;  %v1648_v10 = vld [vmem:[#allocation7 + $0x60] sm:$0xff]  ;;  %v1645_v21 = vld [vmem:[#allocation7 + $0x48] sm:$0xff]  ;;  %v1764_v4 = vunpack.c.l.s8.bf16 %v1636_v59 }
 0x1df   :  { %v1107_v41 = vpop.f32.mrf.mxu0  ;;  %v1792_v13 = vunpack.c.h.s8.bf16 %v1648_v10 }
 0x1e0   :  { %1482 = vmatpush1.bf16.msra.mxu0 %v798_v20  ;;  %v287_v20 = vld [vmem:[#allocation2 + $0x4b8] sm:$0xff]  ;;  %v1788_v41 = vunpack.c.l.s8.bf16 %v1648_v10 }
 0x1e1   :  { %1375 = vmatpush2.bf16.msra.mxu1 %v478_v16  ;;  %1483 = vmatprep.subr.bf16.mxu0 %v791_v25  ;;  %v1108_v37 = vpop.f32.mrf.mxu0  ;;  %v1789_v16 = vunpack.c.l.s8.bf16 %v1649_v3  ;;  %v3939_v25 = vpack.c.bf16 %v1621_v11, %v1621_v11  ;;  %v655_v39 = vunpack.c.l.s8.bf16 %v287_v20  ;;  %v622_v3 = vunpack.c.l.s8.bf16 %v270_v57 }
 0x1e2   :  { %1376 = vmatprep.subr.bf16.mxu1 %v471_v24 }
 0x1e4   :  { %1484 = vmatpush1.bf16.msra.mxu0 %v790_v32  ;;  %v663_v32 = vunpack.c.h.s8.bf16 %v287_v20 }
 0x1e5   :  { %1377 = vmatpush2.bf16.msra.mxu1 %v470_v18  ;;  %1485 = vmatprep.subr.bf16.mxu0 %v783_v34  ;;  %v286_v34 = vld [vmem:[#allocation2 + $0x4b0] sm:$0xff] }
 0x1e6   :  { %1378 = vmatprep.subr.bf16.mxu1 %v463_v17  ;;  %v1785_v17 = vunpack.c.h.s8.bf16 %v1645_v21 }
 0x1e8   :  { %1486 = vmatpush1.bf16.msra.mxu0 %v782_v40  ;;  %v279_v40 = vld [vmem:[#allocation2 + $0x478] sm:$0xff] }
 0x1e9   :  { %1379 = vmatpush2.bf16.msra.mxu1 %v462_v19  ;;  %1487 = vmatprep.subr.bf16.mxu0 %v775_v7  ;;  %v1781_v19 = vunpack.c.l.s8.bf16 %v1645_v21  ;;  %v654_v7 = vunpack.c.l.s8.bf16 %v286_v34  ;;  %v647_v27 = vunpack.c.h.s8.bf16 %v279_v40  ;;  %v639_v47 = vunpack.c.l.s8.bf16 %v279_v40 }
 0x1ea   :  { %1380 = vmatprep.subr.bf16.mxu1 %v455_v23  ;;  %v1641_v23 = vld [vmem:[#allocation7 + $0x28] sm:$0xff] }
 0x1eb   :  { %v1773_v49 = vunpack.c.l.s8.bf16 %v1641_v23 }
 0x1ec   :  { %1488 = vmatpush1.bf16.msra.mxu0 %v774_v52  ;;  %v1640_v52 = vld [vmem:[#allocation7 + $0x20] sm:$0xff] }
 0x1ed   :  { %1381 = vmatpush2.bf16.msra.mxu1 %v454_v44  ;;  %1489 = vmatprep.subr.bf16.mxu0 %v767_v45  ;;  %v278_v44 = vld [vmem:[#allocation2 + $0x470] sm:$0xff]  ;;  %v1776_v45 = vunpack.c.h.s8.bf16 %v1640_v52 }
 0x1ee   :  { %1382 = vmatprep.subr.bf16.mxu1 %v447_v22  ;;  %v646_v22 = vunpack.c.h.s8.bf16 %v278_v44 }
 0x1f0   :  { %1490 = vmatpush1.bf16.msra.mxu0 %v766_v35  ;;  %v638_v35 = vunpack.c.l.s8.bf16 %v278_v44  ;;  %v3956_v44 = vsub.s32 0, %v3819_v26 }
 0x1f1   :  { %1383 = vmatpush2.bf16.msra.mxu1 %v446_v54  ;;  %1491 = vmatprep.subr.bf16.mxu0 %v759_v55  ;;  %v1637_v54 = vld [vmem:[#allocation7 + $0x8] sm:$0xff]  ;;  %v631_v55 = vunpack.c.h.s8.bf16 %v271_v36 }
 0x1f2   :  { %1384 = vmatprep.subr.bf16.mxu1 %v439_v53  ;;  %v1772_v53 = vunpack.c.l.s8.bf16 %v1640_v52  ;;  %v1769_v56 = vunpack.c.h.s8.bf16 %v1637_v54 }
 0x1f4   :  { %1492 = vmatpush1.bf16.msra.mxu0 %v758_v62  ;;  %v623_v62 = vunpack.c.l.s8.bf16 %v271_v36 }
 0x1f5   :  { %1385 = vmatpush2.bf16.msra.mxu1 %v438_v61  ;;  %1493 = vmatprep.subr.bf16.mxu0 %v751_v1  ;;  %v1768_v61 = vunpack.c.h.s8.bf16 %v1636_v59  ;;  %v327_v1 = vld [vmem:[#allocation2 + $0x5f8] sm:$0xff] }
 0x1f6   :  { %1386 = vmatprep.subr.bf16.mxu1 %v431_v63  ;;  %v1765_v63 = vunpack.c.l.s8.bf16 %v1637_v54  ;;  %v735_v11 = vunpack.c.l.s8.bf16 %v327_v1 }
 0x1f8   :  { %1494 = vmatpush1.bf16.msra.mxu0 %v750_v6  ;;  %v1825_v6 = vunpack.c.h.s8.bf16 %v1665_v2 }
 0x1f9   :  { %1387 = vmatpush2.bf16.msra.mxu1 %v430_v5  ;;  %2020 = vmatprep.subr.bf16.mxu0 %v1793_v8  ;;  %v743_v5 = vunpack.c.h.s8.bf16 %v327_v1  ;;  %v1664_v8 = vld [vmem:[#allocation7 + $0xe0] sm:$0xff] }
 0x1fa   :  { %1438 = vmatprep.subr.bf16.mxu1 %v679_v33  ;;  %v326_v33 = vld [vmem:[#allocation2 + $0x5f0] sm:$0xff]  ;;  %v1824_v10 = vunpack.c.h.s8.bf16 %v1664_v8 }
 0x1fb   :  { %1512 = vmatmul.mubr.bf16.vlgmr.msra.gmra.mxu0 %v3872_v50  ;;  %v742_v9 = vunpack.c.h.s8.bf16 %v326_v33 }
 0x1fc   :  { %v1144_v24 = vpop.f32.mrf.mxu1  ;;  %1389 = vmatmul.mubr.bf16.vlgmr.msra.gmra.mxu1 %v3848_v48  ;;  %2021 = vmatpush1.bf16.msra.mxu0 %v1792_v13  ;;  %v1644_v48 = vld [vmem:[#allocation7 + $0x40] sm:$0xff]  ;;  %v319_v13 = vld [vmem:[#allocation2 + $0x5b8] sm:$0xff] }
 0x1fd   :  { %v3942_v28 = vadd.f32 %v1144_v24, %v3916_v15  ;;  %1439 = vmatpush1.bf16.msra.mxu1 %v678_v12  ;;  %2052 = vmatprep.mubr.bf16.mxu0 %v3939_v25  ;;  %v662_v15 = vunpack.c.h.s8.bf16 %v286_v34  ;;  %v1784_v37 = vunpack.c.h.s8.bf16 %v1644_v48  ;;  %v1780_v43 = vunpack.c.l.s8.bf16 %v1644_v48  ;;  %v318_v34 = vld [vmem:[#allocation2 + $0x5b0] sm:$0xff]  ;;  %v1660_v48 = vld [vmem:[#allocation7 + $0xc0] sm:$0xff] }
 0x1fe   :  { %v3945_v18 = vpop.f32.mrf.mxu1  ;;  %1440 = vmatprep.subr.bf16.mxu1 %v671_v14  ;;  %2022 = vmatprep.subr.bf16.mxu0 %v1789_v16  ;;  %v1821_v12 = vunpack.c.l.s8.bf16 %v1665_v2  ;;  %v1661_v14 = vld [vmem:[#allocation7 + $0xc8] sm:$0xff]  ;;  %v734_v24 = vunpack.c.l.s8.bf16 %v326_v33 }
 0x1ff   :  { %1470 = vmatprep.mubr.bf16.mxu1 %v3860_v0  ;;  %v1777_v0 = vunpack.c.h.s8.bf16 %v1641_v23  ;;  %v1813_v40 = vunpack.c.l.s8.bf16 %v1661_v14  ;;  %v1147_v36 = vadd.f32 %v3945_v18, %v3919_v30 }
 0x200   :  { %v1148_v50 = vpop.f32.mrf.mxu1  ;;  %2023 = vmatpush1.bf16.msra.mxu0 %v1788_v41 }
 0x201   :  { %1441 = vmatpush1.bf16.msra.mxu1 %v670_v29  ;;  %2024 = vmatprep.subr.bf16.mxu0 %v1785_v17  ;;  %v1820_v29 = vunpack.c.l.s8.bf16 %v1664_v8  ;;  %v1817_v17 = vunpack.c.h.s8.bf16 %v1661_v14 }
 0x202   :  { %v1149_v38 = vpop.f32.mrf.mxu1  ;;  %1442 = vmatprep.subr.bf16.mxu1 %v663_v32  ;;  %v727_v32 = vunpack.c.h.s8.bf16 %v319_v13 }
 0x203   :  { %v726_v38 = vunpack.c.h.s8.bf16 %v318_v34 }
 0x204   :  { %2025 = vmatpush1.bf16.msra.mxu0 %v1784_v37 }
 0x205   :  { %1443 = vmatpush1.bf16.msra.mxu1 %v662_v15  ;;  %2026 = vmatprep.subr.bf16.mxu0 %v1781_v19  ;;  %v719_v19 = vunpack.c.l.s8.bf16 %v319_v13  ;;  %v1713_v13 = vld [vmem:[#allocation7 + $0x268] sm:$0xff] }
 0x206   :  { %1444 = vmatprep.subr.bf16.mxu1 %v655_v39 }
 0x208   :  { %2027 = vmatpush1.bf16.msra.mxu0 %v1780_v43  ;;  %v1657_v43 = vld [vmem:[#allocation7 + $0xa8] sm:$0xff] }
 0x209   :  { %1445 = vmatpush1.bf16.msra.mxu1 %v654_v7  ;;  %2028 = vmatprep.subr.bf16.mxu0 %v1777_v0  ;;  %v311_v7 = vld [vmem:[#allocation2 + $0x578] sm:$0xff]  ;;  %v1812_v0 = vunpack.c.l.s8.bf16 %v1660_v48 }
 0x20a   :  { %1446 = vmatprep.subr.bf16.mxu1 %v647_v27  ;;  %v718_v27 = vunpack.c.l.s8.bf16 %v318_v34  ;;  %v711_v52 = vunpack.c.h.s8.bf16 %v311_v7  ;;  %v1712_v34 = vld [vmem:[#allocation7 + $0x260] sm:$0xff] }
 0x20c   :  { %2029 = vmatpush1.bf16.msra.mxu0 %v1776_v45  ;;  %v310_v45 = vld [vmem:[#allocation2 + $0x570] sm:$0xff] }
 0x20d   :  { %1447 = vmatpush1.bf16.msra.mxu1 %v646_v22  ;;  %2030 = vmatprep.subr.bf16.mxu0 %v1773_v49  ;;  %v1809_v22 = vunpack.c.h.s8.bf16 %v1657_v43  ;;  %v3959_v49 = vsub.s32 3, %v3819_v26  ;;  %v710_v54 = vunpack.c.h.s8.bf16 %v310_v45  ;;  %v702_v30 = vunpack.c.l.s8.bf16 %v310_v45 }
 0x20e   :  { %1448 = vmatprep.subr.bf16.mxu1 %v639_v47  ;;  %v1656_v47 = vld [vmem:[#allocation7 + $0xa0] sm:$0xff] }
 0x20f   :  { %v1537_v59 = vrot.slane %v3928_v46, %v3959_v49  ;;  %v1804_v18 = vunpack.c.l.s8.bf16 %v1656_v47 }
 0x210   :  { %2031 = vmatpush1.bf16.msra.mxu0 %v1772_v53  ;;  %v1525_v53 = vrot.slane %v3928_v46, %v3956_v44 }
 0x211   :  { %1449 = vmatpush1.bf16.msra.mxu1 %v638_v35  ;;  %2032 = vmatprep.subr.bf16.mxu0 %v1769_v56  ;;  %v1808_v35 = vunpack.c.h.s8.bf16 %v1656_v47  ;;  %v1805_v56 = vunpack.c.l.s8.bf16 %v1657_v43  ;;  %v1676_v43 = vld [vmem:[#allocation7 + $0x140] sm:$0xff]  ;;  %v1673_v47 = vld [vmem:[#allocation7 + $0x128] sm:$0xff] }
 0x212   :  { %1450 = vmatprep.subr.bf16.mxu1 %v631_v55  ;;  %v703_v55 = vunpack.c.l.s8.bf16 %v311_v7 }
 0x214   :  { %2033 = vmatpush1.bf16.msra.mxu0 %v1768_v61  ;;  %v1653_v61 = vld [vmem:[#allocation7 + $0x88] sm:$0xff] }
 0x215   :  { %1451 = vmatpush1.bf16.msra.mxu1 %v630_v60  ;;  %2034 = vmatprep.subr.bf16.mxu0 %v1765_v63  ;;  %v303_v60 = vld [vmem:[#allocation2 + $0x538] sm:$0xff]  ;;  %v1575_v63 = vrot.slane %v3932_v58, %v3956_v44  ;;  %v1801_v2 = vunpack.c.h.s8.bf16 %v1653_v61 }
 0x216   :  { %1452 = vmatprep.subr.bf16.mxu1 %v623_v62  ;;  %v1562_v62 = vmul.f32 %v1525_v53, %v3900_v31  ;;  %v695_v1 = vunpack.c.h.s8.bf16 %v303_v60  ;;  %v687_v31 = vunpack.c.l.s8.bf16 %v303_v60  ;;  %v1841_v53 = vunpack.c.h.s8.bf16 %v1673_v47 }
 0x218   :  { %2035 = vmatpush1.bf16.msra.mxu0 %v1764_v4  ;;  %v1652_v4 = vld [vmem:[#allocation7 + $0x80] sm:$0xff] }
 0x219   :  { %1453 = vmatpush1.bf16.msra.mxu1 %v622_v3  ;;  %2036 = vmatprep.subr.bf16.mxu0 %v1825_v6  ;;  %v302_v3 = vld [vmem:[#allocation2 + $0x530] sm:$0xff]  ;;  %v1587_v6 = vrot.slane %v3932_v58, %v3959_v49  ;;  %v1800_v8 = vunpack.c.h.s8.bf16 %v1652_v4 }
 0x21a   :  { %1454 = vmatprep.subr.bf16.mxu1 %v743_v5  ;;  %v694_v33 = vunpack.c.h.s8.bf16 %v302_v3  ;;  %v686_v14 = vunpack.c.l.s8.bf16 %v302_v3  ;;  %v1668_v3 = vld [vmem:[#allocation7 + $0x100] sm:$0xff] }
 0x21b   :  { %v3948_v20 = vpop.f32.mrf.mxu0 }
 0x21c   :  { %v1185_v16 = vpop.f32.mrf.mxu1  ;;  %2037 = vmatpush2.bf16.msra.mxu0 %v1824_v10  ;;  %v1797_v10 = vunpack.c.l.s8.bf16 %v1653_v61  ;;  %v1837_v61 = vunpack.c.l.s8.bf16 %v1673_v47 }
 0x21d   :  { %v3951_v21 = vadd.f32 %v1185_v16, %v3942_v28  ;;  %1455 = vmatpush2.bf16.msra.mxu1 %v742_v9  ;;  %2038 = vmatprep.subr.bf16.mxu0 %v1821_v12  ;;  %v3953_v50 = vpop.f32.mrf.mxu0  ;;  %v1816_v28 = vunpack.c.h.s8.bf16 %v1660_v48  ;;  %v1612_v9 = vadd.f32 %v1575_v63, %v1562_v62  ;;  %v1681_v12 = vld [vmem:[#allocation7 + $0x168] sm:$0xff]  ;;  %v1796_v16 = vunpack.c.l.s8.bf16 %v1652_v4 }
 0x21e   :  { %v1187_v41 = vpop.f32.mrf.mxu1  ;;  %1456 = vmatprep.subr.bf16.mxu1 %v735_v11  ;;  %v1701_v63 = vld [vmem:[#allocation7 + $0x208] sm:$0xff] }
 0x21f   :  { %v1230_v37 = vpop.f32.mrf.mxu0  ;;  %v1188_v57 = vadd.f32 %v1187_v41, %v1147_v36  ;;  %v1680_v41 = vld [vmem:[#allocation7 + $0x160] sm:$0xff] }
 0x220   :  { %v1189_v15 = vpop.f32.mrf.mxu1  ;;  %2039 = vmatpush2.bf16.msra.mxu0 %v1820_v29  ;;  %v1857_v29 = vunpack.c.h.s8.bf16 %v1681_v12  ;;  %v1856_v48 = vunpack.c.h.s8.bf16 %v1680_v41  ;;  %v1853_v37 = vunpack.c.l.s8.bf16 %v1681_v12  ;;  %v1828_v12 = vunpack.c.l.s8.bf16 %v1668_v3 }
 0x221   :  { %1457 = vmatpush2.bf16.msra.mxu1 %v734_v24  ;;  %2040 = vmatprep.subr.bf16.mxu0 %v1817_v17  ;;  %v1231_v23 = vpop.f32.mrf.mxu0  ;;  %v1565_v5 = vmul.f32 %v1537_v59, %v1188_v57  ;;  %v1620_v24 = vmax.f32 %v1612_v9, 0.0  ;;  %v1704_v59 = vld [vmem:[#allocation7 + $0x220] sm:$0xff] }
 0x222   :  { %v1190_v39 = vpop.f32.mrf.mxu1  ;;  %1458 = vmatprep.subr.bf16.mxu1 %v727_v32  ;;  %v1921_v32 = vunpack.c.h.s8.bf16 %v1713_v13  ;;  %v1852_v23 = vunpack.c.l.s8.bf16 %v1680_v41  ;;  %v1900_v4 = vunpack.c.l.s8.bf16 %v1704_v59 }
 0x223   :  { %v1615_v11 = vadd.f32 %v1587_v6, %v1565_v5  ;;  %v3972_v15 = vpack.c.bf16 %v1620_v24, %v1620_v24  ;;  %v1677_v39 = vld [vmem:[#allocation7 + $0x148] sm:$0xff]  ;;  %v1897_v5 = vunpack.c.h.s8.bf16 %v1701_v63  ;;  %v1700_v6 = vld [vmem:[#allocation7 + $0x200] sm:$0xff] }
 0x224   :  { %2041 = vmatpush2.bf16.msra.mxu0 %v1816_v28  ;;  %v1849_v7 = vunpack.c.h.s8.bf16 %v1677_v39  ;;  %v1845_v45 = vunpack.c.l.s8.bf16 %v1677_v39  ;;  %v1896_v9 = vunpack.c.h.s8.bf16 %v1700_v6  ;;  %v1725_v39 = vld [vmem:[#allocation7 + $0x2c8] sm:$0xff] }
 0x225   :  { %1459 = vmatpush2.bf16.msra.mxu1 %v726_v38  ;;  %2042 = vmatprep.subr.bf16.mxu0 %v1813_v40  ;;  %v1623_v17 = vmax.f32 %v1615_v11, 0.0  ;;  %v1920_v38 = vunpack.c.h.s8.bf16 %v1712_v34  ;;  %v1709_v40 = vld [vmem:[#allocation7 + $0x248] sm:$0xff] }
 0x226   :  { %1460 = vmatprep.subr.bf16.mxu1 %v719_v19  ;;  %v1917_v19 = vunpack.c.l.s8.bf16 %v1713_v13  ;;  %v1909_v36 = vunpack.c.l.s8.bf16 %v1709_v40  ;;  %v1729_v11 = vld [vmem:[#allocation7 + $0x2e8] sm:$0xff] }
 0x227   :  { %v3974_v28 = vpack.c.bf16 %v1623_v17, %v1623_v17  ;;  %v1953_v24 = vunpack.c.h.s8.bf16 %v1729_v11 }
 0x228   :  { %2043 = vmatpush2.bf16.msra.mxu0 %v1812_v0  ;;  %v1913_v0 = vunpack.c.h.s8.bf16 %v1709_v40 }
 0x229   :  { %1461 = vmatpush2.bf16.msra.mxu1 %v718_v27  ;;  %2044 = vmatprep.subr.bf16.mxu0 %v1809_v22  ;;  %v1916_v27 = vunpack.c.l.s8.bf16 %v1712_v34  ;;  %v1848_v22 = vunpack.c.h.s8.bf16 %v1676_v43  ;;  %v1693_v34 = vld [vmem:[#allocation7 + $0x1c8] sm:$0xff] }
 0x22a   :  { %1462 = vmatprep.subr.bf16.mxu1 %v711_v52  ;;  %v1708_v52 = vld [vmem:[#allocation7 + $0x240] sm:$0xff] }
 0x22c   :  { %2045 = vmatpush2.bf16.msra.mxu0 %v1808_v35  ;;  %v1844_v35 = vunpack.c.l.s8.bf16 %v1676_v43  ;;  %v1692_v43 = vld [vmem:[#allocation7 + $0x1c0] sm:$0xff] }
 0x22d   :  { %1463 = vmatpush2.bf16.msra.mxu1 %v710_v54  ;;  %2046 = vmatprep.subr.bf16.mxu0 %v1805_v56  ;;  %v1705_v54 = vld [vmem:[#allocation7 + $0x228] sm:$0xff]  ;;  %v1908_v56 = vunpack.c.l.s8.bf16 %v1708_v52 }
 0x22e   :  { %1464 = vmatprep.subr.bf16.mxu1 %v703_v55  ;;  %v1672_v55 = vld [vmem:[#allocation7 + $0x120] sm:$0xff]  ;;  %v1905_v57 = vunpack.c.h.s8.bf16 %v1705_v54  ;;  %v1901_v62 = vunpack.c.l.s8.bf16 %v1705_v54 }
 0x22f   :  { %v1840_v60 = vunpack.c.h.s8.bf16 %v1672_v55 }
 0x230   :  { %2047 = vmatpush2.bf16.msra.mxu0 %v1804_v18  ;;  %v1669_v18 = vld [vmem:[#allocation7 + $0x108] sm:$0xff] }
 0x231   :  { %1465 = vmatpush2.bf16.msra.mxu1 %v702_v30  ;;  %2048 = vmatprep.subr.bf16.mxu0 %v1801_v2  ;;  %v1904_v30 = vunpack.c.h.s8.bf16 %v1704_v59  ;;  %v1833_v2 = vunpack.c.h.s8.bf16 %v1669_v18  ;;  %v3988_v59 = vsub.s32 2, %v3819_v26 }
 0x232   :  { %1466 = vmatprep.subr.bf16.mxu1 %v695_v1  ;;  %v1836_v1 = vunpack.c.l.s8.bf16 %v1672_v55  ;;  %v1941_v55 = vunpack.c.l.s8.bf16 %v1725_v39 }
 0x234   :  { %2049 = vmatpush2.bf16.msra.mxu0 %v1800_v8  ;;  %v1829_v8 = vunpack.c.l.s8.bf16 %v1669_v18 }
 0x235   :  { %1467 = vmatpush2.bf16.msra.mxu1 %v694_v33  ;;  %2050 = vmatprep.subr.bf16.mxu0 %v1797_v10  ;;  %v1832_v33 = vunpack.c.h.s8.bf16 %v1668_v3  ;;  %v1893_v10 = vunpack.c.l.s8.bf16 %v1701_v63 }
 0x236   :  { %1468 = vmatprep.subr.bf16.mxu1 %v687_v31  ;;  %v1697_v31 = vld [vmem:[#allocation7 + $0x1e8] sm:$0xff] }
 0x237   :  { %v1889_v13 = vunpack.c.h.s8.bf16 %v1697_v31 }
 0x238   :  { %2051 = vmatpush2.bf16.msra.mxu0 %v1796_v16  ;;  %v1892_v16 = vunpack.c.l.s8.bf16 %v1700_v6  ;;  %v1717_v6 = vld [vmem:[#allocation7 + $0x288] sm:$0xff] }
 0x239   :  { %1469 = vmatpush2.bf16.msra.mxu1 %v686_v14  ;;  %2102 = vmatprep.subr.bf16.mxu0 %v1921_v32  ;;  %v1696_v14 = vld [vmem:[#allocation7 + $0x1e0] sm:$0xff]  ;;  %v1885_v32 = vunpack.c.l.s8.bf16 %v1697_v31 }
 0x23a   :  { %2061 = vmatprep.subr.bf16.mxu1 %v1857_v29  ;;  %v1728_v29 = vld [vmem:[#allocation7 + $0x2e0] sm:$0xff]  ;;  %v1888_v41 = vunpack.c.h.s8.bf16 %v1696_v14 }
 0x23b   :  { %2053 = vmatmul.mubr.bf16.vlgmr.msra.gmra.mxu0 %v3972_v15  ;;  %v1952_v17 = vunpack.c.h.s8.bf16 %v1728_v29 }
 0x23c   :  { %1471 = vmatmul.mubr.bf16.vlgmr.msra.gmra.mxu1 %v3868_v42  ;;  %2103 = vmatpush1.bf16.msra.mxu0 %v1920_v38  ;;  %v1912_v42 = vunpack.c.h.s8.bf16 %v1708_v52  ;;  %v1724_v52 = vld [vmem:[#allocation7 + $0x2c0] sm:$0xff] }
 0x23d   :  { %2062 = vmatpush1.bf16.msra.mxu1 %v1856_v48  ;;  %2093 = vmatprep.mubr.bf16.mxu1 %v3974_v28  ;;  %v1949_v48 = vunpack.c.l.s8.bf16 %v1729_v11  ;;  %v1944_v54 = vunpack.c.h.s8.bf16 %v1724_v52 }
 0x23e   :  { %2063 = vmatprep.subr.bf16.mxu1 %v1853_v37  ;;  %2104 = vmatprep.subr.bf16.mxu0 %v1917_v19  ;;  %v1884_v19 = vunpack.c.l.s8.bf16 %v1696_v14 }
 0x240   :  { %2105 = vmatpush1.bf16.msra.mxu0 %v1916_v27  ;;  %v1948_v27 = vunpack.c.l.s8.bf16 %v1728_v29 }
 0x241   :  { %2064 = vmatpush1.bf16.msra.mxu1 %v1852_v23  ;;  %2106 = vmatprep.subr.bf16.mxu0 %v1913_v0  ;;  %v1945_v0 = vunpack.c.h.s8.bf16 %v1725_v39 }
 0x242   :  { %2065 = vmatprep.subr.bf16.mxu1 %v1849_v7  ;;  %v1881_v7 = vunpack.c.h.s8.bf16 %v1693_v34 }
 0x244   :  { %2107 = vmatpush1.bf16.msra.mxu0 %v1912_v42  ;;  %v1880_v42 = vunpack.c.h.s8.bf16 %v1692_v43 }
 0x245   :  { %2066 = vmatpush1.bf16.msra.mxu1 %v1848_v22  ;;  %2108 = vmatprep.subr.bf16.mxu0 %v1909_v36  ;;  %v1877_v36 = vunpack.c.l.s8.bf16 %v1693_v34 }
 0x246   :  { %2067 = vmatprep.subr.bf16.mxu1 %v1845_v45 }
 0x248   :  { %2109 = vmatpush1.bf16.msra.mxu0 %v1908_v56  ;;  %v1721_v56 = vld [vmem:[#allocation7 + $0x2a8] sm:$0xff] }
 0x249   :  { %2068 = vmatpush1.bf16.msra.mxu1 %v1844_v35  ;;  %2110 = vmatprep.subr.bf16.mxu0 %v1905_v57  ;;  %v1876_v57 = vunpack.c.l.s8.bf16 %v1692_v43  ;;  %v1937_v18 = vunpack.c.h.s8.bf16 %v1721_v56  ;;  %v4000_v43 = vsub.s32 4, %v3819_v26 }
 0x24a   :  { %2069 = vmatprep.subr.bf16.mxu1 %v1841_v53  ;;  %v1689_v53 = vld [vmem:[#allocation7 + $0x1a8] sm:$0xff] }
 0x24c   :  { %2111 = vmatpush1.bf16.msra.mxu0 %v1904_v30  ;;  %v1940_v30 = vunpack.c.l.s8.bf16 %v1724_v52  ;;  %v4006_v52 = vsub.s32 5, %v3819_v26 }
 0x24d   :  { %2070 = vmatpush1.bf16.msra.mxu1 %v1840_v60  ;;  %2112 = vmatprep.subr.bf16.mxu0 %v1901_v62  ;;  %v1873_v60 = vunpack.c.h.s8.bf16 %v1689_v53  ;;  %v1720_v62 = vld [vmem:[#allocation7 + $0x2a0] sm:$0xff] }
 0x24e   :  { %2071 = vmatprep.subr.bf16.mxu1 %v1837_v61  ;;  %v1688_v61 = vld [vmem:[#allocation7 + $0x1a0] sm:$0xff]  ;;  %v1936_v3 = vunpack.c.h.s8.bf16 %v1720_v62  ;;  %v1932_v11 = vunpack.c.l.s8.bf16 %v1720_v62 }
 0x24f   :  { %v1872_v63 = vunpack.c.h.s8.bf16 %v1688_v61 }
 0x250   :  { %2113 = vmatpush1.bf16.msra.mxu0 %v1900_v4  ;;  %v1685_v4 = vld [vmem:[#allocation7 + $0x188] sm:$0xff] }
 0x251   :  { %2072 = vmatpush1.bf16.msra.mxu1 %v1836_v1  ;;  %2114 = vmatprep.subr.bf16.mxu0 %v1897_v5  ;;  %v1533_v1 = vrot.slane %v3928_v46, %v3988_v59  ;;  %v1933_v5 = vunpack.c.l.s8.bf16 %v1721_v56  ;;  %v1865_v31 = vunpack.c.h.s8.bf16 %v1685_v4  ;;  %v1740_v56 = vld [vmem:[#allocation7 + $0x340] sm:$0xff] }
 0x252   :  { %2073 = vmatprep.subr.bf16.mxu1 %v1833_v2  ;;  %v1869_v2 = vunpack.c.l.s8.bf16 %v1689_v53 }
 0x254   :  { %2115 = vmatpush1.bf16.msra.mxu0 %v1896_v9  ;;  %v1583_v9 = vrot.slane %v3932_v58, %v3988_v59 }
 0x255   :  { %2074 = vmatpush1.bf16.msra.mxu1 %v1832_v33  ;;  %2116 = vmatprep.subr.bf16.mxu0 %v1893_v10  ;;  %v1868_v33 = vunpack.c.l.s8.bf16 %v1688_v61  ;;  %v1684_v10 = vld [vmem:[#allocation7 + $0x180] sm:$0xff]  ;;  %v1595_v61 = vrot.slane %v3932_v58, %v4006_v52 }
 0x256   :  { %2075 = vmatprep.subr.bf16.mxu1 %v1829_v8  ;;  %v1564_v8 = vmul.f32 %v1533_v1, %v3951_v21  ;;  %v1864_v14 = vunpack.c.h.s8.bf16 %v1684_v10  ;;  %v1925_v21 = vunpack.c.l.s8.bf16 %v1717_v6 }
 0x258   :  { %2117 = vmatpush1.bf16.msra.mxu0 %v1892_v16  ;;  %v1614_v16 = vadd.f32 %v1583_v9, %v1564_v8  ;;  %v1736_v8 = vld [vmem:[#allocation7 + $0x320] sm:$0xff] }
 0x259   :  { %2076 = vmatpush1.bf16.msra.mxu1 %v1828_v12  ;;  %2118 = vmatprep.subr.bf16.mxu0 %v1953_v24  ;;  %v1929_v12 = vunpack.c.h.s8.bf16 %v1717_v6  ;;  %v1861_v24 = vunpack.c.l.s8.bf16 %v1685_v4  ;;  %v1650_v4 = vld [vmem:[#allocation7 + $0x70] sm:$0xff]  ;;  %v1972_v6 = vunpack.c.l.s8.bf16 %v1740_v56 }
 0x25a   :  { %2077 = vmatprep.subr.bf16.mxu1 %v1889_v13  ;;  %v1716_v13 = vld [vmem:[#allocation7 + $0x280] sm:$0xff]  ;;  %v1622_v34 = vmax.f32 %v1614_v16, 0.0  ;;  %v1733_v16 = vld [vmem:[#allocation7 + $0x308] sm:$0xff] }
 0x25b   :  { %v3981_v38 = vpop.f32.mrf.mxu0  ;;  %v1928_v29 = vunpack.c.h.s8.bf16 %v1716_v13 }
 0x25c   :  { %v3979_v37 = vpop.f32.mrf.mxu1  ;;  %2119 = vmatpush2.bf16.msra.mxu0 %v1952_v17  ;;  %v1860_v17 = vunpack.c.l.s8.bf16 %v1684_v10 }
 0x25d   :  { %2078 = vmatpush2.bf16.msra.mxu1 %v1888_v41  ;;  %v3985_v23 = vpop.f32.mrf.mxu0  ;;  %2120 = vmatprep.subr.bf16.mxu0 %v1949_v48  ;;  %v1745_v41 = vld [vmem:[#allocation7 + $0x368] sm:$0xff]  ;;  %v1924_v48 = vunpack.c.l.s8.bf16 %v1716_v13 }
 0x25e   :  { %v3983_v40 = vpop.f32.mrf.mxu1  ;;  %2079 = vmatprep.subr.bf16.mxu1 %v1885_v32  ;;  %v3995_v32 = vld [vmem:[#allocation7 + $0x78] sm:$0xff]  ;;  %v1985_v39 = vunpack.c.h.s8.bf16 %v1745_v41 }
 0x25f   :  { %v1312_v45 = vpop.f32.mrf.mxu0  ;;  %v1791_v10 = vunpack.c.l.s8.bf16 %v3995_v32 }
 0x260   :  { %v1271_v22 = vpop.f32.mrf.mxu1  ;;  %2121 = vmatpush2.bf16.msra.mxu0 %v1948_v27  ;;  %v1795_v27 = vunpack.c.h.s8.bf16 %v3995_v32  ;;  %v4008_v45 = vpack.c.bf16 %v1622_v34, %v1622_v34  ;;  %v1732_v32 = vld [vmem:[#allocation7 + $0x300] sm:$0xff] }
 0x261   :  { %2080 = vmatpush2.bf16.msra.mxu1 %v1884_v19  ;;  %v1313_v35 = vpop.f32.mrf.mxu0  ;;  %2122 = vmatprep.subr.bf16.mxu0 %v1945_v0  ;;  %v1744_v19 = vld [vmem:[#allocation7 + $0x360] sm:$0xff]  ;;  %v1270_v0 = vadd.f32 %v3983_v40, %v3953_v50  ;;  %v1591_v50 = vrot.slane %v3932_v58, %v4000_v43  ;;  %v1794_v58 = vunpack.c.h.s8.bf16 %v1650_v4 }
 0x262   :  { %v1272_v47 = vpop.f32.mrf.mxu1  ;;  %2081 = vmatprep.subr.bf16.mxu1 %v1881_v7  ;;  %v1268_v7 = vadd.f32 %v3979_v37, %v3948_v20  ;;  %v1984_v22 = vunpack.c.h.s8.bf16 %v1744_v19  ;;  %v1541_v37 = vrot.slane %v3928_v46, %v4000_v43  ;;  %v1545_v35 = vrot.slane %v3928_v46, %v4006_v52 }
 0x263   :  { %v1741_v47 = vld [vmem:[#allocation7 + $0x348] sm:$0xff]  ;;  %v1311_v40 = vadd.f32 %v3985_v23, %v1270_v0  ;;  %v1980_v53 = vunpack.c.l.s8.bf16 %v1744_v19  ;;  %v1976_v23 = vunpack.c.h.s8.bf16 %v1740_v56  ;;  %v1957_v19 = vunpack.c.l.s8.bf16 %v1733_v16  ;;  %v1642_v0 = vld [vmem:[#allocation7 + $0x30] sm:$0xff] }
 0x264   :  { %2123 = vmatpush2.bf16.msra.mxu0 %v1944_v54  ;;  %v1309_v20 = vadd.f32 %v3981_v38, %v1268_v7  ;;  %v1973_v1 = vunpack.c.l.s8.bf16 %v1741_v47  ;;  %v1761_v7 = vld [vmem:[#allocation7 + $0x3e8] sm:$0xff] }
 0x265   :  { %2082 = vmatpush2.bf16.msra.mxu1 %v1880_v42  ;;  %2124 = vmatprep.subr.bf16.mxu0 %v1941_v55  ;;  %v1981_v42 = vunpack.c.l.s8.bf16 %v1745_v41  ;;  %v1977_v55 = vunpack.c.h.s8.bf16 %v1741_v47  ;;  %v1961_v41 = vunpack.c.h.s8.bf16 %v1733_v16  ;;  %v1749_v16 = vld [vmem:[#allocation7 + $0x388] sm:$0xff] }
 0x266   :  { %2083 = vmatprep.subr.bf16.mxu1 %v1877_v36 }
 0x268   :  { %2125 = vmatpush2.bf16.msra.mxu0 %v1940_v30 }
 0x269   :  { %2084 = vmatpush2.bf16.msra.mxu1 %v1876_v57  ;;  %2126 = vmatprep.subr.bf16.mxu0 %v1937_v18 }
 0x26a   :  { %2085 = vmatprep.subr.bf16.mxu1 %v1873_v60 }
 0x26c   :  { %2127 = vmatpush2.bf16.msra.mxu0 %v1936_v3 }
 0x26d   :  { %2086 = vmatpush2.bf16.msra.mxu1 %v1872_v63  ;;  %2128 = vmatprep.subr.bf16.mxu0 %v1933_v5 }
 0x26e   :  { %2087 = vmatprep.subr.bf16.mxu1 %v1869_v2  ;;  %v1737_v2 = vld [vmem:[#allocation7 + $0x328] sm:$0xff] }
 0x26f   :  { %v1965_v13 = vunpack.c.l.s8.bf16 %v1737_v2 }
 0x270   :  { %2129 = vmatpush2.bf16.msra.mxu0 %v1932_v11  ;;  %v1647_v11 = vld [vmem:[#allocation7 + $0x58] sm:$0xff] }
 0x271   :  { %2088 = vmatpush2.bf16.msra.mxu1 %v1868_v33  ;;  %2130 = vmatprep.subr.bf16.mxu0 %v1929_v12  ;;  %v1969_v33 = vunpack.c.h.s8.bf16 %v1737_v2  ;;  %v1968_v12 = vunpack.c.h.s8.bf16 %v1736_v8  ;;  %v1783_v34 = vunpack.c.l.s8.bf16 %v1647_v11 }
 0x272   :  { %2089 = vmatprep.subr.bf16.mxu1 %v1865_v31 }
 0x274   :  { %2131 = vmatpush2.bf16.msra.mxu0 %v1928_v29  ;;  %v1646_v29 = vld [vmem:[#allocation7 + $0x50] sm:$0xff] }
 0x275   :  { %2090 = vmatpush2.bf16.msra.mxu1 %v1864_v14  ;;  %2132 = vmatprep.subr.bf16.mxu0 %v1925_v21  ;;  %v1790_v14 = vunpack.c.l.s8.bf16 %v1650_v4  ;;  %v1964_v21 = vunpack.c.l.s8.bf16 %v1736_v8  ;;  %v1752_v8 = vld [vmem:[#allocation7 + $0x3a0] sm:$0xff] }
 0x276   :  { %2091 = vmatprep.subr.bf16.mxu1 %v1861_v24  ;;  %v1787_v24 = vunpack.c.h.s8.bf16 %v1647_v11  ;;  %v1663_v11 = vld [vmem:[#allocation7 + $0xd8] sm:$0xff] }
 0x278   :  { %2133 = vmatpush2.bf16.msra.mxu0 %v1924_v48  ;;  %v1643_v48 = vld [vmem:[#allocation7 + $0x38] sm:$0xff] }
 0x279   :  { %2092 = vmatpush2.bf16.msra.mxu1 %v1860_v17  ;;  %2184 = vmatprep.subr.bf16.mxu0 %v1795_v27  ;;  %v1786_v17 = vunpack.c.h.s8.bf16 %v1646_v29  ;;  %v1779_v27 = vunpack.c.h.s8.bf16 %v1643_v48  ;;  %v1775_v47 = vunpack.c.l.s8.bf16 %v1643_v48  ;;  %v1659_v48 = vld [vmem:[#allocation7 + $0xb8] sm:$0xff] }
 0x27a   :  { %2143 = vmatprep.subr.bf16.mxu1 %v1985_v39  ;;  %v1960_v39 = vunpack.c.h.s8.bf16 %v1732_v32 }
 0x27c   :  { %v1349_v36 = vpop.f32.mrf.mxu1  ;;  %2094 = vmatmul.mubr.bf16.vlgmr.msra.gmra.mxu1 %v4008_v45 }
 0x27d   :  { %v1350_v54 = vadd.f32 %v1349_v36, %v1309_v20  ;;  %2144 = vmatpush1.bf16.msra.mxu1 %v1984_v22  ;;  %v1956_v22 = vunpack.c.l.s8.bf16 %v1732_v32  ;;  %v1760_v20 = vld [vmem:[#allocation7 + $0x3e0] sm:$0xff]  ;;  %v1639_v36 = vld [vmem:[#allocation7 + $0x18] sm:$0xff] }
 0x27e   :  { %v1351_v38 = vpop.f32.mrf.mxu1  ;;  %2145 = vmatprep.subr.bf16.mxu1 %v1981_v42  ;;  %v2017_v42 = vunpack.c.h.s8.bf16 %v1761_v7  ;;  %v2012_v56 = vunpack.c.l.s8.bf16 %v1760_v20  ;;  %v1748_v32 = vld [vmem:[#allocation7 + $0x380] sm:$0xff] }
 0x27f   :  { %v1566_v57 = vmul.f32 %v1541_v37, %v1350_v54  ;;  %v1352_v60 = vadd.f32 %v1351_v38, %v1311_v40  ;;  %v1778_v37 = vunpack.c.h.s8.bf16 %v1642_v0  ;;  %v2013_v40 = vunpack.c.l.s8.bf16 %v1761_v7  ;;  %v1638_v38 = vld [vmem:[#allocation7 + $0x10] sm:$0xff]  ;;  %v4033_v7 = vld [vmem:[#allocation7 + $0x178] sm:$0xff] }
 0x280   :  { %v1353_v30 = vpop.f32.mrf.mxu1  ;;  %v1774_v54 = vunpack.c.l.s8.bf16 %v1642_v0  ;;  %v1766_v2 = vunpack.c.l.s8.bf16 %v1638_v38  ;;  %v1658_v0 = vld [vmem:[#allocation7 + $0xb0] sm:$0xff] }
 0x281   :  { %v1616_v18 = vadd.f32 %v1591_v50, %v1566_v57  ;;  %v1567_v62 = vmul.f32 %v1545_v35, %v1352_v60  ;;  %2146 = vmatpush1.bf16.msra.mxu1 %v1980_v53  ;;  %v2016_v50 = vunpack.c.h.s8.bf16 %v1760_v20  ;;  %v1757_v35 = vld [vmem:[#allocation7 + $0x3c8] sm:$0xff]  ;;  %v1771_v53 = vunpack.c.h.s8.bf16 %v1639_v36 }
 0x282   :  { %v1354_v63 = vpop.f32.mrf.mxu1  ;;  %2147 = vmatprep.subr.bf16.mxu1 %v1977_v55  ;;  %v2009_v60 = vunpack.c.h.s8.bf16 %v1757_v35  ;;  %v1770_v30 = vunpack.c.h.s8.bf16 %v1638_v38  ;;  %v1810_v20 = vunpack.c.h.s8.bf16 %v1658_v0 }
 0x283   :  { %v1617_v46 = vadd.f32 %v1595_v61, %v1567_v62  ;;  %v1624_v3 = vmax.f32 %v1616_v18, 0.0  ;;  %v1756_v61 = vld [vmem:[#allocation7 + $0x3c0] sm:$0xff]  ;;  %v1767_v18 = vunpack.c.l.s8.bf16 %v1639_v36  ;;  %v1806_v36 = vunpack.c.l.s8.bf16 %v1658_v0 }
 0x284   :  { %v2008_v63 = vunpack.c.h.s8.bf16 %v1756_v61 }
 0x285   :  { %v1625_v5 = vmax.f32 %v1617_v46, 0.0  ;;  %2148 = vmatpush1.bf16.msra.mxu1 %v1976_v23  ;;  %v4023_v31 = vpack.c.bf16 %v1624_v3, %v1624_v3  ;;  %v1667_v23 = vld [vmem:[#allocation7 + $0xf8] sm:$0xff]  ;;  %v2005_v46 = vunpack.c.l.s8.bf16 %v1757_v35  ;;  %v1753_v3 = vld [vmem:[#allocation7 + $0x3a8] sm:$0xff] }
 0x286   :  { %2149 = vmatprep.subr.bf16.mxu1 %v1973_v1  ;;  %v1827_v4 = vunpack.c.h.s8.bf16 %v1667_v23 }
 0x287   :  { %v4021_v9 = vpack.c.bf16 %v1625_v5, %v1625_v5  ;;  %v1666_v5 = vld [vmem:[#allocation7 + $0xf0] sm:$0xff] }
 0x289   :  { %2134 = vmatprep.mubr.bf16.mxu0 %v4021_v9  ;;  %2150 = vmatpush1.bf16.msra.mxu1 %v1972_v6  ;;  %v2004_v6 = vunpack.c.l.s8.bf16 %v1756_v61 }
 0x28a   :  { %2135 = vmatmul.mubr.bf16.vlgmr.msra.gmra.mxu0 %v4023_v31  ;;  %2151 = vmatprep.subr.bf16.mxu1 %v1969_v33  ;;  %v2001_v33 = vunpack.c.h.s8.bf16 %v1753_v3 }
 0x28b   :  { %2185 = vmatpush1.bf16.msra.mxu0 %v1794_v58  ;;  %2216 = vmatprep.mubr.bf16.mxu0 %v3939_v25  ;;  %v1782_v25 = vunpack.c.l.s8.bf16 %v1646_v29  ;;  %v1826_v58 = vunpack.c.h.s8.bf16 %v1666_v5  ;;  %v1662_v29 = vld [vmem:[#allocation7 + $0xd0] sm:$0xff] }
 0x28c   :  { %2186 = vmatprep.subr.bf16.mxu0 %v1791_v10  ;;  %v1823_v10 = vunpack.c.l.s8.bf16 %v1667_v23 }
 0x28d   :  { %2152 = vmatpush1.bf16.msra.mxu1 %v1968_v12  ;;  %v2000_v12 = vunpack.c.h.s8.bf16 %v1752_v8 }
 0x28e   :  { %2153 = vmatprep.subr.bf16.mxu1 %v1965_v13  ;;  %v1997_v13 = vunpack.c.l.s8.bf16 %v1753_v3 }
 0x28f   :  { %2187 = vmatpush1.bf16.msra.mxu0 %v1790_v14  ;;  %v1822_v14 = vunpack.c.l.s8.bf16 %v1666_v5 }
 0x290   :  { %2188 = vmatprep.subr.bf16.mxu0 %v1787_v24  ;;  %v1819_v24 = vunpack.c.h.s8.bf16 %v1663_v11 }
 0x291   :  { %2154 = vmatpush1.bf16.msra.mxu1 %v1964_v21  ;;  %v1996_v21 = vunpack.c.l.s8.bf16 %v1752_v8 }
 0x292   :  { %2155 = vmatprep.subr.bf16.mxu1 %v1961_v41  ;;  %v1993_v41 = vunpack.c.h.s8.bf16 %v1749_v16 }
 0x293   :  { %2189 = vmatpush1.bf16.msra.mxu0 %v1786_v17  ;;  %v1818_v17 = vunpack.c.h.s8.bf16 %v1662_v29 }
 0x294   :  { %2190 = vmatprep.subr.bf16.mxu0 %v1783_v34  ;;  %v1815_v34 = vunpack.c.l.s8.bf16 %v1663_v11 }
 0x295   :  { %2156 = vmatpush1.bf16.msra.mxu1 %v1960_v39  ;;  %v1992_v39 = vunpack.c.h.s8.bf16 %v1748_v32 }
 0x296   :  { %2157 = vmatprep.subr.bf16.mxu1 %v1957_v19  ;;  %v1989_v19 = vunpack.c.l.s8.bf16 %v1749_v16  ;;  %v1703_v16 = vld [vmem:[#allocation7 + $0x218] sm:$0xff] }
 0x297   :  { %2191 = vmatpush1.bf16.msra.mxu0 %v1782_v25  ;;  %v1814_v25 = vunpack.c.l.s8.bf16 %v1662_v29  ;;  %v1702_v29 = vld [vmem:[#allocation7 + $0x210] sm:$0xff] }
 0x298   :  { %2192 = vmatprep.subr.bf16.mxu0 %v1779_v27  ;;  %v1811_v27 = vunpack.c.h.s8.bf16 %v1659_v48 }
 0x299   :  { %2158 = vmatpush1.bf16.msra.mxu1 %v1956_v22  ;;  %v1988_v22 = vunpack.c.l.s8.bf16 %v1748_v32  ;;  %v1731_v32 = vld [vmem:[#allocation7 + $0x2f8] sm:$0xff] }
 0x29a   :  { %2159 = vmatprep.subr.bf16.mxu1 %v2017_v42  ;;  %v1859_v42 = vunpack.c.h.s8.bf16 %v4033_v7 }
 0x29b   :  { %2193 = vmatpush1.bf16.msra.mxu0 %v1778_v37  ;;  %v4029_v55 = vpop.f32.mrf.mxu0  ;;  %v1807_v37 = vunpack.c.l.s8.bf16 %v1659_v48  ;;  %v1730_v48 = vld [vmem:[#allocation7 + $0x2f0] sm:$0xff] }
 0x29c   :  { %2194 = vmatprep.subr.bf16.mxu0 %v1775_v47  ;;  %v1655_v47 = vld [vmem:[#allocation7 + $0x98] sm:$0xff] }
 0x29d   :  { %2160 = vmatpush2.bf16.msra.mxu1 %v2016_v50  ;;  %v4031_v57 = vpop.f32.mrf.mxu0 }
 0x29e   :  { %2161 = vmatprep.subr.bf16.mxu1 %v2013_v40  ;;  %v1803_v40 = vunpack.c.h.s8.bf16 %v1655_v47 }
 0x29f   :  { %2195 = vmatpush1.bf16.msra.mxu0 %v1774_v54  ;;  %v1435_v62 = vpop.f32.mrf.mxu0  ;;  %v1654_v54 = vld [vmem:[#allocation7 + $0x90] sm:$0xff] }
 0x2a0   :  { %2196 = vmatprep.subr.bf16.mxu0 %v1771_v53  ;;  %v1715_v62 = vld [vmem:[#allocation7 + $0x278] sm:$0xff] }
 0x2a1   :  { %2162 = vmatpush2.bf16.msra.mxu1 %v2012_v56  ;;  %v1436_v1 = vpop.f32.mrf.mxu0  ;;  %v1919_v3 = vunpack.c.l.s8.bf16 %v1715_v62 }
 0x2a2   :  { %2163 = vmatprep.subr.bf16.mxu1 %v2009_v60  ;;  %v1802_v60 = vunpack.c.h.s8.bf16 %v1654_v54  ;;  %v1798_v1 = vunpack.c.l.s8.bf16 %v1654_v54 }
 0x2a3   :  { %2197 = vmatpush1.bf16.msra.mxu0 %v1770_v30  ;;  %v1799_v30 = vunpack.c.l.s8.bf16 %v1655_v47 }
 0x2a4   :  { %2198 = vmatprep.subr.bf16.mxu0 %v1767_v18 }
 0x2a5   :  { %2164 = vmatpush2.bf16.msra.mxu1 %v2008_v63 }
 0x2a6   :  { %2165 = vmatprep.subr.bf16.mxu1 %v2005_v46  ;;  %v1923_v46 = vunpack.c.h.s8.bf16 %v1715_v62 }
 0x2a7   :  { %2199 = vmatpush1.bf16.msra.mxu0 %v1766_v2  ;;  %v1714_v2 = vld [vmem:[#allocation7 + $0x270] sm:$0xff] }
 0x2a8   :  { %2200 = vmatprep.subr.bf16.mxu0 %v1827_v4  ;;  %v1711_v4 = vld [vmem:[#allocation7 + $0x258] sm:$0xff]  ;;  %v1918_v5 = vunpack.c.l.s8.bf16 %v1714_v2 }
 0x2a9   :  { %2166 = vmatpush2.bf16.msra.mxu1 %v2004_v6  ;;  %v1915_v6 = vunpack.c.h.s8.bf16 %v1711_v4 }
 0x2aa   :  { %2167 = vmatprep.subr.bf16.mxu1 %v2001_v33  ;;  %v1710_v33 = vld [vmem:[#allocation7 + $0x250] sm:$0xff] }
 0x2ab   :  { %2201 = vmatpush2.bf16.msra.mxu0 %v1826_v58  ;;  %v1914_v8 = vunpack.c.h.s8.bf16 %v1710_v33  ;;  %v1911_v58 = vunpack.c.l.s8.bf16 %v1711_v4  ;;  %v1910_v11 = vunpack.c.l.s8.bf16 %v1710_v33  ;;  %v3538_v4 = vld [vmem:[#allocation5] sm:$0xff] }
 0x2ac   :  { %2202 = vmatprep.subr.bf16.mxu0 %v1823_v10  ;;  %v1707_v10 = vld [vmem:[#allocation7 + $0x238] sm:$0xff] }
 0x2ad   :  { %2168 = vmatpush2.bf16.msra.mxu1 %v2000_v12  ;;  %v1907_v12 = vunpack.c.h.s8.bf16 %v1707_v10 }
 0x2ae   :  { %2169 = vmatprep.subr.bf16.mxu1 %v1997_v13  ;;  %v1706_v13 = vld [vmem:[#allocation7 + $0x230] sm:$0xff] }
 0x2af   :  { %2203 = vmatpush2.bf16.msra.mxu0 %v1822_v14  ;;  %v1906_v14 = vunpack.c.h.s8.bf16 %v1706_v13 }
 0x2b0   :  { %2204 = vmatprep.subr.bf16.mxu0 %v1819_v24  ;;  %v1899_v24 = vunpack.c.h.s8.bf16 %v1703_v16 }
 0x2b1   :  { %2170 = vmatpush2.bf16.msra.mxu1 %v1996_v21  ;;  %v1898_v21 = vunpack.c.h.s8.bf16 %v1702_v29 }
 0x2b2   :  { %2171 = vmatprep.subr.bf16.mxu1 %v1993_v41  ;;  %v1895_v41 = vunpack.c.l.s8.bf16 %v1703_v16 }
 0x2b3   :  { %2205 = vmatpush2.bf16.msra.mxu0 %v1818_v17  ;;  %v1894_v17 = vunpack.c.l.s8.bf16 %v1702_v29 }
 0x2b4   :  { %2206 = vmatprep.subr.bf16.mxu0 %v1815_v34  ;;  %v1955_v34 = vunpack.c.h.s8.bf16 %v1731_v32 }
 0x2b5   :  { %2172 = vmatpush2.bf16.msra.mxu1 %v1992_v39  ;;  %v1954_v39 = vunpack.c.h.s8.bf16 %v1730_v48 }
 0x2b6   :  { %2173 = vmatprep.subr.bf16.mxu1 %v1989_v19  ;;  %v1951_v19 = vunpack.c.l.s8.bf16 %v1731_v32 }
 0x2b7   :  { %2207 = vmatpush2.bf16.msra.mxu0 %v1814_v25  ;;  %v1727_v25 = vld [vmem:[#allocation7 + $0x2d8] sm:$0xff] }
 0x2b8   :  { %2208 = vmatprep.subr.bf16.mxu0 %v1811_v27  ;;  %v1950_v27 = vunpack.c.l.s8.bf16 %v1730_v48  ;;  %v1947_v0 = vunpack.c.h.s8.bf16 %v1727_v25  ;;  %v1855_v48 = vunpack.c.l.s8.bf16 %v4033_v7 }
 0x2b9   :  { %2174 = vmatpush2.bf16.msra.mxu1 %v1988_v22  ;;  %v1726_v22 = vld [vmem:[#allocation7 + $0x2d0] sm:$0xff] }
 0x2ba   :  { %2225 = vmatprep.subr.bf16.mxu1 %v1859_v42  ;;  %v1946_v42 = vunpack.c.h.s8.bf16 %v1726_v22  ;;  %v1942_v47 = vunpack.c.l.s8.bf16 %v1726_v22  ;;  %v2414_v22 = vld [vmem:[#allocation10 + $0x30] sm:$0xff] }
 0x2bb   :  { %2209 = vmatpush2.bf16.msra.mxu0 %v1810_v20  ;;  %v4036_v35 = vpop.f32.mrf.mxu0  ;;  %v1943_v20 = vunpack.c.l.s8.bf16 %v1727_v25 }
 0x2bc   :  { %v1390_v50 = vpop.f32.mrf.mxu1  ;;  %2210 = vmatprep.subr.bf16.mxu0 %v1807_v37  ;;  %v1723_v37 = vld [vmem:[#allocation7 + $0x2b8] sm:$0xff] }
 0x2bd   :  { %v4039_v53 = vadd.f32 %v4029_v55, %v1390_v50  ;;  %v4043_v56 = vpop.f32.mrf.mxu0  ;;  %v1922_v55 = vunpack.c.h.s8.bf16 %v1714_v2  ;;  %v1722_v50 = vld [vmem:[#allocation7 + $0x2b0] sm:$0xff]  ;;  %v1935_v54 = vunpack.c.l.s8.bf16 %v1723_v37 }
 0x2be   :  { %v4041_v38 = vpop.f32.mrf.mxu1 }
 0x2bf   :  { %2211 = vmatpush2.bf16.msra.mxu0 %v1806_v36  ;;  %v1517_v18 = vpop.f32.mrf.mxu0  ;;  %v1939_v36 = vunpack.c.h.s8.bf16 %v1723_v37 }
 0x2c0   :  { %v1394_v61 = vpop.f32.mrf.mxu1  ;;  %2212 = vmatprep.subr.bf16.mxu0 %v1803_v40  ;;  %v1938_v40 = vunpack.c.h.s8.bf16 %v1722_v50  ;;  %v1934_v18 = vunpack.c.l.s8.bf16 %v1722_v50  ;;  %v2452_v50 = vunpack.c.l.s8.bf16 %v2414_v22 }
 0x2c1   :  { %v1518_v63 = vpop.f32.mrf.mxu0  ;;  %v1719_v61 = vld [vmem:[#allocation7 + $0x298] sm:$0xff] }
 0x2c2   :  { %v1395_v23 = vpop.f32.mrf.mxu1  ;;  %v1931_v63 = vunpack.c.h.s8.bf16 %v1719_v61 }
 0x2c3   :  { %2213 = vmatpush2.bf16.msra.mxu0 %v1802_v60  ;;  %v4048_v60 = vsub.s32 6, %v3819_v26 }
 0x2c4   :  { %2214 = vmatprep.subr.bf16.mxu0 %v1799_v30  ;;  %v4051_v30 = vsub.s32 7, %v3819_v26 }
 0x2c7   :  { %2215 = vmatpush2.bf16.msra.mxu0 %v1798_v1  ;;  %v1718_v1 = vld [vmem:[#allocation7 + $0x290] sm:$0xff] }
 0x2c8   :  { %2266 = vmatprep.subr.bf16.mxu0 %v1923_v46  ;;  %v1434_v46 = vadd.f32 %v4031_v57, %v4041_v38  ;;  %v1930_v57 = vunpack.c.h.s8.bf16 %v1718_v1 }
 0x2ca   :  { %2217 = vmatmul.mubr.bf16.vlgmr.msra.gmra.mxu0 %v3972_v15  ;;  %v1903_v15 = vunpack.c.l.s8.bf16 %v1707_v10 }
 0x2cb   :  { %2267 = vmatpush1.bf16.msra.mxu0 %v1922_v55  ;;  %2298 = vmatprep.mubr.bf16.mxu0 %v4021_v9  ;;  %v1902_v9 = vunpack.c.l.s8.bf16 %v1706_v13  ;;  %v3537_v55 = vld [vmem:[%s4215_s2] sm:$0xff] }
 0x2cc   :  { %2268 = vmatprep.subr.bf16.mxu0 %v1919_v3  ;;  %v1549_v3 = vrot.slane %v3537_v55, %v4048_v60  ;;  %v1553_v10 = vrot.slane %v3537_v55, %v4051_v30  ;;  %v1671_v55 = vld [vmem:[#allocation7 + $0x118] sm:$0xff] }
 0x2cf   :  { %2269 = vmatpush1.bf16.msra.mxu0 %v1918_v5  ;;  %v1599_v5 = vrot.slane %v3538_v4, %v4048_v60 }
 0x2d0   :  { %2270 = vmatprep.subr.bf16.mxu0 %v1915_v6 }
 0x2d3   :  { %2271 = vmatpush1.bf16.msra.mxu0 %v1914_v8 }
 0x2d4   :  { %2272 = vmatprep.subr.bf16.mxu0 %v1911_v58 }
 0x2d7   :  { %2273 = vmatpush1.bf16.msra.mxu0 %v1910_v11  ;;  %v1927_v11 = vunpack.c.l.s8.bf16 %v1719_v61 }
 0x2d8   :  { %2274 = vmatprep.subr.bf16.mxu0 %v1907_v12 }
 0x2db   :  { %2275 = vmatpush1.bf16.msra.mxu0 %v1906_v14  ;;  %v1603_v14 = vrot.slane %v3538_v4, %v4051_v30 }
 0x2dc   :  { %2276 = vmatprep.subr.bf16.mxu0 %v1903_v15 }
 0x2df   :  { %2277 = vmatpush1.bf16.msra.mxu0 %v1902_v9 }
 0x2e0   :  { %2278 = vmatprep.subr.bf16.mxu0 %v1899_v24 }
 0x2e3   :  { %2279 = vmatpush1.bf16.msra.mxu0 %v1898_v21 }
 0x2e4   :  { %2280 = vmatprep.subr.bf16.mxu0 %v1895_v41  ;;  %v1682_v41 = vld [vmem:[#allocation7 + $0x170] sm:$0xff] }
 0x2e7   :  { %2281 = vmatpush1.bf16.msra.mxu0 %v1894_v17 }
 0x2e8   :  { %2282 = vmatprep.subr.bf16.mxu0 %v1955_v34  ;;  %v1858_v34 = vunpack.c.h.s8.bf16 %v1682_v41 }
 0x2eb   :  { %2283 = vmatpush2.bf16.msra.mxu0 %v1954_v39  ;;  %v1679_v39 = vld [vmem:[#allocation7 + $0x158] sm:$0xff] }
 0x2ec   :  { %2284 = vmatprep.subr.bf16.mxu0 %v1951_v19  ;;  %v1854_v19 = vunpack.c.l.s8.bf16 %v1682_v41  ;;  %v1851_v25 = vunpack.c.h.s8.bf16 %v1679_v39  ;;  %v1847_v7 = vunpack.c.l.s8.bf16 %v1679_v39 }
 0x2ef   :  { %2285 = vmatpush2.bf16.msra.mxu0 %v1950_v27  ;;  %v1678_v27 = vld [vmem:[#allocation7 + $0x150] sm:$0xff] }
 0x2f0   :  { %2286 = vmatprep.subr.bf16.mxu0 %v1947_v0  ;;  %v2415_v0 = vld [vmem:[#allocation10 + $0x38] sm:$0xff] }
 0x2f1   :  { %v2453_v37 = vunpack.c.l.s8.bf16 %v2415_v0 }
 0x2f3   :  { %2287 = vmatpush2.bf16.msra.mxu0 %v1946_v42  ;;  %v2455_v42 = vunpack.c.h.s8.bf16 %v2415_v0  ;;  %v1694_v0 = vld [vmem:[#allocation7 + $0x1d0] sm:$0xff] }
 0x2f4   :  { %2288 = vmatprep.subr.bf16.mxu0 %v1943_v20  ;;  %v2454_v20 = vunpack.c.h.s8.bf16 %v2414_v22 }
 0x2f7   :  { %2289 = vmatpush2.bf16.msra.mxu0 %v1942_v47  ;;  %v2413_v47 = vld [vmem:[#allocation10 + $0x28] sm:$0xff] }
 0x2f8   :  { %2290 = vmatprep.subr.bf16.mxu0 %v1939_v36  ;;  %v1675_v36 = vld [vmem:[#allocation7 + $0x138] sm:$0xff] }
 0x2f9   :  { %v1843_v61 = vunpack.c.h.s8.bf16 %v1675_v36 }
 0x2fb   :  { %2291 = vmatpush2.bf16.msra.mxu0 %v1938_v40  ;;  %v4053_v23 = vpop.f32.mrf.mxu0  ;;  %v2451_v40 = vunpack.c.h.s8.bf16 %v2413_v47 }
 0x2fc   :  { %v1472_v62 = vpop.f32.mrf.mxu1  ;;  %2292 = vmatprep.subr.bf16.mxu0 %v1935_v54  ;;  %v2412_v54 = vld [vmem:[#allocation10 + $0x20] sm:$0xff] }
 0x2fd   :  { %v1473_v2 = vadd.f32 %v1472_v62, %v4039_v53  ;;  %v4063_v33 = vpop.f32.mrf.mxu0  ;;  %v2450_v62 = vunpack.c.h.s8.bf16 %v2412_v54 }
 0x2fe   :  { %v1474_v6 = vpop.f32.mrf.mxu1 }
 0x2ff   :  { %v1514_v8 = vadd.f32 %v4036_v35, %v1473_v2  ;;  %v1475_v58 = vadd.f32 %v1474_v6, %v1434_v46  ;;  %2293 = vmatpush2.bf16.msra.mxu0 %v1934_v18  ;;  %v2058_v38 = vpop.f32.mrf.mxu0  ;;  %v1926_v35 = vunpack.c.l.s8.bf16 %v1718_v1  ;;  %v1674_v18 = vld [vmem:[#allocation7 + $0x130] sm:$0xff]  ;;  %v2449_v1 = vunpack.c.l.s8.bf16 %v2413_v47  ;;  %v2411_v2 = vld [vmem:[#allocation10 + $0x18] sm:$0xff] }
 0x300   :  { %v1476_v53 = vpop.f32.mrf.mxu1  ;;  %2294 = vmatprep.subr.bf16.mxu0 %v1931_v63  ;;  %v1842_v63 = vunpack.c.h.s8.bf16 %v1674_v18  ;;  %v1839_v46 = vunpack.c.l.s8.bf16 %v1675_v36  ;;  %v1838_v4 = vunpack.c.l.s8.bf16 %v1674_v18  ;;  %v2410_v6 = vld [vmem:[#allocation10 + $0x10] sm:$0xff]  ;;  %v1831_v38 = vunpack.c.l.s8.bf16 %v1671_v55 }
 0x301   :  { %v1568_v12 = vmul.f32 %v1549_v3, %v1514_v8  ;;  %v1516_v13 = vadd.f32 %v4043_v56, %v1475_v58  ;;  %v2059_v16 = vpop.f32.mrf.mxu0  ;;  %v2448_v3 = vunpack.c.l.s8.bf16 %v2412_v54  ;;  %v1835_v8 = vunpack.c.h.s8.bf16 %v1671_v55  ;;  %v1670_v58 = vld [vmem:[#allocation7 + $0x110] sm:$0xff] }
 0x302   :  { %v1477_v15 = vpop.f32.mrf.mxu1  ;;  %v2445_v53 = vunpack.c.l.s8.bf16 %v2411_v2  ;;  %v2408_v16 = vld [vmem:[#allocation10] sm:$0xff]  ;;  %v1878_v36 = vunpack.c.l.s8.bf16 %v1694_v0  ;;  %v1690_v54 = vld [vmem:[#allocation7 + $0x1b0] sm:$0xff] }
 0x303   :  { %v1618_v9 = vadd.f32 %v1599_v5, %v1568_v12  ;;  %v1569_v24 = vmul.f32 %v1553_v10, %v1516_v13  ;;  %2295 = vmatpush2.bf16.msra.mxu0 %v1930_v57  ;;  %v2447_v5 = vunpack.c.h.s8.bf16 %v2411_v2  ;;  %v2446_v10 = vunpack.c.h.s8.bf16 %v2410_v6  ;;  %v1699_v12 = vld [vmem:[#allocation7 + $0x1f8] sm:$0xff] }
 0x304   :  { %2296 = vmatprep.subr.bf16.mxu0 %v1927_v11  ;;  %v1834_v57 = vunpack.c.h.s8.bf16 %v1670_v58  ;;  %v2409_v11 = vld [vmem:[#allocation10 + $0x8] sm:$0xff]  ;;  %v2444_v13 = vunpack.c.l.s8.bf16 %v2410_v6  ;;  %v1887_v41 = vunpack.c.l.s8.bf16 %v1699_v12  ;;  %v1874_v18 = vunpack.c.h.s8.bf16 %v1690_v54 }
 0x305   :  { %v1619_v29 = vadd.f32 %v1603_v14, %v1569_v24  ;;  %v1626_v21 = vmax.f32 %v1618_v9, 0.0  ;;  %v1830_v14 = vunpack.c.l.s8.bf16 %v1670_v58  ;;  %v2443_v15 = vunpack.c.h.s8.bf16 %v2409_v11  ;;  %v1698_v24 = vld [vmem:[#allocation7 + $0x1f0] sm:$0xff] }
 0x306   :  { %v1891_v9 = vunpack.c.h.s8.bf16 %v1699_v12  ;;  %v1886_v39 = vunpack.c.l.s8.bf16 %v1698_v24  ;;  %v1686_v6 = vld [vmem:[#allocation7 + $0x190] sm:$0xff] }
 0x307   :  { %2297 = vmatpush2.bf16.msra.mxu0 %v1926_v35  ;;  %v1627_v32 = vmax.f32 %v1619_v29, 0.0  ;;  %v4072_v56 = vpack.c.bf16 %v1626_v21, %v1626_v21  ;;  %v2442_v35 = vunpack.c.h.s8.bf16 %v2408_v16  ;;  %v1890_v29 = vunpack.c.h.s8.bf16 %v1698_v24  ;;  %v1746_v12 = vld [vmem:[#allocation7 + $0x370] sm:$0xff] }
 0x308   :  { %2504 = vmatprep.subr.bf16.mxu0 %v2455_v42  ;;  %v2441_v21 = vunpack.c.l.s8.bf16 %v2409_v11  ;;  %v1862_v11 = vunpack.c.l.s8.bf16 %v1686_v6 }
 0x309   :  { %v4069_v17 = vpack.c.bf16 %v1627_v32, %v1627_v32  ;;  %v2423_v32 = vld [vmem:[#allocation10 + $0x78] sm:$0xff] }
 0x30a   :  { %2299 = vmatmul.mubr.bf16.vlgmr.msra.gmra.mxu0 %v4023_v31  ;;  %v1850_v31 = vunpack.c.h.s8.bf16 %v1678_v27  ;;  %v2469_v42 = vunpack.c.l.s8.bf16 %v2423_v32 }
 0x30b   :  { %2175 = vmatprep.mubr.bf16.mxu1 %v4069_v17  ;;  %2505 = vmatpush1.bf16.msra.mxu0 %v2454_v20 }
 0x30c   :  { %2176 = vmatmul.mubr.bf16.vlgmr.msra.gmra.mxu1 %v4072_v56  ;;  %2506 = vmatprep.subr.bf16.mxu0 %v2453_v37  ;;  %v2421_v37 = vld [vmem:[#allocation10 + $0x68] sm:$0xff] }
 0x30d   :  { %2226 = vmatpush1.bf16.msra.mxu1 %v1858_v34  ;;  %2257 = vmatprep.mubr.bf16.mxu1 %v3974_v28  ;;  %v1846_v28 = vunpack.c.l.s8.bf16 %v1678_v27  ;;  %v1695_v34 = vld [vmem:[#allocation7 + $0x1d8] sm:$0xff] }
 0x30e   :  { %2227 = vmatprep.subr.bf16.mxu1 %v1855_v48  ;;  %v2440_v48 = vunpack.c.l.s8.bf16 %v2408_v16  ;;  %v1883_v27 = vunpack.c.h.s8.bf16 %v1695_v34  ;;  %v1879_v20 = vunpack.c.l.s8.bf16 %v1695_v34  ;;  %v2418_v16 = vld [vmem:[#allocation10 + $0x50] sm:$0xff] }
 0x30f   :  { %2507 = vmatpush1.bf16.msra.mxu0 %v2452_v50  ;;  %v2467_v50 = vunpack.c.h.s8.bf16 %v2421_v37  ;;  %v2462_v24 = vunpack.c.h.s8.bf16 %v2418_v16 }
 0x310   :  { %2508 = vmatprep.subr.bf16.mxu0 %v2451_v40 }
 0x311   :  { %2228 = vmatpush1.bf16.msra.mxu1 %v1854_v19  ;;  %v2471_v19 = vunpack.c.h.s8.bf16 %v2423_v32  ;;  %v1982_v32 = vunpack.c.l.s8.bf16 %v1746_v12 }
 0x312   :  { %2229 = vmatprep.subr.bf16.mxu1 %v1851_v25  ;;  %v2422_v25 = vld [vmem:[#allocation10 + $0x70] sm:$0xff] }
 0x313   :  { %2509 = vmatpush1.bf16.msra.mxu0 %v2450_v62  ;;  %v2470_v22 = vunpack.c.h.s8.bf16 %v2422_v25  ;;  %v2468_v47 = vunpack.c.l.s8.bf16 %v2422_v25  ;;  %v2465_v62 = vunpack.c.l.s8.bf16 %v2421_v37  ;;  %v2460_v25 = vunpack.c.l.s8.bf16 %v2418_v16  ;;  %v1739_v37 = vld [vmem:[#allocation7 + $0x338] sm:$0xff] }
 0x314   :  { %2510 = vmatprep.subr.bf16.mxu0 %v2449_v1  ;;  %v1687_v1 = vld [vmem:[#allocation7 + $0x198] sm:$0xff] }
 0x315   :  { %2230 = vmatpush1.bf16.msra.mxu1 %v1850_v31  ;;  %v1882_v31 = vunpack.c.h.s8.bf16 %v1694_v0  ;;  %v2417_v0 = vld [vmem:[#allocation10 + $0x48] sm:$0xff] }
 0x316   :  { %2231 = vmatprep.subr.bf16.mxu1 %v1847_v7  ;;  %v1691_v7 = vld [vmem:[#allocation7 + $0x1b8] sm:$0xff] }
 0x317   :  { %2511 = vmatpush1.bf16.msra.mxu0 %v2448_v3  ;;  %v1875_v40 = vunpack.c.h.s8.bf16 %v1691_v7  ;;  %v1870_v3 = vunpack.c.l.s8.bf16 %v1690_v54  ;;  %v1735_v54 = vld [vmem:[#allocation7 + $0x318] sm:$0xff] }
 0x318   :  { %2512 = vmatprep.subr.bf16.mxu0 %v2447_v5  ;;  %v1867_v5 = vunpack.c.h.s8.bf16 %v1687_v1 }
 0x319   :  { %2232 = vmatpush1.bf16.msra.mxu1 %v1846_v28  ;;  %v2420_v28 = vld [vmem:[#allocation10 + $0x60] sm:$0xff] }
 0x31a   :  { %2233 = vmatprep.subr.bf16.mxu1 %v1843_v61  ;;  %v2466_v61 = vunpack.c.h.s8.bf16 %v2420_v28  ;;  %v2464_v2 = vunpack.c.l.s8.bf16 %v2420_v28 }
 0x31b   :  { %2513 = vmatpush1.bf16.msra.mxu0 %v2446_v10  ;;  %v1866_v10 = vunpack.c.h.s8.bf16 %v1686_v6  ;;  %v1759_v6 = vld [vmem:[#allocation7 + $0x3d8] sm:$0xff] }
 0x31c   :  { %2514 = vmatprep.subr.bf16.mxu0 %v2445_v53  ;;  %v1863_v53 = vunpack.c.l.s8.bf16 %v1687_v1  ;;  %v1959_v1 = vunpack.c.l.s8.bf16 %v1735_v54 }
 0x31d   :  { %2234 = vmatpush1.bf16.msra.mxu1 %v1842_v63  ;;  %v1871_v63 = vunpack.c.l.s8.bf16 %v1691_v7  ;;  %v2457_v7 = vunpack.c.l.s8.bf16 %v2417_v0 }
 0x31e   :  { %2235 = vmatprep.subr.bf16.mxu1 %v1839_v46 }
 0x31f   :  { %2515 = vmatpush1.bf16.msra.mxu0 %v2444_v13  ;;  %v2419_v13 = vld [vmem:[#allocation10 + $0x58] sm:$0xff] }
 0x320   :  { %2516 = vmatprep.subr.bf16.mxu0 %v2443_v15  ;;  %v2463_v15 = vunpack.c.h.s8.bf16 %v2419_v13  ;;  %v2461_v34 = vunpack.c.l.s8.bf16 %v2419_v13 }
 0x321   :  { %2236 = vmatpush1.bf16.msra.mxu1 %v1838_v4 }
 0x322   :  { %2237 = vmatprep.subr.bf16.mxu1 %v1835_v8 }
 0x323   :  { %2517 = vmatpush1.bf16.msra.mxu0 %v2442_v35 }
 0x324   :  { %2518 = vmatprep.subr.bf16.mxu0 %v2441_v21 }
 0x325   :  { %2238 = vmatpush1.bf16.msra.mxu1 %v1834_v57 }
 0x326   :  { %2239 = vmatprep.subr.bf16.mxu1 %v1831_v38  ;;  %v1747_v38 = vld [vmem:[#allocation7 + $0x378] sm:$0xff] }
 0x327   :  { %2519 = vmatpush1.bf16.msra.mxu0 %v2440_v48 }
 0x328   :  { %2520 = vmatprep.subr.bf16.mxu0 %v2471_v19  ;;  %v1742_v19 = vld [vmem:[#allocation7 + $0x350] sm:$0xff] }
 0x329   :  { %2240 = vmatpush1.bf16.msra.mxu1 %v1830_v14  ;;  %v1986_v14 = vunpack.c.h.s8.bf16 %v1746_v12  ;;  %v1754_v12 = vld [vmem:[#allocation7 + $0x3b0] sm:$0xff] }
 0x32a   :  { %2241 = vmatprep.subr.bf16.mxu1 %v1891_v9  ;;  %v2002_v13 = vunpack.c.h.s8.bf16 %v1754_v12  ;;  %v1998_v16 = vunpack.c.l.s8.bf16 %v1754_v12 }
 0x32b   :  { %2521 = vmatpush2.bf16.msra.mxu0 %v2470_v22  ;;  %v2459_v22 = vunpack.c.h.s8.bf16 %v2417_v0 }
 0x32c   :  { %2522 = vmatprep.subr.bf16.mxu0 %v2469_v42 }
 0x32d   :  { %2242 = vmatpush2.bf16.msra.mxu1 %v1890_v29  ;;  %v1743_v29 = vld [vmem:[#allocation7 + $0x358] sm:$0xff] }
 0x32e   :  { %2243 = vmatprep.subr.bf16.mxu1 %v1887_v41  ;;  %v1975_v42 = vunpack.c.l.s8.bf16 %v1743_v29 }
 0x32f   :  { %2523 = vmatpush2.bf16.msra.mxu0 %v2468_v47 }
 0x330   :  { %2524 = vmatprep.subr.bf16.mxu0 %v2467_v50  ;;  %v1738_v50 = vld [vmem:[#allocation7 + $0x330] sm:$0xff] }
 0x331   :  { %2244 = vmatpush2.bf16.msra.mxu1 %v1886_v39  ;;  %v1979_v39 = vunpack.c.h.s8.bf16 %v1743_v29  ;;  %v1970_v28 = vunpack.c.h.s8.bf16 %v1738_v50 }
 0x332   :  { %2245 = vmatprep.subr.bf16.mxu1 %v1883_v27 }
 0x333   :  { %2525 = vmatpush2.bf16.msra.mxu0 %v2466_v61  ;;  %v1966_v61 = vunpack.c.l.s8.bf16 %v1738_v50 }
 0x334   :  { %2526 = vmatprep.subr.bf16.mxu0 %v2465_v62  ;;  %v1734_v62 = vld [vmem:[#allocation7 + $0x310] sm:$0xff] }
 0x335   :  { %2246 = vmatpush2.bf16.msra.mxu1 %v1882_v31  ;;  %v2416_v31 = vld [vmem:[#allocation10 + $0x40] sm:$0xff] }
 0x336   :  { %2247 = vmatprep.subr.bf16.mxu1 %v1879_v20  ;;  %v2458_v20 = vunpack.c.h.s8.bf16 %v2416_v31  ;;  %v2456_v47 = vunpack.c.l.s8.bf16 %v2416_v31 }
 0x337   :  { %2527 = vmatpush2.bf16.msra.mxu0 %v2464_v2  ;;  %v1958_v2 = vunpack.c.l.s8.bf16 %v1734_v62 }
 0x338   :  { %2528 = vmatprep.subr.bf16.mxu0 %v2463_v15  ;;  %v1751_v15 = vld [vmem:[#allocation7 + $0x398] sm:$0xff] }
 0x339   :  { %2248 = vmatpush2.bf16.msra.mxu1 %v1878_v36  ;;  %v1971_v36 = vunpack.c.h.s8.bf16 %v1739_v37  ;;  %v1991_v29 = vunpack.c.l.s8.bf16 %v1751_v15 }
 0x33a   :  { %2249 = vmatprep.subr.bf16.mxu1 %v1875_v40  ;;  %v1967_v40 = vunpack.c.l.s8.bf16 %v1739_v37 }
 0x33b   :  { %2529 = vmatpush2.bf16.msra.mxu0 %v2462_v24 }
 0x33c   :  { %v2095_v46 = vpop.f32.mrf.mxu1  ;;  %2530 = vmatprep.subr.bf16.mxu0 %v2461_v34 }
 0x33d   :  { %v2096_v55 = vadd.f32 %v2095_v46, %v4053_v23  ;;  %2250 = vmatpush2.bf16.msra.mxu1 %v1874_v18  ;;  %v1987_v23 = vunpack.c.h.s8.bf16 %v1747_v38  ;;  %v1963_v18 = vunpack.c.h.s8.bf16 %v1735_v54  ;;  %v1763_v46 = vld [vmem:[#allocation7 + $0x3f8] sm:$0xff] }
 0x33e   :  { %v2097_v4 = vpop.f32.mrf.mxu1  ;;  %2251 = vmatprep.subr.bf16.mxu1 %v1871_v63  ;;  %v1962_v63 = vunpack.c.h.s8.bf16 %v1734_v62 }
 0x33f   :  { %v2098_v8 = vadd.f32 %v2097_v4, %v4063_v33  ;;  %v1983_v33 = vunpack.c.l.s8.bf16 %v1747_v38  ;;  %2531 = vmatpush2.bf16.msra.mxu0 %v2460_v25  ;;  %v1755_v38 = vld [vmem:[#allocation7 + $0x3b8] sm:$0xff] }
 0x340   :  { %v2099_v58 = vpop.f32.mrf.mxu1  ;;  %2532 = vmatprep.subr.bf16.mxu0 %v2459_v22  ;;  %v2430_v25 = vld [vmem:[#allocation10 + $0xb0] sm:$0xff]  ;;  %v2429_v22 = vld [vmem:[#allocation10 + $0xa8] sm:$0xff] }
 0x341   :  { %2252 = vmatpush2.bf16.msra.mxu1 %v1870_v3  ;;  %v1762_v3 = vld [vmem:[#allocation7 + $0x3f0] sm:$0xff]  ;;  %v2011_v58 = vunpack.c.h.s8.bf16 %v1759_v6  ;;  %v2486_v0 = vunpack.c.h.s8.bf16 %v2430_v25  ;;  %v2484_v31 = vunpack.c.l.s8.bf16 %v2430_v25 }
 0x342   :  { %v2100_v57 = vpop.f32.mrf.mxu1  ;;  %2253 = vmatprep.subr.bf16.mxu1 %v1867_v5  ;;  %v2018_v4 = vunpack.c.h.s8.bf16 %v1762_v3  ;;  %v2015_v5 = vunpack.c.l.s8.bf16 %v1763_v46 }
 0x343   :  { %2533 = vmatpush2.bf16.msra.mxu0 %v2458_v20  ;;  %v2428_v20 = vld [vmem:[#allocation10 + $0xa0] sm:$0xff] }
 0x344   :  { %2534 = vmatprep.subr.bf16.mxu0 %v2457_v7  ;;  %v2482_v37 = vunpack.c.h.s8.bf16 %v2428_v20  ;;  %v2427_v7 = vld [vmem:[#allocation10 + $0x98] sm:$0xff] }
 0x345   :  { %2254 = vmatpush2.bf16.msra.mxu1 %v1866_v10  ;;  %v1758_v10 = vld [vmem:[#allocation7 + $0x3d0] sm:$0xff] }
 0x346   :  { %2255 = vmatprep.subr.bf16.mxu1 %v1863_v53  ;;  %v2010_v57 = vunpack.c.h.s8.bf16 %v1758_v10  ;;  %v2007_v53 = vunpack.c.l.s8.bf16 %v1759_v6 }
 0x347   :  { %2535 = vmatpush2.bf16.msra.mxu0 %v2456_v47  ;;  %v2479_v47 = vunpack.c.h.s8.bf16 %v2427_v7 }
 0x349   :  { %2256 = vmatpush2.bf16.msra.mxu1 %v1862_v11  ;;  %v2006_v11 = vunpack.c.l.s8.bf16 %v1758_v10 }
 0x34a   :  { %v2136_v9 = vpop.f32.mrf.mxu0  ;;  %2307 = vmatprep.subr.bf16.mxu1 %v1987_v23  ;;  %v2003_v23 = vunpack.c.h.s8.bf16 %v1755_v38 }
 0x34b   :  { %v4080_v35 = vadd.f32 %v2136_v9, %v2096_v55  ;;  %v2019_v55 = vunpack.c.h.s8.bf16 %v1763_v46  ;;  %v1995_v9 = vunpack.c.h.s8.bf16 %v1751_v15  ;;  %v4098_v15 = vld [vmem:[#allocation8] sm:$0xf] }
 0x34c   :  { %2258 = vmatmul.mubr.bf16.vlgmr.msra.gmra.mxu1 %v4008_v45  ;;  %v2138_v21 = vpop.f32.mrf.mxu0  ;;  %v1978_v45 = vunpack.c.h.s8.bf16 %v1742_v19 }
 0x34d   :  { %v4083_v41 = vadd.f32 %v2138_v21, %v2098_v8  ;;  %2308 = vmatpush1.bf16.msra.mxu1 %v1986_v14  ;;  %2339 = vmatprep.mubr.bf16.mxu1 %v4069_v17  ;;  %v1974_v17 = vunpack.c.l.s8.bf16 %v1742_v19  ;;  %v2014_v8 = vunpack.c.l.s8.bf16 %v1762_v3  ;;  %v1999_v14 = vunpack.c.l.s8.bf16 %v1755_v38  ;;  %v2431_v19 = vld [vmem:[#allocation10 + $0xb8] sm:$0xff] }
 0x34e   :  { %v2140_v48 = vpop.f32.mrf.mxu0  ;;  %2309 = vmatprep.subr.bf16.mxu1 %v1983_v33  ;;  %v1750_v33 = vld [vmem:[#allocation7 + $0x390] sm:$0xff] }
 0x34f   :  { %v1994_v24 = vunpack.c.h.s8.bf16 %v1750_v33  ;;  %v1990_v21 = vunpack.c.l.s8.bf16 %v1750_v33 }
 0x350   :  { %v2141_v27 = vpop.f32.mrf.mxu0 }
 0x351   :  { %2310 = vmatpush1.bf16.msra.mxu1 %v1982_v32  ;;  %v2487_v27 = vunpack.c.h.s8.bf16 %v2431_v19 }
 0x352   :  { %2311 = vmatprep.subr.bf16.mxu1 %v1979_v39 }
 0x355   :  { %2312 = vmatpush1.bf16.msra.mxu1 %v1978_v45  ;;  %v2485_v45 = vunpack.c.l.s8.bf16 %v2431_v19 }
 0x356   :  { %2313 = vmatprep.subr.bf16.mxu1 %v1975_v42  ;;  %v2483_v42 = vunpack.c.h.s8.bf16 %v2429_v22 }
 0x359   :  { %2314 = vmatpush1.bf16.msra.mxu1 %v1974_v17  ;;  %v2481_v17 = vunpack.c.l.s8.bf16 %v2429_v22  ;;  %v2433_v22 = vld [vmem:[#allocation10 + $0xc8] sm:$0xff] }
 0x35a   :  { %2315 = vmatprep.subr.bf16.mxu1 %v1971_v36  ;;  %v2426_v36 = vld [vmem:[#allocation10 + $0x90] sm:$0xff] }
 0x35b   :  { %v2478_v50 = vunpack.c.h.s8.bf16 %v2426_v36  ;;  %v2476_v54 = vunpack.c.l.s8.bf16 %v2426_v36 }
 0x35d   :  { %2316 = vmatpush1.bf16.msra.mxu1 %v1970_v28  ;;  %v2477_v28 = vunpack.c.l.s8.bf16 %v2427_v7 }
 0x35e   :  { %2317 = vmatprep.subr.bf16.mxu1 %v1967_v40  ;;  %v2425_v40 = vld [vmem:[#allocation10 + $0x88] sm:$0xff] }
 0x361   :  { %2318 = vmatpush1.bf16.msra.mxu1 %v1966_v61  ;;  %v2475_v61 = vunpack.c.h.s8.bf16 %v2425_v40 }
 0x362   :  { %2319 = vmatprep.subr.bf16.mxu1 %v1963_v18  ;;  %v2424_v18 = vld [vmem:[#allocation10 + $0x80] sm:$0xff] }
 0x363   :  { %v2474_v62 = vunpack.c.h.s8.bf16 %v2424_v18  ;;  %v2472_v46 = vunpack.c.l.s8.bf16 %v2424_v18 }
 0x365   :  { %2320 = vmatpush1.bf16.msra.mxu1 %v1962_v63  ;;  %v2473_v63 = vunpack.c.l.s8.bf16 %v2425_v40 }
 0x366   :  { %2321 = vmatprep.subr.bf16.mxu1 %v1959_v1  ;;  %v2439_v1 = vld [vmem:[#allocation10 + $0xf8] sm:$0xff] }
 0x369   :  { %2322 = vmatpush1.bf16.msra.mxu1 %v1958_v2  ;;  %v2503_v2 = vunpack.c.h.s8.bf16 %v2439_v1 }
 0x36a   :  { %2323 = vmatprep.subr.bf16.mxu1 %v2019_v55  ;;  %v2438_v55 = vld [vmem:[#allocation10 + $0xf0] sm:$0xff] }
 0x36b   :  { %v2502_v3 = vunpack.c.h.s8.bf16 %v2438_v55  ;;  %v2500_v6 = vunpack.c.l.s8.bf16 %v2438_v55 }
 0x36d   :  { %2324 = vmatpush2.bf16.msra.mxu1 %v2018_v4  ;;  %v2501_v4 = vunpack.c.l.s8.bf16 %v2439_v1  ;;  %v2661_v1 = vld [vmem:[#allocation13 + $0x158] sm:$0xff] }
 0x36e   :  { %2325 = vmatprep.subr.bf16.mxu1 %v2015_v5  ;;  %v2437_v5 = vld [vmem:[#allocation10 + $0xe8] sm:$0xff]  ;;  %v2829_v55 = vunpack.c.h.s8.bf16 %v2661_v1 }
 0x370   :  { %2954 = vmatprep.subr.bf16.mxu0 %v2829_v55 }
 0x371   :  { %2326 = vmatpush2.bf16.msra.mxu1 %v2014_v8  ;;  %v2499_v8 = vunpack.c.h.s8.bf16 %v2437_v5 }
 0x372   :  { %2327 = vmatprep.subr.bf16.mxu1 %v2011_v58  ;;  %v2436_v58 = vld [vmem:[#allocation10 + $0xe0] sm:$0xff] }
 0x373   :  { %v2498_v10 = vunpack.c.h.s8.bf16 %v2436_v58  ;;  %v2496_v38 = vunpack.c.l.s8.bf16 %v2436_v58 }
 0x375   :  { %2328 = vmatpush2.bf16.msra.mxu1 %v2010_v57  ;;  %v2497_v57 = vunpack.c.l.s8.bf16 %v2437_v5  ;;  %v2815_v5 = vunpack.c.l.s8.bf16 %v2661_v1 }
 0x376   :  { %2329 = vmatprep.subr.bf16.mxu1 %v2007_v53  ;;  %v2435_v53 = vld [vmem:[#allocation10 + $0xd8] sm:$0xff] }
 0x379   :  { %2330 = vmatpush2.bf16.msra.mxu1 %v2006_v11  ;;  %v2495_v11 = vunpack.c.h.s8.bf16 %v2435_v53 }
 0x37a   :  { %2331 = vmatprep.subr.bf16.mxu1 %v2003_v23  ;;  %v2434_v23 = vld [vmem:[#allocation10 + $0xd0] sm:$0xff] }
 0x37b   :  { %v2494_v12 = vunpack.c.h.s8.bf16 %v2434_v23 }
 0x37d   :  { %2332 = vmatpush2.bf16.msra.mxu1 %v2002_v13  ;;  %v4094_v13 = vld [vmem:[%s4218_s5] sm:$0xf] }
 0x37e   :  { %2333 = vmatprep.subr.bf16.mxu1 %v1999_v14 }
 0x381   :  { %2334 = vmatpush2.bf16.msra.mxu1 %v1998_v16  ;;  %v2353_v16 = vrot.slane %v4094_v13, %v3956_v44 }
 0x382   :  { %2335 = vmatprep.subr.bf16.mxu1 %v1995_v9 }
 0x385   :  { %2336 = vmatpush2.bf16.msra.mxu1 %v1994_v24  ;;  %v2493_v24 = vunpack.c.l.s8.bf16 %v2435_v53 }
 0x386   :  { %2337 = vmatprep.subr.bf16.mxu1 %v1991_v29 }
 0x389   :  { %2338 = vmatpush2.bf16.msra.mxu1 %v1990_v21  ;;  %v2379_v21 = vrot.slane %v4098_v15, %v3956_v44 }
 0x38a   :  { %v4086_v32 = vpop.f32.mrf.mxu0  ;;  %2545 = vmatprep.subr.bf16.mxu1 %v2487_v27 }
 0x38c   :  { %v4088_v34 = vpop.f32.mrf.mxu0  ;;  %2340 = vmatmul.mubr.bf16.vlgmr.msra.gmra.mxu1 %v4072_v56  ;;  %v2480_v56 = vunpack.c.l.s8.bf16 %v2428_v20  ;;  %v2432_v20 = vld [vmem:[#allocation10 + $0xc0] sm:$0xff] }
 0x38d   :  { %2546 = vmatpush1.bf16.msra.mxu1 %v2486_v0  ;;  %v2490_v7 = vunpack.c.h.s8.bf16 %v2432_v20 }
 0x38e   :  { %v2222_v48 = vpop.f32.mrf.mxu0  ;;  %2547 = vmatprep.subr.bf16.mxu1 %v2485_v45  ;;  %v2383_v45 = vrot.slane %v4098_v15, %v3923_v51 }
 0x38f   :  { %v2357_v48 = vrot.slane %v4094_v13, %v3923_v51 }
 0x390   :  { %v2223_v39 = vpop.f32.mrf.mxu0 }
 0x391   :  { %2548 = vmatpush1.bf16.msra.mxu1 %v2484_v31  ;;  %v2492_v39 = vunpack.c.l.s8.bf16 %v2434_v23 }
 0x392   :  { %2549 = vmatprep.subr.bf16.mxu1 %v2483_v42  ;;  %v2491_v42 = vunpack.c.h.s8.bf16 %v2433_v22 }
 0x395   :  { %2550 = vmatpush1.bf16.msra.mxu1 %v2482_v37 }
 0x396   :  { %2551 = vmatprep.subr.bf16.mxu1 %v2481_v17 }
 0x399   :  { %2552 = vmatpush1.bf16.msra.mxu1 %v2480_v56 }
 0x39a   :  { %2553 = vmatprep.subr.bf16.mxu1 %v2479_v47 }
 0x39d   :  { %2554 = vmatpush1.bf16.msra.mxu1 %v2478_v50  ;;  %v2489_v50 = vunpack.c.l.s8.bf16 %v2433_v22 }
 0x39e   :  { %2555 = vmatprep.subr.bf16.mxu1 %v2477_v28 }
 0x3a1   :  { %2556 = vmatpush1.bf16.msra.mxu1 %v2476_v54 }
 0x3a2   :  { %2557 = vmatprep.subr.bf16.mxu1 %v2475_v61 }
 0x3a5   :  { %2558 = vmatpush1.bf16.msra.mxu1 %v2474_v62 }
 0x3a6   :  { %2559 = vmatprep.subr.bf16.mxu1 %v2473_v63 }
 0x3a9   :  { %2560 = vmatpush1.bf16.msra.mxu1 %v2472_v46  ;;  %v4112_v46 = vld [vmem:[#allocation13 + $0x168] sm:$0xff] }
 0x3aa   :  { %2561 = vmatprep.subr.bf16.mxu1 %v2503_v2  ;;  %v2660_v2 = vld [vmem:[#allocation13 + $0x150] sm:$0xff] }
 0x3ad   :  { %2562 = vmatpush2.bf16.msra.mxu1 %v2502_v3  ;;  %v2831_v3 = vunpack.c.h.s8.bf16 %v4112_v46 }
 0x3ae   :  { %2563 = vmatprep.subr.bf16.mxu1 %v2501_v4  ;;  %v2828_v4 = vunpack.c.h.s8.bf16 %v2660_v2 }
 0x3b1   :  { %2564 = vmatpush2.bf16.msra.mxu1 %v2500_v6  ;;  %v2647_v6 = vld [vmem:[#allocation13 + $0xe8] sm:$0xff] }
 0x3b2   :  { %2565 = vmatprep.subr.bf16.mxu1 %v2499_v8  ;;  %v2814_v8 = vunpack.c.l.s8.bf16 %v2660_v2  ;;  %v2801_v58 = vunpack.c.h.s8.bf16 %v2647_v6  ;;  %v2787_v53 = vunpack.c.l.s8.bf16 %v2647_v6  ;;  %v2391_v2 = vrot.slane %v4098_v15, %v3959_v49 }
 0x3b5   :  { %2566 = vmatpush2.bf16.msra.mxu1 %v2498_v10  ;;  %v2646_v10 = vld [vmem:[#allocation13 + $0xe0] sm:$0xff] }
 0x3b6   :  { %2567 = vmatprep.subr.bf16.mxu1 %v2497_v57  ;;  %v2800_v57 = vunpack.c.h.s8.bf16 %v2646_v10 }
 0x3b9   :  { %2568 = vmatpush2.bf16.msra.mxu1 %v2496_v38  ;;  %v2633_v38 = vld [vmem:[#allocation13 + $0x78] sm:$0xff] }
 0x3ba   :  { %2569 = vmatprep.subr.bf16.mxu1 %v2495_v11  ;;  %v2786_v11 = vunpack.c.l.s8.bf16 %v2646_v10  ;;  %v2773_v23 = vunpack.c.h.s8.bf16 %v2633_v38 }
 0x3bd   :  { %2570 = vmatpush2.bf16.msra.mxu1 %v2494_v12  ;;  %v2632_v12 = vld [vmem:[#allocation13 + $0x70] sm:$0xff] }
 0x3be   :  { %2571 = vmatprep.subr.bf16.mxu1 %v2493_v24  ;;  %v2619_v24 = vld [vmem:[#allocation13 + $0x8] sm:$0xff] }
 0x3c1   :  { %2572 = vmatpush2.bf16.msra.mxu1 %v2492_v39 }
 0x3c2   :  { %2573 = vmatprep.subr.bf16.mxu1 %v2491_v42 }
 0x3c5   :  { %2574 = vmatpush2.bf16.msra.mxu1 %v2490_v7 }
 0x3c6   :  { %2575 = vmatprep.subr.bf16.mxu1 %v2489_v50 }
 0x3ca   :  { %v4096_v14 = vpop.f32.mrf.mxu0 }
 0x3cc   :  { %v4102_v9 = vpop.f32.mrf.mxu0  ;;  %v2177_v33 = vpop.f32.mrf.mxu1 }
 0x3cd   :  { %v2178_v29 = vadd.f32 %v2177_v33, %v4080_v35  ;;  %v2759_v33 = vunpack.c.l.s8.bf16 %v2633_v38  ;;  %v2817_v38 = vunpack.c.l.s8.bf16 %v4112_v46 }
 0x3ce   :  { %v2304_v19 = vpop.f32.mrf.mxu0  ;;  %v2179_v25 = vpop.f32.mrf.mxu1 }
 0x3cf   :  { %v2370_v27 = vmul.f32 %v2353_v16, %v2178_v29  ;;  %v2180_v0 = vadd.f32 %v2179_v25, %v4083_v41  ;;  %v2488_v41 = vunpack.c.l.s8.bf16 %v2432_v20  ;;  %v2772_v16 = vunpack.c.h.s8.bf16 %v2632_v12  ;;  %v2717_v25 = vld [vmem:[#allocation13 + $0x318] sm:$0xff] }
 0x3d0   :  { %v2305_v31 = vpop.f32.mrf.mxu0  ;;  %v2181_v35 = vpop.f32.mrf.mxu1  ;;  %v2758_v29 = vunpack.c.l.s8.bf16 %v2632_v12  ;;  %v2731_v19 = vunpack.c.l.s8.bf16 %v2619_v24  ;;  %v2648_v12 = vld [vmem:[#allocation13 + $0xf0] sm:$0xff] }
 0x3d1   :  { %v2396_v37 = vadd.f32 %v2379_v21, %v2370_v27  ;;  %v2371_v17 = vmul.f32 %v2357_v48, %v2180_v0  ;;  %2576 = vmatpush2.bf16.msra.mxu1 %v2488_v41  ;;  %v2745_v21 = vunpack.c.h.s8.bf16 %v2619_v24  ;;  %v2618_v48 = vld [vmem:[#allocation13] sm:$0xff]  ;;  %v2941_v0 = vunpack.c.h.s8.bf16 %v2717_v25  ;;  %v2703_v35 = vld [vmem:[#allocation13 + $0x2a8] sm:$0xff] }
 0x3d2   :  { %v2182_v56 = vpop.f32.mrf.mxu1  ;;  %2995 = vmatprep.subr.bf16.mxu1 %v2831_v3  ;;  %v2744_v39 = vunpack.c.h.s8.bf16 %v2618_v48  ;;  %v2730_v27 = vunpack.c.l.s8.bf16 %v2618_v48  ;;  %v2927_v31 = vunpack.c.l.s8.bf16 %v2717_v25  ;;  %v2913_v20 = vunpack.c.h.s8.bf16 %v2703_v35  ;;  %v2635_v24 = vld [vmem:[#allocation13 + $0x88] sm:$0xff]  ;;  %v2634_v48 = vld [vmem:[#allocation13 + $0x80] sm:$0xff] }
 0x3d3   :  { %v2397_v47 = vadd.f32 %v2383_v45, %v2371_v17  ;;  %v2400_v36 = vmax.f32 %v2396_v37, 0.0  ;;  %v2716_v45 = vld [vmem:[#allocation13 + $0x310] sm:$0xff]  ;;  %v2702_v37 = vld [vmem:[#allocation13 + $0x2a0] sm:$0xff]  ;;  %v2774_v46 = vunpack.c.h.s8.bf16 %v2634_v48  ;;  %v2760_v25 = vunpack.c.l.s8.bf16 %v2634_v48 }
 0x3d4   :  { %v2940_v22 = vunpack.c.h.s8.bf16 %v2716_v45  ;;  %v2926_v42 = vunpack.c.l.s8.bf16 %v2716_v45  ;;  %v2912_v7 = vunpack.c.h.s8.bf16 %v2702_v37 }
 0x3d5   :  { %v2401_v28 = vmax.f32 %v2397_v47, 0.0  ;;  %v2404_v54 = vpack.c.bf16 %v2400_v36, %v2400_v36  ;;  %v2899_v47 = vunpack.c.l.s8.bf16 %v2703_v35  ;;  %v4117_v36 = vld [vmem:[#allocation13 + $0x238] sm:$0xff] }
 0x3d7   :  { %v2405_v40 = vpack.c.bf16 %v2401_v28, %v2401_v28  ;;  %v2361_v28 = vrot.slane %v4094_v13, %v3988_v59 }
 0x3d9   :  { %2536 = vmatprep.mubr.bf16.mxu0 %v2405_v40  ;;  %v2387_v40 = vrot.slane %v4098_v15, %v3988_v59  ;;  %v2649_v15 = vld [vmem:[#allocation13 + $0xf8] sm:$0xff] }
 0x3da   :  { %2537 = vmatmul.mubr.bf16.vlgmr.msra.gmra.mxu0 %v2404_v54  ;;  %v2898_v54 = vunpack.c.l.s8.bf16 %v2702_v37 }
 0x3db   :  { %2955 = vmatpush1.bf16.msra.mxu0 %v2828_v4 }
 0x3dc   :  { %2956 = vmatprep.subr.bf16.mxu0 %v2815_v5 }
 0x3df   :  { %2957 = vmatpush1.bf16.msra.mxu0 %v2814_v8  ;;  %v2662_v8 = vld [vmem:[#allocation13 + $0x160] sm:$0xff] }
 0x3e0   :  { %2958 = vmatprep.subr.bf16.mxu0 %v2801_v58 }
 0x3e3   :  { %2959 = vmatpush1.bf16.msra.mxu0 %v2800_v57  ;;  %v2830_v57 = vunpack.c.h.s8.bf16 %v2662_v8 }
 0x3e4   :  { %2960 = vmatprep.subr.bf16.mxu0 %v2787_v53 }
 0x3e7   :  { %2961 = vmatpush1.bf16.msra.mxu0 %v2786_v11  ;;  %v2816_v11 = vunpack.c.l.s8.bf16 %v2662_v8 }
 0x3e8   :  { %2962 = vmatprep.subr.bf16.mxu0 %v2773_v23  ;;  %v2803_v23 = vunpack.c.h.s8.bf16 %v2649_v15 }
 0x3eb   :  { %2963 = vmatpush1.bf16.msra.mxu0 %v2772_v16  ;;  %v2802_v16 = vunpack.c.h.s8.bf16 %v2648_v12 }
 0x3ec   :  { %2964 = vmatprep.subr.bf16.mxu0 %v2759_v33  ;;  %v2789_v33 = vunpack.c.l.s8.bf16 %v2649_v15  ;;  %v2665_v15 = vld [vmem:[#allocation13 + $0x178] sm:$0xff] }
 0x3ef   :  { %2965 = vmatpush1.bf16.msra.mxu0 %v2758_v29  ;;  %v2788_v29 = vunpack.c.l.s8.bf16 %v2648_v12 }
 0x3f0   :  { %2966 = vmatprep.subr.bf16.mxu0 %v2745_v21  ;;  %v2775_v21 = vunpack.c.h.s8.bf16 %v2635_v24 }
 0x3f3   :  { %2967 = vmatpush1.bf16.msra.mxu0 %v2744_v39  ;;  %v2761_v39 = vunpack.c.l.s8.bf16 %v2635_v24 }
 0x3f4   :  { %2968 = vmatprep.subr.bf16.mxu0 %v2731_v19  ;;  %v2621_v19 = vld [vmem:[#allocation13 + $0x18] sm:$0xff] }
 0x3f7   :  { %2969 = vmatpush1.bf16.msra.mxu0 %v2730_v27  ;;  %v2747_v27 = vunpack.c.h.s8.bf16 %v2621_v19 }
 0x3f8   :  { %2970 = vmatprep.subr.bf16.mxu0 %v2941_v0  ;;  %v2620_v0 = vld [vmem:[#allocation13 + $0x10] sm:$0xff] }
 0x3f9   :  { %v2746_v45 = vunpack.c.h.s8.bf16 %v2620_v0  ;;  %v2732_v35 = vunpack.c.l.s8.bf16 %v2620_v0 }
 0x3fb   :  { %2971 = vmatpush2.bf16.msra.mxu0 %v2940_v22  ;;  %v2733_v22 = vunpack.c.l.s8.bf16 %v2621_v19 }
 0x3fc   :  { %2972 = vmatprep.subr.bf16.mxu0 %v2927_v31  ;;  %v2719_v31 = vld [vmem:[#allocation13 + $0x328] sm:$0xff] }
 0x3ff   :  { %2973 = vmatpush2.bf16.msra.mxu0 %v2926_v42  ;;  %v2943_v42 = vunpack.c.h.s8.bf16 %v2719_v31 }
 0x400   :  { %2974 = vmatprep.subr.bf16.mxu0 %v2913_v20  ;;  %v2718_v20 = vld [vmem:[#allocation13 + $0x320] sm:$0xff] }
 0x401   :  { %v2942_v37 = vunpack.c.h.s8.bf16 %v2718_v20 }
 0x403   :  { %2975 = vmatpush2.bf16.msra.mxu0 %v2912_v7  ;;  %v2705_v7 = vld [vmem:[#allocation13 + $0x2b8] sm:$0xff] }
 0x404   :  { %2976 = vmatprep.subr.bf16.mxu0 %v2899_v47  ;;  %v2915_v47 = vunpack.c.h.s8.bf16 %v2705_v7 }
 0x407   :  { %2977 = vmatpush2.bf16.msra.mxu0 %v2898_v54 }
 0x40c   :  { %v2259_v61 = vpop.f32.mrf.mxu1 }
 0x40d   :  { %v2260_v17 = vadd.f32 %v2259_v61, %v4086_v32 }
 0x40e   :  { %v2261_v18 = vpop.f32.mrf.mxu1 }
 0x40f   :  { %v2262_v56 = vadd.f32 %v2261_v18, %v4088_v34  ;;  %v2301_v50 = vadd.f32 %v4096_v14, %v2260_v17  ;;  %v2365_v34 = vrot.slane %v4094_v13, %v3959_v49  ;;  %v2885_v18 = vunpack.c.h.s8.bf16 %v4117_v36 }
 0x410   :  { %v2263_v62 = vpop.f32.mrf.mxu1  ;;  %v2929_v17 = vunpack.c.l.s8.bf16 %v2719_v31 }
 0x411   :  { %v2303_v61 = vadd.f32 %v4102_v9, %v2262_v56  ;;  %v4128_v62 = vld [vmem:[#allocation13 + $0x230] sm:$0xff]  ;;  %2978 = vmatprep.subr.bf16.mxu0 %v2885_v18  ;;  %v2928_v56 = vunpack.c.l.s8.bf16 %v2718_v20  ;;  %v2871_v18 = vunpack.c.l.s8.bf16 %v4117_v36 }
 0x412   :  { %v2264_v63 = vpop.f32.mrf.mxu1  ;;  %v2884_v3 = vunpack.c.h.s8.bf16 %v4128_v62  ;;  %v2664_v20 = vld [vmem:[#allocation13 + $0x170] sm:$0xff] }
 0x414   :  { %2979 = vmatpush2.bf16.msra.mxu0 %v2884_v3  ;;  %v2675_v3 = vld [vmem:[#allocation13 + $0x1c8] sm:$0xff] }
 0x415   :  { %2980 = vmatprep.subr.bf16.mxu0 %v2871_v18 }
 0x44c   :  { %v2341_v41 = vpop.f32.mrf.mxu1 }
 0x44d   :  { %v2342_v32 = vadd.f32 %v2341_v41, %v2301_v50  ;;  %v2704_v50 = vld [vmem:[#allocation13 + $0x2b0] sm:$0xff]  ;;  %v2901_v41 = vunpack.c.l.s8.bf16 %v2705_v7 }
 0x44e   :  { %v2343_v14 = vpop.f32.mrf.mxu1  ;;  %v2900_v54 = vunpack.c.l.s8.bf16 %v2704_v50 }
 0x44f   :  { %v2372_v63 = vmul.f32 %v2361_v28, %v2342_v32  ;;  %v2344_v1 = vadd.f32 %v2343_v14, %v2303_v61  ;;  %v2914_v28 = vunpack.c.h.s8.bf16 %v2704_v50  ;;  %v2690_v61 = vld [vmem:[#allocation13 + $0x240] sm:$0xff] }
 0x450   :  { %v2345_v55 = vpop.f32.mrf.mxu1 }
 0x451   :  { %v2398_v4 = vadd.f32 %v2387_v40, %v2372_v63  ;;  %v2373_v9 = vmul.f32 %v2365_v34, %v2344_v1  ;;  %v2691_v40 = vld [vmem:[#allocation13 + $0x248] sm:$0xff]  ;;  %v2886_v34 = vunpack.c.h.s8.bf16 %v2690_v61  ;;  %v2870_v1 = vunpack.c.l.s8.bf16 %v4128_v62 }
 0x452   :  { %v2346_v5 = vpop.f32.mrf.mxu1  ;;  %v2887_v32 = vunpack.c.h.s8.bf16 %v2691_v40  ;;  %v2873_v14 = vunpack.c.l.s8.bf16 %v2691_v40  ;;  %v2843_v62 = vunpack.c.l.s8.bf16 %v2675_v3  ;;  %v2651_v40 = vld [vmem:[#allocation13 + $0x108] sm:$0xff] }
 0x453   :  { %v2399_v13 = vadd.f32 %v2391_v2, %v2373_v9  ;;  %v2402_v6 = vmax.f32 %v2398_v4, 0.0  ;;  %v2872_v2 = vunpack.c.l.s8.bf16 %v2690_v61  ;;  %2981 = vmatpush2.bf16.msra.mxu0 %v2870_v1  ;;  %v2677_v4 = vld [vmem:[#allocation13 + $0x1d8] sm:$0xff]  ;;  %v2857_v9 = vunpack.c.h.s8.bf16 %v2675_v3 }
 0x454   :  { %v2859_v5 = vunpack.c.h.s8.bf16 %v2677_v4 }
 0x455   :  { %v2403_v58 = vmax.f32 %v2399_v13, 0.0  ;;  %v2406_v53 = vpack.c.bf16 %v2402_v6, %v2402_v6  ;;  %v2674_v13 = vld [vmem:[#allocation13 + $0x1c0] sm:$0xff]  ;;  %v2676_v6 = vld [vmem:[#allocation13 + $0x1d0] sm:$0xff]  ;;  %2982 = vmatprep.subr.bf16.mxu0 %v2857_v9  ;;  %v2639_v9 = vld [vmem:[#allocation13 + $0xa8] sm:$0xff] }
 0x457   :  { %v2407_v10 = vpack.c.bf16 %v2403_v58, %v2403_v58  ;;  %v2856_v58 = vunpack.c.h.s8.bf16 %v2674_v13 }
 0x459   :  { %2577 = vmatprep.mubr.bf16.mxu1 %v2407_v10  ;;  %v2858_v10 = vunpack.c.h.s8.bf16 %v2676_v6  ;;  %2983 = vmatpush2.bf16.msra.mxu0 %v2856_v58  ;;  %v2636_v58 = vld [vmem:[#allocation13 + $0x90] sm:$0xff] }
 0x45a   :  { %2578 = vmatmul.mubr.bf16.vlgmr.msra.gmra.mxu1 %v2406_v53  ;;  %v2842_v53 = vunpack.c.l.s8.bf16 %v2674_v13  ;;  %2984 = vmatprep.subr.bf16.mxu0 %v2843_v62 }
 0x45b   :  { %2996 = vmatpush1.bf16.msra.mxu1 %v2830_v57  ;;  %v2845_v57 = vunpack.c.l.s8.bf16 %v2677_v4  ;;  %v2637_v4 = vld [vmem:[#allocation13 + $0x98] sm:$0xff] }
 0x45c   :  { %2997 = vmatprep.subr.bf16.mxu1 %v2817_v38  ;;  %v2844_v38 = vunpack.c.l.s8.bf16 %v2676_v6  ;;  %v2777_v6 = vunpack.c.h.s8.bf16 %v2637_v4 }
 0x45d   :  { %2985 = vmatpush2.bf16.msra.mxu0 %v2842_v53  ;;  %v2765_v53 = vunpack.c.l.s8.bf16 %v2639_v9 }
 0x45f   :  { %2998 = vmatpush1.bf16.msra.mxu1 %v2816_v11  ;;  %v2667_v11 = vld [vmem:[#allocation13 + $0x188] sm:$0xff] }
 0x460   :  { %2999 = vmatprep.subr.bf16.mxu1 %v2803_v23  ;;  %v2833_v23 = vunpack.c.h.s8.bf16 %v2665_v15  ;;  %v2835_v12 = vunpack.c.h.s8.bf16 %v2667_v11 }
 0x462   :  { %3036 = vmatprep.subr.bf16.mxu0 %v2833_v23 }
 0x463   :  { %3000 = vmatpush1.bf16.msra.mxu1 %v2802_v16  ;;  %v2586_v16 = vld [vmem:[%s4221_s8] sm:$0x3] }
 0x464   :  { %3001 = vmatprep.subr.bf16.mxu1 %v2789_v33  ;;  %v2600_v33 = vld [vmem:[#allocation11] sm:$0x3]  ;;  %v2591_v24 = vrot.slane %v2586_v16, %v3956_v44 }
 0x465   :  { %v2605_v48 = vrot.slane %v2600_v33, %v3956_v44 }
 0x467   :  { %3002 = vmatpush1.bf16.msra.mxu1 %v2788_v29 }
 0x468   :  { %3003 = vmatprep.subr.bf16.mxu1 %v2775_v21 }
 0x46b   :  { %3004 = vmatpush1.bf16.msra.mxu1 %v2774_v46  ;;  %v2595_v46 = vrot.slane %v2586_v16, %v3923_v51 }
 0x46c   :  { %3005 = vmatprep.subr.bf16.mxu1 %v2761_v39 }
 0x46f   :  { %3006 = vmatpush1.bf16.msra.mxu1 %v2760_v25 }
 0x470   :  { %3007 = vmatprep.subr.bf16.mxu1 %v2747_v27  ;;  %v2609_v27 = vrot.slane %v2600_v33, %v3923_v51  ;;  %v2622_v33 = vld [vmem:[#allocation13 + $0x20] sm:$0xff] }
 0x473   :  { %3008 = vmatpush1.bf16.msra.mxu1 %v2746_v45 }
 0x474   :  { %3009 = vmatprep.subr.bf16.mxu1 %v2733_v22 }
 0x477   :  { %3010 = vmatpush1.bf16.msra.mxu1 %v2732_v35 }
 0x478   :  { %3011 = vmatprep.subr.bf16.mxu1 %v2943_v42 }
 0x47b   :  { %3012 = vmatpush2.bf16.msra.mxu1 %v2942_v37  ;;  %v2666_v37 = vld [vmem:[#allocation13 + $0x180] sm:$0xff] }
 0x47c   :  { %3013 = vmatprep.subr.bf16.mxu1 %v2929_v17  ;;  %v2820_v61 = vunpack.c.l.s8.bf16 %v2666_v37 }
 0x47f   :  { %3014 = vmatpush2.bf16.msra.mxu1 %v2928_v56  ;;  %v2832_v56 = vunpack.c.h.s8.bf16 %v2664_v20 }
 0x480   :  { %3015 = vmatprep.subr.bf16.mxu1 %v2915_v47  ;;  %v2834_v47 = vunpack.c.h.s8.bf16 %v2666_v37 }
 0x483   :  { %3016 = vmatpush2.bf16.msra.mxu1 %v2914_v28  ;;  %v2819_v28 = vunpack.c.l.s8.bf16 %v2665_v15  ;;  %v2625_v15 = vld [vmem:[#allocation13 + $0x38] sm:$0xff] }
 0x484   :  { %3017 = vmatprep.subr.bf16.mxu1 %v2901_v41  ;;  %v2821_v41 = vunpack.c.l.s8.bf16 %v2667_v11  ;;  %v2762_v11 = vunpack.c.l.s8.bf16 %v2636_v58  ;;  %v2751_v16 = vunpack.c.h.s8.bf16 %v2625_v15 }
 0x487   :  { %3018 = vmatpush2.bf16.msra.mxu1 %v2900_v54  ;;  %v2653_v54 = vld [vmem:[#allocation13 + $0x118] sm:$0xff] }
 0x488   :  { %3019 = vmatprep.subr.bf16.mxu1 %v2887_v32  ;;  %v2818_v32 = vunpack.c.l.s8.bf16 %v2664_v20  ;;  %v2807_v18 = vunpack.c.h.s8.bf16 %v2653_v54  ;;  %v2793_v3 = vunpack.c.l.s8.bf16 %v2653_v54  ;;  %v2706_v54 = vld [vmem:[#allocation13 + $0x2c0] sm:$0xff] }
 0x48b   :  { %3020 = vmatpush2.bf16.msra.mxu1 %v2886_v34  ;;  %v2805_v34 = vunpack.c.h.s8.bf16 %v2651_v40 }
 0x48c   :  { %3021 = vmatprep.subr.bf16.mxu1 %v2873_v14  ;;  %v2650_v14 = vld [vmem:[#allocation13 + $0x100] sm:$0xff] }
 0x48d   :  { %v2804_v1 = vunpack.c.h.s8.bf16 %v2650_v14 }
 0x48f   :  { %3022 = vmatpush2.bf16.msra.mxu1 %v2872_v2 }
 0x490   :  { %3023 = vmatprep.subr.bf16.mxu1 %v2859_v5  ;;  %v2790_v5 = vunpack.c.l.s8.bf16 %v2650_v14 }
 0x493   :  { %3024 = vmatpush2.bf16.msra.mxu1 %v2858_v10  ;;  %v2638_v10 = vld [vmem:[#allocation13 + $0xa0] sm:$0xff] }
 0x494   :  { %3025 = vmatprep.subr.bf16.mxu1 %v2845_v57  ;;  %v2778_v62 = vunpack.c.h.s8.bf16 %v2638_v10  ;;  %v2763_v57 = vunpack.c.l.s8.bf16 %v2637_v4  ;;  %v2764_v23 = vunpack.c.l.s8.bf16 %v2638_v10  ;;  %v2679_v10 = vld [vmem:[#allocation13 + $0x1e8] sm:$0xff] }
 0x497   :  { %3026 = vmatpush2.bf16.msra.mxu1 %v2844_v38  ;;  %v2623_v38 = vld [vmem:[#allocation13 + $0x28] sm:$0xff] }
 0x498   :  { %3077 = vmatprep.subr.bf16.mxu1 %v2835_v12  ;;  %v2749_v12 = vunpack.c.h.s8.bf16 %v2623_v38 }
 0x49a   :  { %v2538_v63 = vpop.f32.mrf.mxu0 }
 0x49c   :  { %v2540_v55 = vpop.f32.mrf.mxu0 }
 0x49e   :  { %v2542_v8 = vpop.f32.mrf.mxu0 }
 0x49f   :  { %v2779_v8 = vunpack.c.h.s8.bf16 %v2639_v9  ;;  %v2692_v9 = vld [vmem:[#allocation13 + $0x250] sm:$0xff] }
 0x4a0   :  { %v2543_v36 = vpop.f32.mrf.mxu0 }
 0x4a1   :  { %v2776_v36 = vunpack.c.h.s8.bf16 %v2636_v58 }
 0x51a   :  { %v2579_v29 = vpop.f32.mrf.mxu1 }
 0x51b   :  { %v2580_v21 = vadd.f32 %v2579_v29, %v2538_v63  ;;  %v2652_v63 = vld [vmem:[#allocation13 + $0x110] sm:$0xff]  ;;  %v2748_v29 = vunpack.c.h.s8.bf16 %v2622_v33 }
 0x51c   :  { %v2581_v39 = vpop.f32.mrf.mxu1  ;;  %v2806_v2 = vunpack.c.h.s8.bf16 %v2652_v63  ;;  %v2792_v13 = vunpack.c.l.s8.bf16 %v2652_v63  ;;  %v2693_v63 = vld [vmem:[#allocation13 + $0x258] sm:$0xff] }
 0x51d   :  { %v2598_v19 = vmul.f32 %v2591_v24, %v2580_v21  ;;  %v2582_v25 = vadd.f32 %v2581_v39, %v2540_v55  ;;  %v2791_v55 = vunpack.c.l.s8.bf16 %v2651_v40  ;;  %v2624_v24 = vld [vmem:[#allocation13 + $0x30] sm:$0xff]  ;;  %v2721_v39 = vld [vmem:[#allocation13 + $0x338] sm:$0xff] }
 0x51e   :  { %v2583_v0 = vpop.f32.mrf.mxu1  ;;  %v2750_v21 = vunpack.c.h.s8.bf16 %v2624_v24  ;;  %v2931_v20 = vunpack.c.l.s8.bf16 %v2721_v39 }
 0x51f   :  { %v2612_v45 = vadd.f32 %v2605_v48, %v2598_v19  ;;  %v2599_v22 = vmul.f32 %v2595_v46, %v2582_v25  ;;  %v2735_v48 = vunpack.c.l.s8.bf16 %v2623_v38  ;;  %v2737_v46 = vunpack.c.l.s8.bf16 %v2625_v15  ;;  %v2723_v19 = vld [vmem:[#allocation13 + $0x348] sm:$0xff]  ;;  %v2678_v15 = vld [vmem:[#allocation13 + $0x1e0] sm:$0xff] }
 0x520   :  { %v2584_v31 = vpop.f32.mrf.mxu1  ;;  %v2734_v25 = vunpack.c.l.s8.bf16 %v2622_v33  ;;  %v2945_v0 = vunpack.c.h.s8.bf16 %v2721_v39  ;;  %v2933_v37 = vunpack.c.l.s8.bf16 %v2723_v19 }
 0x521   :  { %v2613_v35 = vadd.f32 %v2609_v27, %v2599_v22  ;;  %v2614_v42 = vmax.f32 %v2612_v45, 0.0  ;;  %v2736_v27 = vunpack.c.l.s8.bf16 %v2624_v24  ;;  %v2947_v45 = vunpack.c.h.s8.bf16 %v2723_v19  ;;  %v2720_v22 = vld [vmem:[#allocation13 + $0x330] sm:$0xff]  ;;  %v2722_v31 = vld [vmem:[#allocation13 + $0x340] sm:$0xff]  ;;  %v2669_v24 = vld [vmem:[#allocation13 + $0x198] sm:$0xff] }
 0x522   :  { %v2668_v19 = vld [vmem:[#allocation13 + $0x190] sm:$0xff] }
 0x523   :  { %v2615_v17 = vmax.f32 %v2613_v35, 0.0  ;;  %v4145_v50 = vpack.c.bf16 %v2614_v42, %v2614_v42  ;;  %v2944_v35 = vunpack.c.h.s8.bf16 %v2720_v22  ;;  %v2946_v42 = vunpack.c.h.s8.bf16 %v2722_v31 }
 0x525   :  { %v4143_v7 = vpack.c.bf16 %v2615_v17, %v2615_v17  ;;  %v2707_v17 = vld [vmem:[#allocation13 + $0x2c8] sm:$0xff] }
 0x527   :  { %2986 = vmatprep.mubr.bf16.mxu0 %v4143_v7  ;;  %3027 = vmatprep.mubr.bf16.mxu1 %v4143_v7 }
 0x528   :  { %2987 = vmatmul.mubr.bf16.vlgmr.msra.gmra.mxu0 %v4145_v50  ;;  %3028 = vmatmul.mubr.bf16.vlgmr.msra.gmra.mxu1 %v4145_v50 }
 0x529   :  { %3037 = vmatpush1.bf16.msra.mxu0 %v2832_v56  ;;  %3078 = vmatpush1.bf16.msra.mxu1 %v2834_v47  ;;  %v2709_v56 = vld [vmem:[#allocation13 + $0x2d8] sm:$0xff]  ;;  %v2930_v47 = vunpack.c.l.s8.bf16 %v2720_v22 }
 0x52a   :  { %3068 = vmatprep.mubr.bf16.mxu0 %v4143_v7  ;;  %3109 = vmatprep.mubr.bf16.mxu1 %v4143_v7  ;;  %v2919_v40 = vunpack.c.h.s8.bf16 %v2709_v56  ;;  %v2905_v14 = vunpack.c.l.s8.bf16 %v2709_v56 }
 0x52b   :  { %3038 = vmatprep.subr.bf16.mxu0 %v2819_v28  ;;  %3079 = vmatprep.subr.bf16.mxu1 %v2821_v41  ;;  %v2932_v28 = vunpack.c.l.s8.bf16 %v2722_v31  ;;  %v2917_v41 = vunpack.c.h.s8.bf16 %v2707_v17  ;;  %v2655_v31 = vld [vmem:[#allocation13 + $0x128] sm:$0xff] }
 0x52d   :  { %3039 = vmatpush1.bf16.msra.mxu0 %v2818_v32  ;;  %3080 = vmatpush1.bf16.msra.mxu1 %v2820_v61  ;;  %v2708_v32 = vld [vmem:[#allocation13 + $0x2d0] sm:$0xff]  ;;  %v2916_v61 = vunpack.c.h.s8.bf16 %v2706_v54 }
 0x52e   :  { %3040 = vmatprep.subr.bf16.mxu0 %v2805_v34  ;;  %3081 = vmatprep.subr.bf16.mxu1 %v2807_v18  ;;  %v2918_v34 = vunpack.c.h.s8.bf16 %v2708_v32  ;;  %v2903_v18 = vunpack.c.l.s8.bf16 %v2707_v17  ;;  %v2654_v17 = vld [vmem:[#allocation13 + $0x120] sm:$0xff] }
 0x531   :  { %3041 = vmatpush1.bf16.msra.mxu0 %v2804_v1  ;;  %3082 = vmatpush1.bf16.msra.mxu1 %v2806_v2  ;;  %v2695_v1 = vld [vmem:[#allocation13 + $0x268] sm:$0xff]  ;;  %v2902_v2 = vunpack.c.l.s8.bf16 %v2706_v54 }
 0x532   :  { %3042 = vmatprep.subr.bf16.mxu0 %v2791_v55  ;;  %3083 = vmatprep.subr.bf16.mxu1 %v2793_v3  ;;  %v2904_v55 = vunpack.c.l.s8.bf16 %v2708_v32  ;;  %v2889_v3 = vunpack.c.h.s8.bf16 %v2693_v63  ;;  %v2891_v4 = vunpack.c.h.s8.bf16 %v2695_v1  ;;  %v2877_v58 = vunpack.c.l.s8.bf16 %v2695_v1  ;;  %v2641_v32 = vld [vmem:[#allocation13 + $0xb8] sm:$0xff] }
 0x535   :  { %3043 = vmatpush1.bf16.msra.mxu0 %v2790_v5  ;;  %3084 = vmatpush1.bf16.msra.mxu1 %v2792_v13  ;;  %v2694_v5 = vld [vmem:[#allocation13 + $0x260] sm:$0xff]  ;;  %v2888_v13 = vunpack.c.h.s8.bf16 %v2692_v9 }
 0x536   :  { %3044 = vmatprep.subr.bf16.mxu0 %v2777_v6  ;;  %3085 = vmatprep.subr.bf16.mxu1 %v2779_v8  ;;  %v2890_v6 = vunpack.c.h.s8.bf16 %v2694_v5  ;;  %v2875_v8 = vunpack.c.l.s8.bf16 %v2693_v63  ;;  %v2640_v63 = vld [vmem:[#allocation13 + $0xb0] sm:$0xff] }
 0x539   :  { %3045 = vmatpush1.bf16.msra.mxu0 %v2776_v36  ;;  %3086 = vmatpush1.bf16.msra.mxu1 %v2778_v62  ;;  %v2681_v36 = vld [vmem:[#allocation13 + $0x1f8] sm:$0xff]  ;;  %v2874_v62 = vunpack.c.l.s8.bf16 %v2692_v9 }
 0x53a   :  { %3046 = vmatprep.subr.bf16.mxu0 %v2763_v57  ;;  %3087 = vmatprep.subr.bf16.mxu1 %v2765_v53  ;;  %v2876_v57 = vunpack.c.l.s8.bf16 %v2694_v5  ;;  %v2861_v53 = vunpack.c.h.s8.bf16 %v2679_v10  ;;  %v2863_v38 = vunpack.c.h.s8.bf16 %v2681_v36  ;;  %v2849_v33 = vunpack.c.l.s8.bf16 %v2681_v36  ;;  %v2627_v5 = vld [vmem:[#allocation13 + $0x48] sm:$0xff] }
 0x53d   :  { %3047 = vmatpush1.bf16.msra.mxu0 %v2762_v11  ;;  %3088 = vmatpush1.bf16.msra.mxu1 %v2764_v23  ;;  %v2680_v11 = vld [vmem:[#allocation13 + $0x1f0] sm:$0xff]  ;;  %v2860_v23 = vunpack.c.h.s8.bf16 %v2678_v15 }
 0x53e   :  { %3048 = vmatprep.subr.bf16.mxu0 %v2749_v12  ;;  %3089 = vmatprep.subr.bf16.mxu1 %v2751_v16  ;;  %v2862_v12 = vunpack.c.h.s8.bf16 %v2680_v11  ;;  %v2847_v16 = vunpack.c.l.s8.bf16 %v2679_v10  ;;  %v2626_v10 = vld [vmem:[#allocation13 + $0x40] sm:$0xff] }
 0x541   :  { %3049 = vmatpush1.bf16.msra.mxu0 %v2748_v29  ;;  %3090 = vmatpush1.bf16.msra.mxu1 %v2750_v21  ;;  %v2671_v29 = vld [vmem:[#allocation13 + $0x1a8] sm:$0xff]  ;;  %v2846_v21 = vunpack.c.l.s8.bf16 %v2678_v15 }
 0x542   :  { %3050 = vmatprep.subr.bf16.mxu0 %v2735_v48  ;;  %3091 = vmatprep.subr.bf16.mxu1 %v2737_v46  ;;  %v2848_v48 = vunpack.c.l.s8.bf16 %v2680_v11  ;;  %v2837_v46 = vunpack.c.h.s8.bf16 %v2669_v24  ;;  %v2839_v39 = vunpack.c.h.s8.bf16 %v2671_v29  ;;  %v2825_v22 = vunpack.c.l.s8.bf16 %v2671_v29  ;;  %v2725_v11 = vld [vmem:[#allocation13 + $0x358] sm:$0xff] }
 0x545   :  { %3051 = vmatpush1.bf16.msra.mxu0 %v2734_v25  ;;  %3092 = vmatpush1.bf16.msra.mxu1 %v2736_v27  ;;  %v2670_v25 = vld [vmem:[#allocation13 + $0x1a0] sm:$0xff]  ;;  %v2836_v27 = vunpack.c.h.s8.bf16 %v2668_v19 }
 0x546   :  { %3052 = vmatprep.subr.bf16.mxu0 %v2945_v0  ;;  %3093 = vmatprep.subr.bf16.mxu1 %v2947_v45  ;;  %v2838_v0 = vunpack.c.h.s8.bf16 %v2670_v25  ;;  %v2823_v45 = vunpack.c.l.s8.bf16 %v2669_v24  ;;  %v2724_v24 = vld [vmem:[#allocation13 + $0x350] sm:$0xff] }
 0x549   :  { %3053 = vmatpush2.bf16.msra.mxu0 %v2944_v35  ;;  %3094 = vmatpush2.bf16.msra.mxu1 %v2946_v42  ;;  %v2657_v35 = vld [vmem:[#allocation13 + $0x138] sm:$0xff]  ;;  %v2822_v42 = vunpack.c.l.s8.bf16 %v2668_v19 }
 0x54a   :  { %3054 = vmatprep.subr.bf16.mxu0 %v2931_v20  ;;  %3095 = vmatprep.subr.bf16.mxu1 %v2933_v37  ;;  %v2824_v20 = vunpack.c.l.s8.bf16 %v2670_v25  ;;  %v2809_v37 = vunpack.c.h.s8.bf16 %v2655_v31  ;;  %v2811_v56 = vunpack.c.h.s8.bf16 %v2657_v35  ;;  %v2797_v54 = vunpack.c.l.s8.bf16 %v2657_v35  ;;  %v2711_v25 = vld [vmem:[#allocation13 + $0x2e8] sm:$0xff] }
 0x54d   :  { %3055 = vmatpush2.bf16.msra.mxu0 %v2930_v47  ;;  %3096 = vmatpush2.bf16.msra.mxu1 %v2932_v28  ;;  %v2656_v47 = vld [vmem:[#allocation13 + $0x130] sm:$0xff]  ;;  %v2808_v28 = vunpack.c.h.s8.bf16 %v2654_v17 }
 0x54e   :  { %3056 = vmatprep.subr.bf16.mxu0 %v2917_v41  ;;  %3097 = vmatprep.subr.bf16.mxu1 %v2919_v40  ;;  %v2810_v41 = vunpack.c.h.s8.bf16 %v2656_v47  ;;  %v2795_v40 = vunpack.c.l.s8.bf16 %v2655_v31  ;;  %v2710_v31 = vld [vmem:[#allocation13 + $0x2e0] sm:$0xff] }
 0x551   :  { %3057 = vmatpush2.bf16.msra.mxu0 %v2916_v61  ;;  %3098 = vmatpush2.bf16.msra.mxu1 %v2918_v34  ;;  %v2643_v61 = vld [vmem:[#allocation13 + $0xc8] sm:$0xff]  ;;  %v2794_v34 = vunpack.c.l.s8.bf16 %v2654_v17  ;;  %v2907_v17 = vunpack.c.l.s8.bf16 %v2711_v25 }
 0x552   :  { %3058 = vmatprep.subr.bf16.mxu0 %v2903_v18  ;;  %3099 = vmatprep.subr.bf16.mxu1 %v2905_v14  ;;  %v2796_v18 = vunpack.c.l.s8.bf16 %v2656_v47  ;;  %v2781_v14 = vunpack.c.h.s8.bf16 %v2641_v32  ;;  %v2783_v1 = vunpack.c.h.s8.bf16 %v2643_v61  ;;  %v2769_v9 = vunpack.c.l.s8.bf16 %v2643_v61  ;;  %v2697_v47 = vld [vmem:[#allocation13 + $0x278] sm:$0xff] }
 0x555   :  { %3059 = vmatpush2.bf16.msra.mxu0 %v2902_v2  ;;  %3100 = vmatpush2.bf16.msra.mxu1 %v2904_v55  ;;  %v2642_v2 = vld [vmem:[#allocation13 + $0xc0] sm:$0xff]  ;;  %v2780_v55 = vunpack.c.h.s8.bf16 %v2640_v63 }
 0x556   :  { %3060 = vmatprep.subr.bf16.mxu0 %v2889_v3  ;;  %3101 = vmatprep.subr.bf16.mxu1 %v2891_v4  ;;  %v2782_v3 = vunpack.c.h.s8.bf16 %v2642_v2  ;;  %v2767_v4 = vunpack.c.l.s8.bf16 %v2641_v32  ;;  %v2696_v32 = vld [vmem:[#allocation13 + $0x270] sm:$0xff] }
 0x559   :  { %3061 = vmatpush2.bf16.msra.mxu0 %v2888_v13  ;;  %3102 = vmatpush2.bf16.msra.mxu1 %v2890_v6  ;;  %v2629_v13 = vld [vmem:[#allocation13 + $0x58] sm:$0xff]  ;;  %v2766_v6 = vunpack.c.l.s8.bf16 %v2640_v63  ;;  %v2879_v63 = vunpack.c.l.s8.bf16 %v2697_v47 }
 0x55a   :  { %3062 = vmatprep.subr.bf16.mxu0 %v2875_v8  ;;  %3103 = vmatprep.subr.bf16.mxu1 %v2877_v58  ;;  %v2768_v8 = vunpack.c.l.s8.bf16 %v2642_v2  ;;  %v2753_v58 = vunpack.c.h.s8.bf16 %v2627_v5  ;;  %v2755_v36 = vunpack.c.h.s8.bf16 %v2629_v13  ;;  %v2741_v15 = vunpack.c.l.s8.bf16 %v2629_v13  ;;  %v2683_v2 = vld [vmem:[#allocation13 + $0x208] sm:$0xff] }
 0x55d   :  { %3063 = vmatpush2.bf16.msra.mxu0 %v2874_v62  ;;  %3104 = vmatpush2.bf16.msra.mxu1 %v2876_v57  ;;  %v2628_v62 = vld [vmem:[#allocation13 + $0x50] sm:$0xff]  ;;  %v2752_v57 = vunpack.c.h.s8.bf16 %v2626_v10 }
 0x55e   :  { %3064 = vmatprep.subr.bf16.mxu0 %v2861_v53  ;;  %3105 = vmatprep.subr.bf16.mxu1 %v2863_v38  ;;  %v2754_v53 = vunpack.c.h.s8.bf16 %v2628_v62  ;;  %v2739_v38 = vunpack.c.l.s8.bf16 %v2627_v5  ;;  %v2682_v5 = vld [vmem:[#allocation13 + $0x200] sm:$0xff] }
 0x561   :  { %3065 = vmatpush2.bf16.msra.mxu0 %v2860_v23  ;;  %3106 = vmatpush2.bf16.msra.mxu1 %v2862_v12  ;;  %v2727_v23 = vld [vmem:[#allocation13 + $0x368] sm:$0xff]  ;;  %v2738_v12 = vunpack.c.l.s8.bf16 %v2626_v10  ;;  %v2851_v10 = vunpack.c.l.s8.bf16 %v2683_v2 }
 0x562   :  { %3066 = vmatprep.subr.bf16.mxu0 %v2847_v16  ;;  %3107 = vmatprep.subr.bf16.mxu1 %v2849_v33  ;;  %v2740_v16 = vunpack.c.l.s8.bf16 %v2628_v62  ;;  %v2949_v33 = vunpack.c.h.s8.bf16 %v2725_v11  ;;  %v2951_v29 = vunpack.c.h.s8.bf16 %v2727_v23  ;;  %v2937_v19 = vunpack.c.l.s8.bf16 %v2727_v23  ;;  %v2673_v62 = vld [vmem:[#allocation13 + $0x1b8] sm:$0xff] }
 0x563   :  { %v2827_v23 = vunpack.c.l.s8.bf16 %v2673_v62 }
 0x565   :  { %3067 = vmatpush2.bf16.msra.mxu0 %v2846_v21  ;;  %3108 = vmatpush2.bf16.msra.mxu1 %v2848_v48  ;;  %v2726_v21 = vld [vmem:[#allocation13 + $0x360] sm:$0xff]  ;;  %v2948_v48 = vunpack.c.h.s8.bf16 %v2724_v24 }
 0x566   :  { %3118 = vmatprep.subr.bf16.mxu0 %v2837_v46  ;;  %3159 = vmatprep.subr.bf16.mxu1 %v2839_v39  ;;  %v2950_v46 = vunpack.c.h.s8.bf16 %v2726_v21  ;;  %v2935_v39 = vunpack.c.l.s8.bf16 %v2725_v11 }
 0x568   :  { %3069 = vmatmul.mubr.bf16.vlgmr.msra.gmra.mxu0 %v4145_v50  ;;  %3110 = vmatmul.mubr.bf16.vlgmr.msra.gmra.mxu1 %v4145_v50 }
 0x569   :  { %3119 = vmatpush1.bf16.msra.mxu0 %v2836_v27  ;;  %3150 = vmatprep.mubr.bf16.mxu0 %v4143_v7  ;;  %v2713_v27 = vld [vmem:[#allocation13 + $0x2f8] sm:$0xff] }
 0x56a   :  { %3160 = vmatpush1.bf16.msra.mxu1 %v2838_v0  ;;  %3191 = vmatprep.mubr.bf16.mxu1 %v4143_v7  ;;  %v2934_v0 = vunpack.c.l.s8.bf16 %v2724_v24  ;;  %v2923_v35 = vunpack.c.h.s8.bf16 %v2713_v27  ;;  %v2658_v24 = vld [vmem:[#allocation13 + $0x140] sm:$0xff] }
 0x56b   :  { %3120 = vmatprep.subr.bf16.mxu0 %v2823_v45  ;;  %3161 = vmatprep.subr.bf16.mxu1 %v2825_v22  ;;  %v2936_v45 = vunpack.c.l.s8.bf16 %v2726_v21  ;;  %v2921_v22 = vunpack.c.h.s8.bf16 %v2711_v25 }
 0x56d   :  { %3121 = vmatpush1.bf16.msra.mxu0 %v2822_v42  ;;  %v2712_v42 = vld [vmem:[#allocation13 + $0x2f0] sm:$0xff] }
 0x56e   :  { %3162 = vmatpush1.bf16.msra.mxu1 %v2824_v20  ;;  %3122 = vmatprep.subr.bf16.mxu0 %v2809_v37  ;;  %v2920_v20 = vunpack.c.h.s8.bf16 %v2710_v31  ;;  %v2922_v37 = vunpack.c.h.s8.bf16 %v2712_v42 }
 0x56f   :  { %3163 = vmatprep.subr.bf16.mxu1 %v2811_v56  ;;  %v2909_v56 = vunpack.c.l.s8.bf16 %v2713_v27 }
 0x571   :  { %3123 = vmatpush1.bf16.msra.mxu0 %v2808_v28  ;;  %v2699_v28 = vld [vmem:[#allocation13 + $0x288] sm:$0xff] }
 0x572   :  { %3164 = vmatpush1.bf16.msra.mxu1 %v2810_v41  ;;  %3124 = vmatprep.subr.bf16.mxu0 %v2795_v40  ;;  %v2906_v41 = vunpack.c.l.s8.bf16 %v2710_v31  ;;  %v2908_v40 = vunpack.c.l.s8.bf16 %v2712_v42  ;;  %v2895_v61 = vunpack.c.h.s8.bf16 %v2699_v28  ;;  %v2729_v42 = vld [vmem:[#allocation13 + $0x378] sm:$0xff] }
 0x573   :  { %3165 = vmatprep.subr.bf16.mxu1 %v2797_v54  ;;  %v2893_v54 = vunpack.c.h.s8.bf16 %v2697_v47  ;;  %v2939_v47 = vunpack.c.l.s8.bf16 %v2729_v42 }
 0x575   :  { %3125 = vmatpush1.bf16.msra.mxu0 %v2794_v34  ;;  %v2698_v34 = vld [vmem:[#allocation13 + $0x280] sm:$0xff] }
 0x576   :  { %3166 = vmatpush1.bf16.msra.mxu1 %v2796_v18  ;;  %3126 = vmatprep.subr.bf16.mxu0 %v2781_v14  ;;  %v2892_v18 = vunpack.c.h.s8.bf16 %v2696_v32  ;;  %v2894_v14 = vunpack.c.h.s8.bf16 %v2698_v34 }
 0x577   :  { %3167 = vmatprep.subr.bf16.mxu1 %v2783_v1  ;;  %v2881_v1 = vunpack.c.l.s8.bf16 %v2699_v28  ;;  %v2715_v28 = vld [vmem:[#allocation13 + $0x308] sm:$0xff] }
 0x579   :  { %3127 = vmatpush1.bf16.msra.mxu0 %v2780_v55  ;;  %v2685_v55 = vld [vmem:[#allocation13 + $0x218] sm:$0xff] }
 0x57a   :  { %3168 = vmatpush1.bf16.msra.mxu1 %v2782_v3  ;;  %3128 = vmatprep.subr.bf16.mxu0 %v2767_v4  ;;  %v2878_v3 = vunpack.c.l.s8.bf16 %v2696_v32  ;;  %v2880_v4 = vunpack.c.l.s8.bf16 %v2698_v34  ;;  %v2867_v13 = vunpack.c.h.s8.bf16 %v2685_v55  ;;  %v2701_v34 = vld [vmem:[#allocation13 + $0x298] sm:$0xff] }
 0x57b   :  { %3169 = vmatprep.subr.bf16.mxu1 %v2769_v9  ;;  %v2865_v9 = vunpack.c.h.s8.bf16 %v2683_v2  ;;  %v2883_v2 = vunpack.c.l.s8.bf16 %v2701_v34 }
 0x57d   :  { %3129 = vmatpush1.bf16.msra.mxu0 %v2766_v6  ;;  %v2684_v6 = vld [vmem:[#allocation13 + $0x210] sm:$0xff] }
 0x57e   :  { %3170 = vmatpush1.bf16.msra.mxu1 %v2768_v8  ;;  %3130 = vmatprep.subr.bf16.mxu0 %v2753_v58  ;;  %v2864_v8 = vunpack.c.h.s8.bf16 %v2682_v5  ;;  %v2866_v58 = vunpack.c.h.s8.bf16 %v2684_v6 }
 0x57f   :  { %3171 = vmatprep.subr.bf16.mxu1 %v2755_v36  ;;  %v2853_v36 = vunpack.c.l.s8.bf16 %v2685_v55  ;;  %v2687_v55 = vld [vmem:[#allocation13 + $0x228] sm:$0xff] }
 0x581   :  { %3131 = vmatpush1.bf16.msra.mxu0 %v2752_v57  ;;  %v2850_v57 = vunpack.c.l.s8.bf16 %v2682_v5 }
 0x582   :  { %3172 = vmatpush1.bf16.msra.mxu1 %v2754_v53  ;;  %3132 = vmatprep.subr.bf16.mxu0 %v2739_v38  ;;  %v2852_v53 = vunpack.c.l.s8.bf16 %v2684_v6  ;;  %v2841_v38 = vunpack.c.h.s8.bf16 %v2673_v62  ;;  %v3329_v62 = vld [vmem:[%s4225_s12] sm:$0xff] }
 0x583   :  { %3173 = vmatprep.subr.bf16.mxu1 %v2741_v15  ;;  %v2672_v15 = vld [vmem:[#allocation13 + $0x1b0] sm:$0xff] }
 0x584   :  { %v2840_v11 = vunpack.c.h.s8.bf16 %v2672_v15 }
 0x585   :  { %3133 = vmatpush1.bf16.msra.mxu0 %v2738_v12  ;;  %v2659_v12 = vld [vmem:[#allocation13 + $0x148] sm:$0xff] }
 0x586   :  { %3174 = vmatpush1.bf16.msra.mxu1 %v2740_v16  ;;  %3134 = vmatprep.subr.bf16.mxu0 %v2949_v33  ;;  %v2826_v16 = vunpack.c.l.s8.bf16 %v2672_v15  ;;  %v2813_v33 = vunpack.c.h.s8.bf16 %v2659_v12  ;;  %v2799_v21 = vunpack.c.l.s8.bf16 %v2659_v12  ;;  %v3344_v12 = vrot.slane %v3329_v62, %v3988_v59 }
 0x587   :  { %3175 = vmatprep.subr.bf16.mxu1 %v2951_v29  ;;  %v2812_v29 = vunpack.c.h.s8.bf16 %v2658_v24 }
 0x589   :  { %3135 = vmatpush2.bf16.msra.mxu0 %v2948_v48  ;;  %v2645_v48 = vld [vmem:[#allocation13 + $0xd8] sm:$0xff] }
 0x58a   :  { %3176 = vmatpush2.bf16.msra.mxu1 %v2950_v46  ;;  %3136 = vmatprep.subr.bf16.mxu0 %v2935_v39  ;;  %v2798_v46 = vunpack.c.l.s8.bf16 %v2658_v24  ;;  %v2785_v39 = vunpack.c.h.s8.bf16 %v2645_v48  ;;  %v2771_v27 = vunpack.c.l.s8.bf16 %v2645_v48 }
 0x58b   :  { %3177 = vmatprep.subr.bf16.mxu1 %v2937_v19  ;;  %v2644_v19 = vld [vmem:[#allocation13 + $0xd0] sm:$0xff] }
 0x58c   :  { %v2784_v25 = vunpack.c.h.s8.bf16 %v2644_v19 }
 0x58d   :  { %3137 = vmatpush2.bf16.msra.mxu0 %v2934_v0  ;;  %v2631_v0 = vld [vmem:[#allocation13 + $0x68] sm:$0xff] }
 0x58e   :  { %3178 = vmatpush2.bf16.msra.mxu1 %v2936_v45  ;;  %3138 = vmatprep.subr.bf16.mxu0 %v2921_v22  ;;  %v2757_v45 = vunpack.c.h.s8.bf16 %v2631_v0  ;;  %v2630_v22 = vld [vmem:[#allocation13 + $0x60] sm:$0xff] }
 0x58f   :  { %3179 = vmatprep.subr.bf16.mxu1 %v2923_v35  ;;  %v2756_v31 = vunpack.c.h.s8.bf16 %v2630_v22  ;;  %v2743_v35 = vunpack.c.l.s8.bf16 %v2631_v0 }
 0x591   :  { %3139 = vmatpush2.bf16.msra.mxu0 %v2920_v20  ;;  %v2742_v20 = vunpack.c.l.s8.bf16 %v2630_v22 }
 0x592   :  { %3180 = vmatpush2.bf16.msra.mxu1 %v2922_v37  ;;  %3140 = vmatprep.subr.bf16.mxu0 %v2907_v17  ;;  %v2953_v37 = vunpack.c.h.s8.bf16 %v2729_v42  ;;  %v2728_v17 = vld [vmem:[#allocation13 + $0x370] sm:$0xff] }
 0x593   :  { %3181 = vmatprep.subr.bf16.mxu1 %v2909_v56  ;;  %v2952_v56 = vunpack.c.h.s8.bf16 %v2728_v17 }
 0x595   :  { %3141 = vmatpush2.bf16.msra.mxu0 %v2906_v41  ;;  %v2938_v41 = vunpack.c.l.s8.bf16 %v2728_v17 }
 0x596   :  { %3182 = vmatpush2.bf16.msra.mxu1 %v2908_v40  ;;  %3142 = vmatprep.subr.bf16.mxu0 %v2893_v54  ;;  %v2925_v40 = vunpack.c.h.s8.bf16 %v2715_v28  ;;  %v2714_v54 = vld [vmem:[#allocation13 + $0x300] sm:$0xff] }
 0x597   :  { %3183 = vmatprep.subr.bf16.mxu1 %v2895_v61  ;;  %v2924_v32 = vunpack.c.h.s8.bf16 %v2714_v54  ;;  %v2911_v61 = vunpack.c.l.s8.bf16 %v2715_v28  ;;  %v3352_v28 = vrot.slane %v3329_v62, %v4000_v43 }
 0x599   :  { %3143 = vmatpush2.bf16.msra.mxu0 %v2892_v18  ;;  %v2910_v18 = vunpack.c.l.s8.bf16 %v2714_v54 }
 0x59a   :  { %3184 = vmatpush2.bf16.msra.mxu1 %v2894_v14  ;;  %3144 = vmatprep.subr.bf16.mxu0 %v2879_v63  ;;  %v2897_v14 = vunpack.c.h.s8.bf16 %v2701_v34  ;;  %v2700_v63 = vld [vmem:[#allocation13 + $0x290] sm:$0xff] }
 0x59b   :  { %3185 = vmatprep.subr.bf16.mxu1 %v2881_v1  ;;  %v2896_v1 = vunpack.c.h.s8.bf16 %v2700_v63 }
 0x59d   :  { %3145 = vmatpush2.bf16.msra.mxu0 %v2878_v3  ;;  %v2882_v3 = vunpack.c.l.s8.bf16 %v2700_v63  ;;  %v3364_v63 = vrot.slane %v3329_v62, %v4051_v30 }
 0x59e   :  { %3186 = vmatpush2.bf16.msra.mxu1 %v2880_v4  ;;  %3146 = vmatprep.subr.bf16.mxu0 %v2865_v9  ;;  %v2869_v4 = vunpack.c.h.s8.bf16 %v2687_v55  ;;  %v2686_v9 = vld [vmem:[#allocation13 + $0x220] sm:$0xff] }
 0x59f   :  { %3187 = vmatprep.subr.bf16.mxu1 %v2867_v13  ;;  %v2868_v5 = vunpack.c.h.s8.bf16 %v2686_v9  ;;  %v2855_v13 = vunpack.c.l.s8.bf16 %v2687_v55  ;;  %v2854_v6 = vunpack.c.l.s8.bf16 %v2686_v9 }
 0x5a1   :  { %3147 = vmatpush2.bf16.msra.mxu0 %v2864_v8  ;;  %v3241_v8 = vld [vmem:[%s4224_s11] sm:$0xff] }
 0x5a2   :  { %3188 = vmatpush2.bf16.msra.mxu1 %v2866_v58  ;;  %3148 = vmatprep.subr.bf16.mxu0 %v2851_v10  ;;  %v3726_v58 = vmov 1983009808   ;;  %v3276_v54 = vrot.slane %v3241_v8, %v4051_v30  ;;  %v3242_v30 = vld [vmem:[%s4224_s11 + $0x8] sm:$0x3f]  ;;  %s3727_s11 = smov [#allocation14]  }
 0x5a3   :  { %3189 = vmatprep.subr.bf16.mxu1 %v2853_v36  ;;  %v3434_v10 = vunpack.c.l.s4 %v3726_v58  ;;  %v3248_v36 = vrot.slane %v3241_v8, %v3956_v44 }
 0x5a5   :  { %3149 = vmatpush2.bf16.msra.mxu0 %v2850_v57  ;;  %v3256_v57 = vrot.slane %v3241_v8, %v3988_v59 }
 0x5a6   :  { %3190 = vmatpush2.bf16.msra.mxu1 %v2852_v53  ;;  %3200 = vmatprep.subr.bf16.mxu0 %v2841_v38  ;;  %v3252_v53 = vrot.slane %v3241_v8, %v3923_v51  ;;  %v3260_v38 = vrot.slane %v3241_v8, %v3959_v49 }
 0x5a8   :  { %3151 = vmatmul.mubr.bf16.vlgmr.msra.gmra.mxu0 %v4145_v50 }
 0x5a9   :  { %3192 = vmatmul.mubr.bf16.vlgmr.msra.gmra.mxu1 %v4145_v50  ;;  %3201 = vmatpush1.bf16.msra.mxu0 %v2840_v11  ;;  %v3336_v11 = vrot.slane %v3329_v62, %v3956_v44 }
 0x5aa   :  { %3232 = vmatprep.mubr.bf16.mxu0 %v4143_v7  ;;  %3202 = vmatprep.subr.bf16.mxu0 %v2827_v23  ;;  %v2770_v7 = vunpack.c.l.s8.bf16 %v2644_v19 }
 0x5ad   :  { %3203 = vmatpush1.bf16.msra.mxu0 %v2826_v16  ;;  %v3435_v16 = vunpack.c.0.s8 %v3434_v10 }
 0x5ae   :  { %3204 = vmatprep.subr.bf16.mxu0 %v2813_v33 }
 0x5b1   :  { %3205 = vmatpush1.bf16.msra.mxu0 %v2812_v29  ;;  %v3340_v29 = vrot.slane %v3329_v62, %v3923_v51 }
 0x5b2   :  { %3206 = vmatprep.subr.bf16.mxu0 %v2799_v21  ;;  %v3348_v21 = vrot.slane %v3329_v62, %v3959_v49 }
 0x5b5   :  { %3207 = vmatpush1.bf16.msra.mxu0 %v2798_v46 }
 0x5b6   :  { %3208 = vmatprep.subr.bf16.mxu0 %v2785_v39 }
 0x5b9   :  { %3209 = vmatpush1.bf16.msra.mxu0 %v2784_v25  ;;  %v4176_v25 = vsub.s32 %v3435_v16, %v3819_v26  ;;  %v3272_v26 = vrot.slane %v3241_v8, %v4048_v60  ;;  %v3292_v16 = vrot.slane %v3242_v30, %v3959_v49 }
 0x5ba   :  { %3210 = vmatprep.subr.bf16.mxu0 %v2771_v27 }
 0x5bd   :  { %3211 = vmatpush1.bf16.msra.mxu0 %v2770_v7 }
 0x5be   :  { %3212 = vmatprep.subr.bf16.mxu0 %v2757_v45 }
 0x5c1   :  { %3213 = vmatpush1.bf16.msra.mxu0 %v2756_v31 }
 0x5c2   :  { %3214 = vmatprep.subr.bf16.mxu0 %v2743_v35 }
 0x5c5   :  { %3215 = vmatpush1.bf16.msra.mxu0 %v2742_v20 }
 0x5c6   :  { %3216 = vmatprep.subr.bf16.mxu0 %v2953_v37 }
 0x5c9   :  { %3217 = vmatpush2.bf16.msra.mxu0 %v2952_v56 }
 0x5ca   :  { %3218 = vmatprep.subr.bf16.mxu0 %v2939_v47  ;;  %v3264_v47 = vrot.slane %v3241_v8, %v4000_v43 }
 0x5cd   :  { %3219 = vmatpush2.bf16.msra.mxu0 %v2938_v41  ;;  %v3360_v41 = vrot.slane %v3329_v62, %v4048_v60 }
 0x5ce   :  { %3220 = vmatprep.subr.bf16.mxu0 %v2925_v40  ;;  %v3268_v40 = vrot.slane %v3241_v8, %v4006_v52 }
 0x5d1   :  { %3221 = vmatpush2.bf16.msra.mxu0 %v2924_v32 }
 0x5d2   :  { %3222 = vmatprep.subr.bf16.mxu0 %v2911_v61 }
 0x5d5   :  { %3223 = vmatpush2.bf16.msra.mxu0 %v2910_v18 }
 0x5d6   :  { %3224 = vmatprep.subr.bf16.mxu0 %v2897_v14  ;;  %v3356_v14 = vrot.slane %v3329_v62, %v4006_v52  ;;  %v3280_v62 = vrot.slane %v3242_v30, %v3956_v44 }
 0x5d9   :  { %3225 = vmatpush2.bf16.msra.mxu0 %v2896_v1 }
 0x5da   :  { %3226 = vmatprep.subr.bf16.mxu0 %v2883_v2 }
 0x5dd   :  { %3227 = vmatpush2.bf16.msra.mxu0 %v2882_v3 }
 0x5de   :  { %3228 = vmatprep.subr.bf16.mxu0 %v2869_v4 }
 0x5e1   :  { %3229 = vmatpush2.bf16.msra.mxu0 %v2868_v5 }
 0x5e2   :  { %3230 = vmatprep.subr.bf16.mxu0 %v2855_v13 }
 0x5e5   :  { %3231 = vmatpush2.bf16.msra.mxu0 %v2854_v6 }
 0x5e8   :  { %3233 = vmatmul.mubr.bf16.vlgmr.msra.gmra.mxu0 %v4145_v50  ;;  %v2988_v15 = vpop.f32.mrf.mxu0  ;;  %v3029_v23 = vpop.f32.mrf.mxu1 }
 0x5e9   :  { %v3315_v33 = vmul.f32 %v3248_v36, %v2988_v15  ;;  %v3317_v24 = vmul.f32 %v3256_v57, %v3029_v23  ;;  %v3330_v15 = vld [vmem:[%s4225_s12 + $0x8] sm:$0x3f]  ;;  %v3284_v23 = vrot.slane %v3242_v30, %v3923_v51  ;;  %s3504_s12 = sshll.u32 %s3727_s11, 4  ;;  %s3505_s12 = int_to_ptr.vmem [resolvable:$true] %s3504_s12 }
 0x5ea   :  { %v2990_v48 = vpop.f32.mrf.mxu0  ;;  %v3031_v46 = vpop.f32.mrf.mxu1  ;;  %s3679_s20 = scalar_lea.vmem %s3505_s12, 448  ;;  %p3684_p8 = scmp.lt.s32.totalorder %s3505_s12, %s3505_s12 }
 0x5eb   :  { %v3316_v39 = vmul.f32 %v3252_v53, %v2990_v48  ;;  %v3318_v19 = vmul.f32 %v3260_v38, %v3031_v46  ;;  %v3403_v0 = vadd.f32 %v3336_v11, %v3315_v33  ;;  %v3405_v7 = vadd.f32 %v3344_v12, %v3317_v24  ;;  %p3680_p7 = scmp.ne.s32.totalorder %s3505_s12, %s3679_s20  ;;  %p3685_p9 = scmp.lt.s32.totalorder %s3679_s20, %s3679_s20 }
 0x5ec   :  { %v2992_v50 = vpop.f32.mrf.mxu0  ;;  %v3033_v27 = vpop.f32.mrf.mxu1  ;;  %v3288_v11 = vrot.slane %v3242_v30, %v3988_v59  ;;  %v3368_v24 = vrot.slane %v3330_v15, %v3956_v44  ;;  %v3376_v46 = vrot.slane %v3330_v15, %v3988_v59 }
 0x5ed   :  { %v3404_v45 = vadd.f32 %v3340_v29, %v3316_v39  ;;  %v3406_v22 = vadd.f32 %v3348_v21, %v3318_v19  ;;  %v3372_v21 = vrot.slane %v3330_v15, %v3923_v51  ;;  %v3380_v19 = vrot.slane %v3330_v15, %v3959_v49  ;;  %p3686_p10 = por %p3685_p9, %p3684_p8 }
 0x5ee   :  { %v2993_v31 = vpop.f32.mrf.mxu0  ;;  %v3034_v35 = vpop.f32.mrf.mxu1  ;;  %v3296_v49 = vrot.slane %v3242_v30, %v4000_v43 }
 0x5ef   :  { %v3431_v42 = vcombine.low %v3403_v0, %v3404_v45  ;;  %v3432_v20 = vcombine.low %v3405_v7, %v3406_v22  ;;  %p3687_p11 = pnand %p3686_p10, %p3680_p7 }
 0x5f1   :  { %v3439_v37 = vrot.slane %v3431_v42, %v4176_v25  ;;  %v3446_v17 = vrot.slane %v3432_v20, %v4176_v25 }
 0x5f3   :  { %v3447_v56 = vcombine.low %v3439_v37, %v3446_v17 }
 0x5f5   :  { %3494 = vst [vmem:[#allocation14] sm:$0xff] %v3447_v56 }
 0x628   :  { %v3070_v32 = vpop.f32.mrf.mxu0  ;;  %v3111_v61 = vpop.f32.mrf.mxu1 }
 0x629   :  { %v3319_v34 = vmul.f32 %v3264_v47, %v3070_v32  ;;  %v3321_v18 = vmul.f32 %v3272_v26, %v3111_v61  ;;  %v3300_v47 = vrot.slane %v3242_v30, %v4006_v52 }
 0x62a   :  { %v3072_v1 = vpop.f32.mrf.mxu0  ;;  %v3113_v2 = vpop.f32.mrf.mxu1 }
 0x62b   :  { %v3407_v55 = vadd.f32 %v3352_v28, %v3319_v34  ;;  %v3409_v3 = vadd.f32 %v3360_v41, %v3321_v18  ;;  %v3320_v4 = vmul.f32 %v3268_v40, %v3072_v1  ;;  %v3322_v9 = vmul.f32 %v3276_v54, %v3113_v2 }
 0x62c   :  { %v3074_v5 = vpop.f32.mrf.mxu0  ;;  %v3115_v60 = vpop.f32.mrf.mxu1  ;;  %v3384_v41 = vrot.slane %v3330_v15, %v4000_v43  ;;  %v3388_v40 = vrot.slane %v3330_v15, %v4006_v52 }
 0x62d   :  { %v3408_v13 = vadd.f32 %v3356_v14, %v3320_v4  ;;  %v3410_v6 = vadd.f32 %v3364_v63, %v3322_v9 }
 0x62e   :  { %v3075_v58 = vpop.f32.mrf.mxu0  ;;  %v3116_v8 = vpop.f32.mrf.mxu1 }
 0x62f   :  { %v3448_v10 = vcombine.low %v3407_v55, %v3408_v13  ;;  %v3449_v36 = vcombine.low %v3409_v3, %v3410_v6 }
 0x631   :  { %v3456_v57 = vrot.slane %v3448_v10, %v4176_v25  ;;  %v3463_v53 = vrot.slane %v3449_v36, %v4176_v25 }
 0x633   :  { %v3464_v38 = vcombine.low %v3456_v57, %v3463_v53 }
 0x635   :  { %3495 = vst [vmem:[#allocation14 + $0x8] sm:$0xff] %v3464_v38 }
 0x668   :  { %v3152_v12 = vpop.f32.mrf.mxu0 }
 0x669   :  { %v3323_v33 = vmul.f32 %v3280_v62, %v3152_v12  ;;  %v3193_v29 = vpop.f32.mrf.mxu1 }
 0x66a   :  { %v3325_v48 = vmul.f32 %v3288_v11, %v3193_v29  ;;  %v3154_v39 = vpop.f32.mrf.mxu0 }
 0x66b   :  { %v3324_v50 = vmul.f32 %v3284_v23, %v3154_v39  ;;  %v3195_v27 = vpop.f32.mrf.mxu1  ;;  %v3411_v45 = vadd.f32 %v3368_v24, %v3323_v33 }
 0x66c   :  { %v3326_v0 = vmul.f32 %v3292_v16, %v3195_v27  ;;  %v3156_v7 = vpop.f32.mrf.mxu0  ;;  %v3413_v35 = vadd.f32 %v3376_v46, %v3325_v48 }
 0x66d   :  { %v3412_v22 = vadd.f32 %v3372_v21, %v3324_v50  ;;  %v3197_v31 = vpop.f32.mrf.mxu1 }
 0x66e   :  { %v3414_v42 = vadd.f32 %v3380_v19, %v3326_v0  ;;  %v3157_v20 = vpop.f32.mrf.mxu0 }
 0x66f   :  { %v3465_v44 = vcombine.low %v3411_v45, %v3412_v22  ;;  %v3198_v37 = vpop.f32.mrf.mxu1 }
 0x670   :  { %v3466_v17 = vcombine.low %v3413_v35, %v3414_v42 }
 0x671   :  { %v3473_v51 = vrot.slane %v3465_v44, %v4176_v25 }
 0x672   :  { %v3480_v59 = vrot.slane %v3466_v17, %v4176_v25 }
 0x674   :  { %v3481_v56 = vcombine.low %v3473_v51, %v3480_v59 }
 0x676   :  { %3496 = vst [vmem:[#allocation14 + $0x10] sm:$0xff] %v3481_v56 }
 0x6a8   :  { %v3234_v26 = vpop.f32.mrf.mxu0 }
 0x6a9   :  { %v3327_v28 = vmul.f32 %v3296_v49, %v3234_v26 }
 0x6aa   :  { %v3236_v54 = vpop.f32.mrf.mxu0 }
 0x6ab   :  { %v3328_v32 = vmul.f32 %v3300_v47, %v3236_v54  ;;  %v3415_v34 = vadd.f32 %v3384_v41, %v3327_v28 }
 0x6ac   :  { %v3238_v61 = vpop.f32.mrf.mxu0 }
 0x6ad   :  { %v3416_v18 = vadd.f32 %v3388_v40, %v3328_v32 }
 0x6ae   :  { %v3239_v25 = vpop.f32.mrf.mxu0 }
 0x6af   :  { %v3482_v14 = vcombine.low %v3415_v34, %v3416_v18 }
 0x6b1   :  { %3516 = vst.sshfl [vmem:[#allocation14 + $0x18] sm:$0x33 pattern:$0x76325410] %v3482_v14 }
 0x6b2   :  { %3690 = shalt.err (!%p3687_p11)
}
 0x6b3   :  { %3507 = dma.vmem_to_hbm [thread:$0]  %s3505_s12, 448, %s4226_s13, [#allocation4]  }
 0x6b4   :  { %3707 = dma.done.wait [#allocation4], 448  }
 0x6b5   :  { %3708 = vsyncadd [#allocation4], 4294966848 }
 0x6b6   :  { %3511 = vsyncpa [#allocation3], 1 }
 0x6b7   :  { %3512 = vsyncpa [#allocation6], 1 }
 0x6b8   :  { %3513 = vsyncpa [#allocation9], 1 }
 0x6b9   :  { %3514 = vsyncpa [#allocation12], 1 }
 0x6ba   :  { %3515 = vsyncpa [#allocation4], 1 }

</bundles_post_ra>
